<compile_context>
chip_gen: v7x
topology: tpu7x:2x2x1
jax: 0.10.0
libtpu: 0.0.40
codegen_flags: <defaults>
</compile_context>

<pallas_src>
import math

import jax
import jax.numpy as jnp
import numpy as np
from jax import lax
from jax.experimental import pallas as pl
from jax.experimental.pallas import tpu as pltpu

_MIB = 1024 * 1024


def _sigmoid(x):
    return 1.0 / (1.0 + jnp.exp(-x))


def _silu(x):
    return x * _sigmoid(x)


def _softplus(x):
    # matches torch.nn.functional.softplus (threshold=20)
    return jnp.where(x > 20.0, x, jnp.log1p(jnp.exp(x)))


def _make_kernel(l_chunk, d_model, d_inner, d_state, d_conv, dt_rank,
                 t_chunk, halo, eps=1e-5):
    n_tchunks = l_chunk // t_chunk

    def kernel(x_ref, w_in_ref, conv_w_ref, vec_inner_ref, w_xproj_ref,
               w_dt_ref, a_t_ref, w_out_ref, vec_model_ref, out_ref,
               h_scr, conv_scr, dt_scr, dtu_scr, bc_scr, y_scr):
        lc = pl.program_id(1)

        # first L-chunk of a sequence -> reset carried scan state + conv halo
        @pl.when(lc == 0)
        def _():
            h_scr[...] = jnp.zeros_like(h_scr)
            conv_scr[...] = jnp.zeros_like(conv_scr)

        x = x_ref[0]                                         # (Lc, d_model) f32

        conv_b = vec_inner_ref[pl.ds(0, 1), :]               # (1, d_inner)
        b_dt = vec_inner_ref[pl.ds(1, 1), :]                 # (1, d_inner)
        d_skip = vec_inner_ref[pl.ds(2, 1), :]               # (1, d_inner)
        gamma = vec_model_ref[pl.ds(0, 1), :]                # (1, d_model)
        beta = vec_model_ref[pl.ds(1, 1), :]                 # (1, d_model)

        # ---- fused in_proj: single (d_model, 2*d_inner) bf16 MXU matmul ----
        xz = jnp.dot(x.astype(jnp.bfloat16), w_in_ref[...],
                     preferred_element_type=jnp.float32)     # (Lc, 2*d_inner)
        xc = xz[:, :d_inner]                                 # conv branch
        z = xz[:, d_inner:]                                  # gate branch

        # ---- causal depthwise conv1d, halo carried across L-chunks ----
        prev = conv_scr[...]                                 # (halo, d_inner)
        xp = jnp.concatenate([prev, xc], axis=0)             # (halo+Lc, d_inner)
        acc = jnp.zeros((l_chunk, d_inner), jnp.float32)
        for k in range(d_conv):
            start = halo - (d_conv - 1) + k
            acc = acc + xp[start:start + l_chunk, :] * conv_w_ref[pl.ds(k, 1), :]
        conv_scr[...] = xc[l_chunk - halo:, :]               # tail for next chunk
        u = _silu(acc + conv_b)                              # (Lc, d_inner)

        # ---- fused x_proj -> [dt_lowrank | B | C | pad] (lane-padded) ----
        dbc = jnp.dot(u.astype(jnp.bfloat16), w_xproj_ref[...],
                      preferred_element_type=jnp.float32)    # (Lc, xw_pad)
        dt_lr = dbc[:, :dt_rank]                             # (Lc, dt_rank)
        bc = dbc[:, dt_rank:dt_rank + 2 * d_state]           # (Lc, 2*d_state)

        if dt_rank == 1:
            dt_pre = dt_lr * w_dt_ref[...]                   # (Lc,1)*(1,d_inner)
        else:
            dt_pre = jnp.dot(dt_lr.astype(jnp.bfloat16),
                             w_dt_ref[...].astype(jnp.bfloat16),
                             preferred_element_type=jnp.float32)
        dt = _softplus(dt_pre + b_dt)                        # (Lc, d_inner)

        # stash fp32 activations for the chunked scan (dt*u precomputed once)
        dt_scr[...] = dt
        dtu_scr[...] = dt * u
        bc_scr[...] = bc

        a_t = a_t_ref[...]                                   # (d_state, d_inner) = -exp(A_log)

        # ---- chunked selective scan: fori over 8-step chunks, carry h ----
        def chunk_body(c, h):
            base = pl.multiple_of(c * t_chunk, t_chunk)
            dt_c = dt_scr[pl.ds(base, t_chunk), :]           # (T, d_inner)
            dtu_c = dtu_scr[pl.ds(base, t_chunk), :]         # (T, d_inner)
            bc_c = bc_scr[pl.ds(base, t_chunk), :]           # (T, 2*d_state)
            bct = bc_c.T                                     # (2S, T) small transpose
            b_col = bct[:d_state, :]                         # (d_state, T)
            c_col = bct[d_state:, :]                         # (d_state, T)
            # whole chunk's dA in one batched exp slab (single big EUP push)
            dA_all = jnp.exp(dt_c[:, None, :] * a_t[None, :, :])  # (T,S,d_inner)
            ys = []
            for t in range(t_chunk):                         # small static unroll
                dBu = dtu_c[t:t + 1, :] * b_col[:, t:t + 1]  # (d_state, d_inner)
                h = dA_all[t] * h + dBu
                ys.append(jnp.sum(h * c_col[:, t:t + 1], axis=0, keepdims=True))
            # single sublane-aligned full-tile store per chunk
            y_scr[pl.ds(base, t_chunk), :] = jnp.concatenate(ys, axis=0)
            return h

        h_final = lax.fori_loop(0, n_tchunks, chunk_body, h_scr[...])
        h_scr[...] = h_final                                 # carry to next L-chunk

        # ---- D skip + SiLU(z) gate + out_proj ----
        y = y_scr[...] + u * d_skip
        y = y * _silu(z)
        out = jnp.dot(y.astype(jnp.bfloat16), w_out_ref[...],
                      preferred_element_type=jnp.float32)    # (Lc, d_model)

        # ---- LayerNorm(d_model) + residual ----
        mean = jnp.mean(out, axis=-1, keepdims=True)
        var = jnp.mean((out - mean) ** 2, axis=-1, keepdims=True)
        normed = (out - mean) * lax.rsqrt(var + eps)
        out_ref[0] = normed * gamma + beta + x

    return kernel


def self_supervised_mamba_forward(x, params, *, d_state, d_conv, expand):
    B, L, d_model = x.shape
    d_inner = expand * d_model
    dt_rank = math.ceil(d_model / 16)

    t_chunk = 8
    halo = 8
    assert d_conv - 1 <= halo, "conv halo buffer assumes d_conv <= 9"

    # L-chunk grid axis: pad L to a multiple of the chunk (causal -> padded
    # rows only affect discarded outputs); chunk size capped at 256 timesteps.
    if L <= 256:
        l_chunk = max(t_chunk, ((L + t_chunk - 1) // t_chunk) * t_chunk)
        l_pad = l_chunk
    else:
        l_chunk = 256
        l_pad = ((L + l_chunk - 1) // l_chunk) * l_chunk
    n_lchunks = l_pad // l_chunk

    x_in = x.astype(jnp.float32)
    if l_pad != L:
        x_in = jnp.concatenate(
            [x_in, jnp.zeros((B, l_pad - L, d_model), jnp.float32)], axis=1)

    bf16 = jnp.bfloat16
    # fused / packed weights (bf16 only for MXU matmul operands)
    w_in = jnp.concatenate([params["w_in_x"], params["w_in_z"]],
                           axis=1).astype(bf16)              # (d_model, 2*d_inner)
    xw = dt_rank + 2 * d_state
    xw_pad = ((xw + 127) // 128) * 128                       # lane-dense width
    w_xproj = jnp.concatenate(
        [params["w_x_dt"], params["w_x_b"], params["w_x_c"]], axis=1)
    if xw_pad != xw:
        w_xproj = jnp.concatenate(
            [w_xproj, jnp.zeros((d_inner, xw_pad - xw), jnp.float32)], axis=1)
    w_xproj = w_xproj.astype(bf16)                           # (d_inner, xw_pad)
    w_out = params["w_out"].astype(bf16)                     # (d_inner, d_model)
    vec_inner = jnp.concatenate(
        [params["conv_b"], params["b_dt"], params["d"]], axis=0)   # (3, d_inner)
    vec_model = jnp.concatenate([params["gamma"], params["beta"]],
                                axis=0)                      # (2, d_model)
    a_t = -jnp.exp(params["a_log_t"])                        # hoisted -exp(A_log)

    weights = [w_in, params["conv_w"], vec_inner, w_xproj, params["w_dt"],
               a_t, w_out, vec_model]

    kernel = _make_kernel(l_chunk, d_model, d_inner, d_state, d_conv, dt_rank,
                          t_chunk, halo)

    # ---- VMEM budget estimate -> scoped limit with headroom ----
    scratch_bytes = 4 * (d_state * d_inner + halo * d_inner
                         + 3 * l_chunk * d_inner + l_chunk * 2 * d_state)
    weight_bytes = sum(int(w.size) * w.dtype.itemsize for w in weights)
    io_bytes = 2 * 2 * l_chunk * d_model * 4                 # double-buffered blocks
    value_bytes = (4 * l_chunk * (8 * d_inner + xw_pad + 2 * d_model)
                   + 4 * 3 * t_chunk * d_state * d_inner)    # live in-kernel values
    est = scratch_bytes + weight_bytes + io_bytes + value_bytes
    try:
        vmem_cap = int(pltpu.get_tpu_info().vmem_capacity_bytes)
    except Exception:
        vmem_cap = 64 * _MIB                                 # v7x-safe fallback
    vmem_limit = int(min(vmem_cap - 4 * _MIB, max(2 * est, 64 * _MIB)))

    def build_and_run(single_buffer_weights):
        def weight_spec(shape):
            nd = len(shape)
            idx = lambda b, l, _nd=nd: (0,) * _nd
            if single_buffer_weights:
                # grid-invariant weights: no double buffering
                return pl.BlockSpec(shape, idx, pipeline_mode=pl.Buffered(1))
            return pl.BlockSpec(shape, idx)

        in_specs = [pl.BlockSpec((1, l_chunk, d_model), lambda b, l: (b, l, 0))]
        in_specs += [weight_spec(w.shape) for w in weights]

        grid_spec = pltpu.PrefetchScalarGridSpec(
            num_scalar_prefetch=0,
            grid=(B, n_lchunks),
            in_specs=in_specs,
            out_specs=pl.BlockSpec((1, l_chunk, d_model), lambda b, l: (b, l, 0)),
            scratch_shapes=[
                pltpu.VMEM((d_state, d_inner), jnp.float32),    # scan state h
                pltpu.VMEM((halo, d_inner), jnp.float32),       # conv halo tail
                pltpu.VMEM((l_chunk, d_inner), jnp.float32),    # dt
                pltpu.VMEM((l_chunk, d_inner), jnp.float32),    # dt*u
                pltpu.VMEM((l_chunk, 2 * d_state), jnp.float32),  # [B | C]
                pltpu.VMEM((l_chunk, d_inner), jnp.float32),    # scan outputs y
            ],
        )
        out = pl.pallas_call(
            kernel,
            out_shape=jax.ShapeDtypeStruct((B, l_pad, d_model), jnp.float32),
            grid_spec=grid_spec,
            compiler_params=pltpu.CompilerParams(
                dimension_semantics=("parallel", "arbitrary"),
                vmem_limit_bytes=vmem_limit),
        )(x_in, *weights)
        return jax.block_until_ready(out)

    try:
        out = build_and_run(True)
    except Exception:
        # pipeline_mode=pl.Buffered(1) unsupported on this JAX build -> default
        out = build_and_run(False)

    if l_pad != L:
        out = out[:, :L, :]
    return out


def init_params(key, d_model, d_state, d_conv, expand):
    d_inner = expand * d_model
    dt_rank = math.ceil(d_model / 16)
    ks = jax.random.split(key, 9)
    s = 0.1
    a = jnp.arange(1, d_state + 1, dtype=jnp.float32)[:, None] * jnp.ones(
        (1, d_inner), jnp.float32)
    return {
        "w_in_x": s * jax.random.normal(ks[0], (d_model, d_inner), jnp.float32),
        "w_in_z": s * jax.random.normal(ks[1], (d_model, d_inner), jnp.float32),
        "conv_w": s * jax.random.normal(ks[2], (d_conv, d_inner), jnp.float32),
        "conv_b": s * jax.random.normal(ks[3], (1, d_inner), jnp.float32),
        "w_x_dt": s * jax.random.normal(ks[4], (d_inner, dt_rank), jnp.float32),
        "w_x_b": s * jax.random.normal(ks[5], (d_inner, d_state), jnp.float32),
        "w_x_c": s * jax.random.normal(ks[6], (d_inner, d_state), jnp.float32),
        "w_dt": s * jax.random.normal(ks[7], (dt_rank, d_inner), jnp.float32),
        "b_dt": jnp.full((1, d_inner), 0.1, jnp.float32),
        "a_log_t": jnp.log(a),                       # (d_state, d_inner)
        "d": jnp.ones((1, d_inner), jnp.float32),
        "w_out": s * jax.random.normal(ks[8], (d_inner, d_model), jnp.float32),
        "gamma": jnp.ones((1, d_model), jnp.float32),
        "beta": jnp.zeros((1, d_model), jnp.float32),
    }


def reference_forward(x, p, *, d_state, d_conv, expand):
    """Pure-JAX fp32 reference mirroring the PyTorch Mamba + LayerNorm + residual."""
    B, L, d_model = x.shape
    d_inner = expand * d_model
    A = -jnp.exp(p["a_log_t"]).T                     # (d_inner, d_state)

    def one(xb):
        xc = xb @ p["w_in_x"]
        z = xb @ p["w_in_z"]
        xp = jnp.concatenate(
            [jnp.zeros((d_conv - 1, d_inner), jnp.float32), xc], axis=0)
        acc = jnp.zeros((L, d_inner), jnp.float32)
        for k in range(d_conv):
            acc = acc + xp[k:k + L] * p["conv_w"][k]
        u = _silu(acc + p["conv_b"])
        dt = _softplus((u @ p["w_x_dt"]) @ p["w_dt"] + p["b_dt"])
        Bm = u @ p["w_x_b"]
        Cm = u @ p["w_x_c"]

        def step(h, inp):
            dt_t, u_t, B_t, C_t = inp
            dA = jnp.exp(dt_t[:, None] * A)
            dBu = dt_t[:, None] * u_t[:, None] * B_t[None, :]
            h = dA * h + dBu
            y = jnp.sum(h * C_t[None, :], axis=-1)
            return h, y

        _, ys = jax.lax.scan(step, jnp.zeros((d_inner, d_state), jnp.float32),
                             (dt, u, Bm, Cm))
        y = ys + u * p["d"]
        y = y * _silu(z)
        out = y @ p["w_out"]
        mean = out.mean(-1, keepdims=True)
        var = ((out - mean) ** 2).mean(-1, keepdims=True)
        normed = (out - mean) * jax.lax.rsqrt(var + 1e-5)
        normed = normed * p["gamma"] + p["beta"]
        return normed + xb

    return jax.vmap(one)(x)


if __name__ == "__main__":
    B, L = 2, 16
    d_model, d_state, d_conv, expand = 16, 8, 4, 2

    root = jax.random.PRNGKey(0)
    k_params, k_x = jax.random.split(root)
    params = init_params(k_params, d_model, d_state, d_conv, expand)
    x = jax.random.normal(k_x, (B, L, d_model), jnp.float32)

    out = self_supervised_mamba_forward(
        x, params, d_state=d_state, d_conv=d_conv, expand=expand)
    out = jax.block_until_ready(out)

    ref = jax.block_until_ready(
        reference_forward(x, params, d_state=d_state, d_conv=d_conv,
                          expand=expand))

    assert out.shape == (B, L, d_model)
    np.testing.assert_allclose(np.asarray(out), np.asarray(ref),
                               rtol=5e-2, atol=5e-2)
    print("KERNEL_OK")
</pallas_src>

<mosaic_0001>
module attributes {stable_mosaic.version = 11 : i64} {
  func.func @kernel(%arg0: i32, %arg1: i32, %arg2: memref<1x16x16xf32, #tpu.memory_space<vmem>>, %arg3: memref<16x64xbf16, #tpu.memory_space<vmem>>, %arg4: memref<4x32xf32, #tpu.memory_space<vmem>>, %arg5: memref<3x32xf32, #tpu.memory_space<vmem>>, %arg6: memref<32x128xbf16, #tpu.memory_space<vmem>>, %arg7: memref<1x32xf32, #tpu.memory_space<vmem>>, %arg8: memref<8x32xf32, #tpu.memory_space<vmem>>, %arg9: memref<32x16xbf16, #tpu.memory_space<vmem>>, %arg10: memref<2x16xf32, #tpu.memory_space<vmem>>, %arg11: memref<1x16x16xf32, #tpu.memory_space<vmem>>, %arg12: memref<8x32xf32, #tpu.memory_space<vmem>>, %arg13: memref<8x32xf32, #tpu.memory_space<vmem>>, %arg14: memref<16x32xf32, #tpu.memory_space<vmem>>, %arg15: memref<16x32xf32, #tpu.memory_space<vmem>>, %arg16: memref<16x16xf32, #tpu.memory_space<vmem>>, %arg17: memref<16x32xf32, #tpu.memory_space<vmem>>) attributes {dimension_semantics = [#tpu.dimension_semantics<parallel>, #tpu.dimension_semantics<arbitrary>], iteration_bounds = array<i64: 2, 1>, scalar_prefetch = 0 : i64, scratch_operands = 6 : i64, tpu.core_type = #tpu.core_type<tc>, window_params = [{transform_indices = @transform_0, window_bounds = array<i64: 1, 16, 16>}, {pipeline_mode = #tpu.pipeline_mode<synchronous>, transform_indices = @transform_1, window_bounds = array<i64: 16, 64>}, {pipeline_mode = #tpu.pipeline_mode<synchronous>, transform_indices = @transform_2, window_bounds = array<i64: 4, 32>}, {pipeline_mode = #tpu.pipeline_mode<synchronous>, transform_indices = @transform_3, window_bounds = array<i64: 3, 32>}, {pipeline_mode = #tpu.pipeline_mode<synchronous>, transform_indices = @transform_4, window_bounds = array<i64: 32, 128>}, {pipeline_mode = #tpu.pipeline_mode<synchronous>, transform_indices = @transform_5, window_bounds = array<i64: 1, 32>}, {pipeline_mode = #tpu.pipeline_mode<synchronous>, transform_indices = @transform_6, window_bounds = array<i64: 8, 32>}, {pipeline_mode = #tpu.pipeline_mode<synchronous>, transform_indices = @transform_7, window_bounds = array<i64: 32, 16>}, {pipeline_mode = #tpu.pipeline_mode<synchronous>, transform_indices = @transform_8, window_bounds = array<i64: 2, 16>}, {transform_indices = @transform_9, window_bounds = array<i64: 1, 16, 16>}]} {
    %c0_i32 = arith.constant 0 : i32
    %0 = arith.cmpi eq, %arg1, %c0_i32 : i32
    %1 = arith.extui %0 : i1 to i32
    %c0_i32_0 = arith.constant 0 : i32
    %2 = arith.cmpi ne, %1, %c0_i32_0 : i32
    scf.if %2 {
      %cst_64 = arith.constant 0.000000e+00 : f32
      %117 = vector.broadcast %cst_64 : f32 to vector<8x32xf32>
      %c0_65 = arith.constant 0 : index
      %c0_66 = arith.constant 0 : index
      %118 = vector.load %arg12[%c0_65, %c0_66] : memref<8x32xf32, #tpu.memory_space<vmem>>, vector<8x32xf32>
      tpu.vector_store %arg12[%c0_65, %c0_66], %117 {strides = array<i32>} : memref<8x32xf32, #tpu.memory_space<vmem>>, vector<8x32xf32>,
      %cst_67 = arith.constant 0.000000e+00 : f32
      %119 = vector.broadcast %cst_67 : f32 to vector<8x32xf32>
      %c0_68 = arith.constant 0 : index
      %c0_69 = arith.constant 0 : index
      %120 = vector.load %arg13[%c0_68, %c0_69] : memref<8x32xf32, #tpu.memory_space<vmem>>, vector<8x32xf32>
      tpu.vector_store %arg13[%c0_68, %c0_69], %119 {strides = array<i32>} : memref<8x32xf32, #tpu.memory_space<vmem>>, vector<8x32xf32>,
    } else {
    }
    %c0 = arith.constant 0 : index
    %c0_1 = arith.constant 0 : index
    %c0_2 = arith.constant 0 : index
    %3 = vector.load %arg2[%c0, %c0_1, %c0_2] : memref<1x16x16xf32, #tpu.memory_space<vmem>>, vector<1x16x16xf32>
    %4 = vector.shape_cast %3 : vector<1x16x16xf32> to vector<16x16xf32>
    %c0_3 = arith.constant 0 : index
    %c0_4 = arith.constant 0 : index
    %5 = vector.load %arg5[%c0_3, %c0_4] : memref<3x32xf32, #tpu.memory_space<vmem>>, vector<1x32xf32>
    %c1 = arith.constant 1 : index
    %c0_5 = arith.constant 0 : index
    %6 = vector.load %arg5[%c1, %c0_5] : memref<3x32xf32, #tpu.memory_space<vmem>>, vector<1x32xf32>
    %c2 = arith.constant 2 : index
    %c0_6 = arith.constant 0 : index
    %7 = vector.load %arg5[%c2, %c0_6] : memref<3x32xf32, #tpu.memory_space<vmem>>, vector<1x32xf32>
    %c0_7 = arith.constant 0 : index
    %c0_8 = arith.constant 0 : index
    %8 = vector.load %arg10[%c0_7, %c0_8] : memref<2x16xf32, #tpu.memory_space<vmem>>, vector<1x16xf32>
    %c1_9 = arith.constant 1 : index
    %c0_10 = arith.constant 0 : index
    %9 = vector.load %arg10[%c1_9, %c0_10] : memref<2x16xf32, #tpu.memory_space<vmem>>, vector<1x16xf32>
    %10 = arith.truncf %4 : vector<16x16xf32> to vector<16x16xbf16>
    %c0_11 = arith.constant 0 : index
    %c0_12 = arith.constant 0 : index
    %11 = vector.load %arg3[%c0_11, %c0_12] : memref<16x64xbf16, #tpu.memory_space<vmem>>, vector<16x64xbf16>
    %cst = arith.constant dense<0.000000e+00> : vector<16x64xf32>
    %12 = tpu.matmul %10, %11, %cst {dimension_numbers = #tpu.dot_dimension_numbers<[1], [0], [0], [1], [0, 0, 1, 1], [], []>} : vector<16x16xbf16>, vector<16x64xbf16>, vector<16x64xf32> -> vector<16x64xf32>
    %13 = vector.extract_strided_slice %12 {offsets = [0, 0], sizes = [16, 32], strides = [1, 1]} : vector<16x64xf32> to vector<16x32xf32>
    %14 = vector.extract_strided_slice %12 {offsets = [0, 32], sizes = [16, 32], strides = [1, 1]} : vector<16x64xf32> to vector<16x32xf32>
    %c0_13 = arith.constant 0 : index
    %c0_14 = arith.constant 0 : index
    %15 = vector.load %arg13[%c0_13, %c0_14] : memref<8x32xf32, #tpu.memory_space<vmem>>, vector<8x32xf32>
    %16 = tpu.concatenate %15, %13 in 0 : vector<8x32xf32>, vector<16x32xf32> -> vector<24x32xf32>
    %cst_15 = arith.constant 0.000000e+00 : f32
    %17 = vector.broadcast %cst_15 : f32 to vector<16x32xf32>
    %18 = vector.extract_strided_slice %16 {offsets = [5, 0], sizes = [16, 32], strides = [1, 1]} : vector<24x32xf32> to vector<16x32xf32>
    %c0_16 = arith.constant 0 : index
    %c0_17 = arith.constant 0 : index
    %19 = vector.load %arg4[%c0_16, %c0_17] : memref<4x32xf32, #tpu.memory_space<vmem>>, vector<1x32xf32>
    %20 = vector.broadcast %19 : vector<1x32xf32> to vector<16x32xf32>
    %21 = arith.mulf %18, %20 : vector<16x32xf32>
    %22 = arith.addf %17, %21 : vector<16x32xf32>
    %23 = vector.extract_strided_slice %16 {offsets = [6, 0], sizes = [16, 32], strides = [1, 1]} : vector<24x32xf32> to vector<16x32xf32>
    %c1_18 = arith.constant 1 : index
    %c0_19 = arith.constant 0 : index
    %24 = vector.load %arg4[%c1_18, %c0_19] : memref<4x32xf32, #tpu.memory_space<vmem>>, vector<1x32xf32>
    %25 = vector.broadcast %24 : vector<1x32xf32> to vector<16x32xf32>
    %26 = arith.mulf %23, %25 : vector<16x32xf32>
    %27 = arith.addf %22, %26 : vector<16x32xf32>
    %28 = vector.extract_strided_slice %16 {offsets = [7, 0], sizes = [16, 32], strides = [1, 1]} : vector<24x32xf32> to vector<16x32xf32>
    %c2_20 = arith.constant 2 : index
    %c0_21 = arith.constant 0 : index
    %29 = vector.load %arg4[%c2_20, %c0_21] : memref<4x32xf32, #tpu.memory_space<vmem>>, vector<1x32xf32>
    %30 = vector.broadcast %29 : vector<1x32xf32> to vector<16x32xf32>
    %31 = arith.mulf %28, %30 : vector<16x32xf32>
    %32 = arith.addf %27, %31 : vector<16x32xf32>
    %33 = vector.extract_strided_slice %16 {offsets = [8, 0], sizes = [16, 32], strides = [1, 1]} : vector<24x32xf32> to vector<16x32xf32>
    %c3 = arith.constant 3 : index
    %c0_22 = arith.constant 0 : index
    %34 = vector.load %arg4[%c3, %c0_22] : memref<4x32xf32, #tpu.memory_space<vmem>>, vector<1x32xf32>
    %35 = vector.broadcast %34 : vector<1x32xf32> to vector<16x32xf32>
    %36 = arith.mulf %33, %35 : vector<16x32xf32>
    %37 = arith.addf %32, %36 : vector<16x32xf32>
    %38 = vector.extract_strided_slice %13 {offsets = [8, 0], sizes = [8, 32], strides = [1, 1]} : vector<16x32xf32> to vector<8x32xf32>
    %c0_23 = arith.constant 0 : index
    %c0_24 = arith.constant 0 : index
    %39 = vector.load %arg13[%c0_23, %c0_24] : memref<8x32xf32, #tpu.memory_space<vmem>>, vector<8x32xf32>
    tpu.vector_store %arg13[%c0_23, %c0_24], %38 {strides = array<i32>} : memref<8x32xf32, #tpu.memory_space<vmem>>, vector<8x32xf32>,
    %40 = vector.broadcast %5 : vector<1x32xf32> to vector<16x32xf32>
    %41 = arith.addf %37, %40 : vector<16x32xf32>
    %cst_25 = arith.constant 0.000000e+00 : f32
    %42 = vector.broadcast %cst_25 : f32 to vector<16x32xf32>
    %43 = arith.subf %42, %41 : vector<16x32xf32>
    %44 = math.exp %43 : vector<16x32xf32>
    %cst_26 = arith.constant 1.000000e+00 : f32
    %45 = vector.broadcast %cst_26 : f32 to vector<16x32xf32>
    %46 = arith.addf %45, %44 : vector<16x32xf32>
    %cst_27 = arith.constant 1.000000e+00 : f32
    %47 = vector.broadcast %cst_27 : f32 to vector<16x32xf32>
    %48 = arith.divf %47, %46 : vector<16x32xf32>
    %49 = arith.mulf %41, %48 : vector<16x32xf32>
    %50 = arith.truncf %49 : vector<16x32xf32> to vector<16x32xbf16>
    %c0_28 = arith.constant 0 : index
    %c0_29 = arith.constant 0 : index
    %51 = vector.load %arg6[%c0_28, %c0_29] : memref<32x128xbf16, #tpu.memory_space<vmem>>, vector<32x128xbf16>
    %cst_30 = arith.constant dense<0.000000e+00> : vector<16x128xf32>
    %52 = tpu.matmul %50, %51, %cst_30 {dimension_numbers = #tpu.dot_dimension_numbers<[1], [0], [0], [1], [0, 0, 1, 1], [], []>} : vector<16x32xbf16>, vector<32x128xbf16>, vector<16x128xf32> -> vector<16x128xf32>
    %53 = vector.extract_strided_slice %52 {offsets = [0, 0], sizes = [16, 1], strides = [1, 1]} : vector<16x128xf32> to vector<16x1xf32>
    %54 = vector.extract_strided_slice %52 {offsets = [0, 1], sizes = [16, 16], strides = [1, 1]} : vector<16x128xf32> to vector<16x16xf32>
    %c0_31 = arith.constant 0 : index
    %c0_32 = arith.constant 0 : index
    %55 = vector.load %arg7[%c0_31, %c0_32] : memref<1x32xf32, #tpu.memory_space<vmem>>, vector<1x32xf32>
    %56 = vector.broadcast %53 : vector<16x1xf32> to vector<16x32xf32>
    %57 = vector.broadcast %55 : vector<1x32xf32> to vector<16x32xf32>
    %58 = arith.mulf %56, %57 : vector<16x32xf32>
    %59 = vector.broadcast %6 : vector<1x32xf32> to vector<16x32xf32>
    %60 = arith.addf %58, %59 : vector<16x32xf32>
    %cst_33 = arith.constant 2.000000e+01 : f32
    %61 = vector.broadcast %cst_33 : f32 to vector<16x32xf32>
    %62 = arith.cmpf ogt, %60, %61 : vector<16x32xf32>
    %63 = math.exp %60 : vector<16x32xf32>
    %64 = math.log1p %63 : vector<16x32xf32>
    %65 = arith.select %62, %60, %64 : vector<16x32xi1>, vector<16x32xf32>
    %c0_34 = arith.constant 0 : index
    %c0_35 = arith.constant 0 : index
    %66 = vector.load %arg14[%c0_34, %c0_35] : memref<16x32xf32, #tpu.memory_space<vmem>>, vector<16x32xf32>
    tpu.vector_store %arg14[%c0_34, %c0_35], %65 {strides = array<i32>} : memref<16x32xf32, #tpu.memory_space<vmem>>, vector<16x32xf32>,
    %67 = arith.mulf %65, %49 : vector<16x32xf32>
    %c0_36 = arith.constant 0 : index
    %c0_37 = arith.constant 0 : index
    %68 = vector.load %arg15[%c0_36, %c0_37] : memref<16x32xf32, #tpu.memory_space<vmem>>, vector<16x32xf32>
    tpu.vector_store %arg15[%c0_36, %c0_37], %67 {strides = array<i32>} : memref<16x32xf32, #tpu.memory_space<vmem>>, vector<16x32xf32>,
    %c0_38 = arith.constant 0 : index
    %c0_39 = arith.constant 0 : index
    %69 = vector.load %arg16[%c0_38, %c0_39] : memref<16x16xf32, #tpu.memory_space<vmem>>, vector<16x16xf32>
    tpu.vector_store %arg16[%c0_38, %c0_39], %54 {strides = array<i32>} : memref<16x16xf32, #tpu.memory_space<vmem>>, vector<16x16xf32>,
    %c0_40 = arith.constant 0 : index
    %c0_41 = arith.constant 0 : index
    %70 = vector.load %arg8[%c0_40, %c0_41] : memref<8x32xf32, #tpu.memory_space<vmem>>, vector<8x32xf32>
    %c0_42 = arith.constant 0 : index
    %c0_43 = arith.constant 0 : index
    %71 = vector.load %arg12[%c0_42, %c0_43] : memref<8x32xf32, #tpu.memory_space<vmem>>, vector<8x32xf32>
    %c0_i32_44 = arith.constant 0 : i32
    %c2_i32 = arith.constant 2 : i32
    %72 = arith.addi %c0_i32_44, %c2_i32 : i32
    %c1_i32 = arith.constant 1 : i32
    %73 = scf.for %arg18 = %c0_i32_44 to %72 step %c1_i32 iter_args(%arg19 = %71) -> (vector<8x32xf32>)  : i32 {
      %c8_i32 = arith.constant 8 : i32
      %117 = arith.muli %arg18, %c8_i32 : i32
      %118 = tpu.assume_multiple %117, 8 : i32
      %119 = arith.index_cast %118 : i32 to index
      %c0_64 = arith.constant 0 : index
      %120 = vector.load %arg14[%119, %c0_64] : memref<16x32xf32, #tpu.memory_space<vmem>>, vector<8x32xf32>
      %121 = arith.index_cast %118 : i32 to index
      %c0_65 = arith.constant 0 : index
      %122 = vector.load %arg15[%121, %c0_65] : memref<16x32xf32, #tpu.memory_space<vmem>>, vector<8x32xf32>
      %123 = arith.index_cast %118 : i32 to index
      %c0_66 = arith.constant 0 : index
      %124 = vector.load %arg16[%123, %c0_66] : memref<16x16xf32, #tpu.memory_space<vmem>>, vector<8x16xf32>
      %125 = tpu.transpose %124, [1, 0] : vector<8x16xf32> -> vector<16x8xf32>
      %126 = vector.extract_strided_slice %125 {offsets = [0, 0], sizes = [8, 8], strides = [1, 1]} : vector<16x8xf32> to vector<8x8xf32>
      %127 = vector.extract_strided_slice %125 {offsets = [8, 0], sizes = [8, 8], strides = [1, 1]} : vector<16x8xf32> to vector<8x8xf32>
      %128 = vector.shape_cast %120 : vector<8x32xf32> to vector<8x1x32xf32>
      %129 = vector.shape_cast %70 : vector<8x32xf32> to vector<1x8x32xf32>
      %130 = vector.broadcast %128 : vector<8x1x32xf32> to vector<8x8x32xf32>
      %131 = vector.broadcast %129 : vector<1x8x32xf32> to vector<8x8x32xf32>
      %132 = arith.mulf %130, %131 : vector<8x8x32xf32>
      %133 = math.exp %132 : vector<8x8x32xf32>
      %134 = vector.extract_strided_slice %122 {offsets = [0, 0], sizes = [1, 32], strides = [1, 1]} : vector<8x32xf32> to vector<1x32xf32>
      %135 = vector.extract_strided_slice %126 {offsets = [0, 0], sizes = [8, 1], strides = [1, 1]} : vector<8x8xf32> to vector<8x1xf32>
      %136 = vector.broadcast %134 : vector<1x32xf32> to vector<8x32xf32>
      %137 = vector.broadcast %135 : vector<8x1xf32> to vector<8x32xf32>
      %138 = arith.mulf %136, %137 : vector<8x32xf32>
      %139 = vector.extract_strided_slice %133 {offsets = [0, 0, 0], sizes = [1, 8, 32], strides = [1, 1, 1]} : vector<8x8x32xf32> to vector<1x8x32xf32>
      %140 = vector.shape_cast %139 : vector<1x8x32xf32> to vector<8x32xf32>
      %141 = arith.mulf %140, %arg19 : vector<8x32xf32>
      %142 = arith.addf %141, %138 : vector<8x32xf32>
      %143 = vector.extract_strided_slice %127 {offsets = [0, 0], sizes = [8, 1], strides = [1, 1]} : vector<8x8xf32> to vector<8x1xf32>
      %144 = vector.broadcast %143 : vector<8x1xf32> to vector<8x32xf32>
      %145 = arith.mulf %142, %144 : vector<8x32xf32>
      %cst_67 = arith.constant dense<0.000000e+00> : vector<32xf32>
      %146 = vector.multi_reduction <add>, %145, %cst_67 [0] : vector<8x32xf32> to vector<32xf32>
      %147 = vector.shape_cast %146 : vector<32xf32> to vector<1x32xf32>
      %148 = vector.extract_strided_slice %122 {offsets = [1, 0], sizes = [1, 32], strides = [1, 1]} : vector<8x32xf32> to vector<1x32xf32>
      %149 = vector.extract_strided_slice %126 {offsets = [0, 1], sizes = [8, 1], strides = [1, 1]} : vector<8x8xf32> to vector<8x1xf32>
      %150 = vector.broadcast %148 : vector<1x32xf32> to vector<8x32xf32>
      %151 = vector.broadcast %149 : vector<8x1xf32> to vector<8x32xf32>
      %152 = arith.mulf %150, %151 : vector<8x32xf32>
      %153 = vector.extract_strided_slice %133 {offsets = [1, 0, 0], sizes = [1, 8, 32], strides = [1, 1, 1]} : vector<8x8x32xf32> to vector<1x8x32xf32>
      %154 = vector.shape_cast %153 : vector<1x8x32xf32> to vector<8x32xf32>
      %155 = arith.mulf %154, %142 : vector<8x32xf32>
      %156 = arith.addf %155, %152 : vector<8x32xf32>
      %157 = vector.extract_strided_slice %127 {offsets = [0, 1], sizes = [8, 1], strides = [1, 1]} : vector<8x8xf32> to vector<8x1xf32>
      %158 = vector.broadcast %157 : vector<8x1xf32> to vector<8x32xf32>
      %159 = arith.mulf %156, %158 : vector<8x32xf32>
      %cst_68 = arith.constant dense<0.000000e+00> : vector<32xf32>
      %160 = vector.multi_reduction <add>, %159, %cst_68 [0] : vector<8x32xf32> to vector<32xf32>
      %161 = vector.shape_cast %160 : vector<32xf32> to vector<1x32xf32>
      %162 = vector.extract_strided_slice %122 {offsets = [2, 0], sizes = [1, 32], strides = [1, 1]} : vector<8x32xf32> to vector<1x32xf32>
      %163 = vector.extract_strided_slice %126 {offsets = [0, 2], sizes = [8, 1], strides = [1, 1]} : vector<8x8xf32> to vector<8x1xf32>
      %164 = vector.broadcast %162 : vector<1x32xf32> to vector<8x32xf32>
      %165 = vector.broadcast %163 : vector<8x1xf32> to vector<8x32xf32>
      %166 = arith.mulf %164, %165 : vector<8x32xf32>
      %167 = vector.extract_strided_slice %133 {offsets = [2, 0, 0], sizes = [1, 8, 32], strides = [1, 1, 1]} : vector<8x8x32xf32> to vector<1x8x32xf32>
      %168 = vector.shape_cast %167 : vector<1x8x32xf32> to vector<8x32xf32>
      %169 = arith.mulf %168, %156 : vector<8x32xf32>
      %170 = arith.addf %169, %166 : vector<8x32xf32>
      %171 = vector.extract_strided_slice %127 {offsets = [0, 2], sizes = [8, 1], strides = [1, 1]} : vector<8x8xf32> to vector<8x1xf32>
      %172 = vector.broadcast %171 : vector<8x1xf32> to vector<8x32xf32>
      %173 = arith.mulf %170, %172 : vector<8x32xf32>
      %cst_69 = arith.constant dense<0.000000e+00> : vector<32xf32>
      %174 = vector.multi_reduction <add>, %173, %cst_69 [0] : vector<8x32xf32> to vector<32xf32>
      %175 = vector.shape_cast %174 : vector<32xf32> to vector<1x32xf32>
      %176 = vector.extract_strided_slice %122 {offsets = [3, 0], sizes = [1, 32], strides = [1, 1]} : vector<8x32xf32> to vector<1x32xf32>
      %177 = vector.extract_strided_slice %126 {offsets = [0, 3], sizes = [8, 1], strides = [1, 1]} : vector<8x8xf32> to vector<8x1xf32>
      %178 = vector.broadcast %176 : vector<1x32xf32> to vector<8x32xf32>
      %179 = vector.broadcast %177 : vector<8x1xf32> to vector<8x32xf32>
      %180 = arith.mulf %178, %179 : vector<8x32xf32>
      %181 = vector.extract_strided_slice %133 {offsets = [3, 0, 0], sizes = [1, 8, 32], strides = [1, 1, 1]} : vector<8x8x32xf32> to vector<1x8x32xf32>
      %182 = vector.shape_cast %181 : vector<1x8x32xf32> to vector<8x32xf32>
      %183 = arith.mulf %182, %170 : vector<8x32xf32>
      %184 = arith.addf %183, %180 : vector<8x32xf32>
      %185 = vector.extract_strided_slice %127 {offsets = [0, 3], sizes = [8, 1], strides = [1, 1]} : vector<8x8xf32> to vector<8x1xf32>
      %186 = vector.broadcast %185 : vector<8x1xf32> to vector<8x32xf32>
      %187 = arith.mulf %184, %186 : vector<8x32xf32>
      %cst_70 = arith.constant dense<0.000000e+00> : vector<32xf32>
      %188 = vector.multi_reduction <add>, %187, %cst_70 [0] : vector<8x32xf32> to vector<32xf32>
      %189 = vector.shape_cast %188 : vector<32xf32> to vector<1x32xf32>
      %190 = vector.extract_strided_slice %122 {offsets = [4, 0], sizes = [1, 32], strides = [1, 1]} : vector<8x32xf32> to vector<1x32xf32>
      %191 = vector.extract_strided_slice %126 {offsets = [0, 4], sizes = [8, 1], strides = [1, 1]} : vector<8x8xf32> to vector<8x1xf32>
      %192 = vector.broadcast %190 : vector<1x32xf32> to vector<8x32xf32>
      %193 = vector.broadcast %191 : vector<8x1xf32> to vector<8x32xf32>
      %194 = arith.mulf %192, %193 : vector<8x32xf32>
      %195 = vector.extract_strided_slice %133 {offsets = [4, 0, 0], sizes = [1, 8, 32], strides = [1, 1, 1]} : vector<8x8x32xf32> to vector<1x8x32xf32>
      %196 = vector.shape_cast %195 : vector<1x8x32xf32> to vector<8x32xf32>
      %197 = arith.mulf %196, %184 : vector<8x32xf32>
      %198 = arith.addf %197, %194 : vector<8x32xf32>
      %199 = vector.extract_strided_slice %127 {offsets = [0, 4], sizes = [8, 1], strides = [1, 1]} : vector<8x8xf32> to vector<8x1xf32>
      %200 = vector.broadcast %199 : vector<8x1xf32> to vector<8x32xf32>
      %201 = arith.mulf %198, %200 : vector<8x32xf32>
      %cst_71 = arith.constant dense<0.000000e+00> : vector<32xf32>
      %202 = vector.multi_reduction <add>, %201, %cst_71 [0] : vector<8x32xf32> to vector<32xf32>
      %203 = vector.shape_cast %202 : vector<32xf32> to vector<1x32xf32>
      %204 = vector.extract_strided_slice %122 {offsets = [5, 0], sizes = [1, 32], strides = [1, 1]} : vector<8x32xf32> to vector<1x32xf32>
      %205 = vector.extract_strided_slice %126 {offsets = [0, 5], sizes = [8, 1], strides = [1, 1]} : vector<8x8xf32> to vector<8x1xf32>
      %206 = vector.broadcast %204 : vector<1x32xf32> to vector<8x32xf32>
      %207 = vector.broadcast %205 : vector<8x1xf32> to vector<8x32xf32>
      %208 = arith.mulf %206, %207 : vector<8x32xf32>
      %209 = vector.extract_strided_slice %133 {offsets = [5, 0, 0], sizes = [1, 8, 32], strides = [1, 1, 1]} : vector<8x8x32xf32> to vector<1x8x32xf32>
      %210 = vector.shape_cast %209 : vector<1x8x32xf32> to vector<8x32xf32>
      %211 = arith.mulf %210, %198 : vector<8x32xf32>
      %212 = arith.addf %211, %208 : vector<8x32xf32>
      %213 = vector.extract_strided_slice %127 {offsets = [0, 5], sizes = [8, 1], strides = [1, 1]} : vector<8x8xf32> to vector<8x1xf32>
      %214 = vector.broadcast %213 : vector<8x1xf32> to vector<8x32xf32>
      %215 = arith.mulf %212, %214 : vector<8x32xf32>
      %cst_72 = arith.constant dense<0.000000e+00> : vector<32xf32>
      %216 = vector.multi_reduction <add>, %215, %cst_72 [0] : vector<8x32xf32> to vector<32xf32>
      %217 = vector.shape_cast %216 : vector<32xf32> to vector<1x32xf32>
      %218 = vector.extract_strided_slice %122 {offsets = [6, 0], sizes = [1, 32], strides = [1, 1]} : vector<8x32xf32> to vector<1x32xf32>
      %219 = vector.extract_strided_slice %126 {offsets = [0, 6], sizes = [8, 1], strides = [1, 1]} : vector<8x8xf32> to vector<8x1xf32>
      %220 = vector.broadcast %218 : vector<1x32xf32> to vector<8x32xf32>
      %221 = vector.broadcast %219 : vector<8x1xf32> to vector<8x32xf32>
      %222 = arith.mulf %220, %221 : vector<8x32xf32>
      %223 = vector.extract_strided_slice %133 {offsets = [6, 0, 0], sizes = [1, 8, 32], strides = [1, 1, 1]} : vector<8x8x32xf32> to vector<1x8x32xf32>
      %224 = vector.shape_cast %223 : vector<1x8x32xf32> to vector<8x32xf32>
      %225 = arith.mulf %224, %212 : vector<8x32xf32>
      %226 = arith.addf %225, %222 : vector<8x32xf32>
      %227 = vector.extract_strided_slice %127 {offsets = [0, 6], sizes = [8, 1], strides = [1, 1]} : vector<8x8xf32> to vector<8x1xf32>
      %228 = vector.broadcast %227 : vector<8x1xf32> to vector<8x32xf32>
      %229 = arith.mulf %226, %228 : vector<8x32xf32>
      %cst_73 = arith.constant dense<0.000000e+00> : vector<32xf32>
      %230 = vector.multi_reduction <add>, %229, %cst_73 [0] : vector<8x32xf32> to vector<32xf32>
      %231 = vector.shape_cast %230 : vector<32xf32> to vector<1x32xf32>
      %232 = vector.extract_strided_slice %122 {offsets = [7, 0], sizes = [1, 32], strides = [1, 1]} : vector<8x32xf32> to vector<1x32xf32>
      %233 = vector.extract_strided_slice %126 {offsets = [0, 7], sizes = [8, 1], strides = [1, 1]} : vector<8x8xf32> to vector<8x1xf32>
      %234 = vector.broadcast %232 : vector<1x32xf32> to vector<8x32xf32>
      %235 = vector.broadcast %233 : vector<8x1xf32> to vector<8x32xf32>
      %236 = arith.mulf %234, %235 : vector<8x32xf32>
      %237 = vector.extract_strided_slice %133 {offsets = [7, 0, 0], sizes = [1, 8, 32], strides = [1, 1, 1]} : vector<8x8x32xf32> to vector<1x8x32xf32>
      %238 = vector.shape_cast %237 : vector<1x8x32xf32> to vector<8x32xf32>
      %239 = arith.mulf %238, %226 : vector<8x32xf32>
      %240 = arith.addf %239, %236 : vector<8x32xf32>
      %241 = vector.extract_strided_slice %127 {offsets = [0, 7], sizes = [8, 1], strides = [1, 1]} : vector<8x8xf32> to vector<8x1xf32>
      %242 = vector.broadcast %241 : vector<8x1xf32> to vector<8x32xf32>
      %243 = arith.mulf %240, %242 : vector<8x32xf32>
      %cst_74 = arith.constant dense<0.000000e+00> : vector<32xf32>
      %244 = vector.multi_reduction <add>, %243, %cst_74 [0] : vector<8x32xf32> to vector<32xf32>
      %245 = vector.shape_cast %244 : vector<32xf32> to vector<1x32xf32>
      %246 = tpu.concatenate %147, %161, %175, %189, %203, %217, %231, %245 in 0 : vector<1x32xf32>, vector<1x32xf32>, vector<1x32xf32>, vector<1x32xf32>, vector<1x32xf32>, vector<1x32xf32>, vector<1x32xf32>, vector<1x32xf32> -> vector<8x32xf32>
      %247 = arith.index_cast %118 : i32 to index
      %c0_75 = arith.constant 0 : index
      %248 = vector.load %arg17[%247, %c0_75] : memref<16x32xf32, #tpu.memory_space<vmem>>, vector<8x32xf32>
      tpu.vector_store %arg17[%247, %c0_75], %246 {strides = array<i32>} : memref<16x32xf32, #tpu.memory_space<vmem>>, vector<8x32xf32>,
      scf.yield %240 : vector<8x32xf32>
    }
    %c2_i32_45 = arith.constant 2 : i32
    %c0_46 = arith.constant 0 : index
    %c0_47 = arith.constant 0 : index
    %74 = vector.load %arg12[%c0_46, %c0_47] : memref<8x32xf32, #tpu.memory_space<vmem>>, vector<8x32xf32>
    tpu.vector_store %arg12[%c0_46, %c0_47], %73 {strides = array<i32>} : memref<8x32xf32, #tpu.memory_space<vmem>>, vector<8x32xf32>,
    %c0_48 = arith.constant 0 : index
    %c0_49 = arith.constant 0 : index
    %75 = vector.load %arg17[%c0_48, %c0_49] : memref<16x32xf32, #tpu.memory_space<vmem>>, vector<16x32xf32>
    %76 = vector.broadcast %7 : vector<1x32xf32> to vector<16x32xf32>
    %77 = arith.mulf %49, %76 : vector<16x32xf32>
    %78 = arith.addf %75, %77 : vector<16x32xf32>
    %cst_50 = arith.constant 0.000000e+00 : f32
    %79 = vector.broadcast %cst_50 : f32 to vector<16x32xf32>
    %80 = arith.subf %79, %14 : vector<16x32xf32>
    %81 = math.exp %80 : vector<16x32xf32>
    %cst_51 = arith.constant 1.000000e+00 : f32
    %82 = vector.broadcast %cst_51 : f32 to vector<16x32xf32>
    %83 = arith.addf %82, %81 : vector<16x32xf32>
    %cst_52 = arith.constant 1.000000e+00 : f32
    %84 = vector.broadcast %cst_52 : f32 to vector<16x32xf32>
    %85 = arith.divf %84, %83 : vector<16x32xf32>
    %86 = arith.mulf %14, %85 : vector<16x32xf32>
    %87 = arith.mulf %78, %86 : vector<16x32xf32>
    %88 = arith.truncf %87 : vector<16x32xf32> to vector<16x32xbf16>
    %c0_53 = arith.constant 0 : index
    %c0_54 = arith.constant 0 : index
    %89 = vector.load %arg9[%c0_53, %c0_54] : memref<32x16xbf16, #tpu.memory_space<vmem>>, vector<32x16xbf16>
    %cst_55 = arith.constant dense<0.000000e+00> : vector<16x16xf32>
    %90 = tpu.matmul %88, %89, %cst_55 {dimension_numbers = #tpu.dot_dimension_numbers<[1], [0], [0], [1], [0, 0, 1, 1], [], []>} : vector<16x32xbf16>, vector<32x16xbf16>, vector<16x16xf32> -> vector<16x16xf32>
    %cst_56 = arith.constant dense<0.000000e+00> : vector<16xf32>
    %91 = vector.multi_reduction <add>, %90, %cst_56 [1] : vector<16x16xf32> to vector<16xf32>
    %92 = vector.shape_cast %91 : vector<16xf32> to vector<16x1xf32>
    %cst_57 = arith.constant 1.600000e+01 : f32
    %93 = vector.broadcast %cst_57 : f32 to vector<16x1xf32>
    %94 = arith.divf %92, %93 : vector<16x1xf32>
    %95 = vector.broadcast %94 : vector<16x1xf32> to vector<16x16xf32>
    %96 = arith.subf %90, %95 : vector<16x16xf32>
    %97 = arith.mulf %96, %96 : vector<16x16xf32>
    %cst_58 = arith.constant dense<0.000000e+00> : vector<16xf32>
    %98 = vector.multi_reduction <add>, %97, %cst_58 [1] : vector<16x16xf32> to vector<16xf32>
    %99 = vector.shape_cast %98 : vector<16xf32> to vector<16x1xf32>
    %cst_59 = arith.constant 1.600000e+01 : f32
    %100 = vector.broadcast %cst_59 : f32 to vector<16x1xf32>
    %101 = arith.divf %99, %100 : vector<16x1xf32>
    %102 = vector.broadcast %94 : vector<16x1xf32> to vector<16x16xf32>
    %103 = arith.subf %90, %102 : vector<16x16xf32>
    %cst_60 = arith.constant 9.99999974E-6 : f32
    %104 = vector.broadcast %cst_60 : f32 to vector<16x1xf32>
    %105 = arith.addf %101, %104 : vector<16x1xf32>
    %106 = math.rsqrt %105 : vector<16x1xf32>
    %107 = vector.broadcast %106 : vector<16x1xf32> to vector<16x16xf32>
    %108 = arith.mulf %103, %107 : vector<16x16xf32>
    %109 = vector.broadcast %8 : vector<1x16xf32> to vector<16x16xf32>
    %110 = arith.mulf %108, %109 : vector<16x16xf32>
    %111 = vector.broadcast %9 : vector<1x16xf32> to vector<16x16xf32>
    %112 = arith.addf %110, %111 : vector<16x16xf32>
    %113 = arith.addf %112, %4 : vector<16x16xf32>
    %c0_61 = arith.constant 0 : index
    %c0_62 = arith.constant 0 : index
    %c0_63 = arith.constant 0 : index
    %114 = vector.load %arg11[%c0_61, %c0_62, %c0_63] : memref<1x16x16xf32, #tpu.memory_space<vmem>>, vector<1x16x16xf32>
    %115 = vector.shape_cast %114 : vector<1x16x16xf32> to vector<16x16xf32>
    %116 = vector.shape_cast %113 : vector<16x16xf32> to vector<1x16x16xf32>
    tpu.vector_store %arg11[%c0_61, %c0_62, %c0_63], %116 {strides = array<i32>} : memref<1x16x16xf32, #tpu.memory_space<vmem>>, vector<1x16x16xf32>,
    return
  }
  func.func @transform_0(%arg0: i32, %arg1: i32) -> (i32, i32, i32) {
    %c0_i32 = arith.constant 0 : i32
    %c0_i32_0 = arith.constant 0 : i32
    return %arg0, %arg1, %c0_i32 : i32, i32, i32
  }
  func.func @transform_1(%arg0: i32, %arg1: i32) -> (i32, i32) {
    %c0_i32 = arith.constant 0 : i32
    %c0_i32_0 = arith.constant 0 : i32
    %c0_i32_1 = arith.constant 0 : i32
    return %c0_i32, %c0_i32_0 : i32, i32
  }
  func.func @transform_2(%arg0: i32, %arg1: i32) -> (i32, i32) {
    %c0_i32 = arith.constant 0 : i32
    %c0_i32_0 = arith.constant 0 : i32
    %c0_i32_1 = arith.constant 0 : i32
    return %c0_i32, %c0_i32_0 : i32, i32
  }
  func.func @transform_3(%arg0: i32, %arg1: i32) -> (i32, i32) {
    %c0_i32 = arith.constant 0 : i32
    %c0_i32_0 = arith.constant 0 : i32
    %c0_i32_1 = arith.constant 0 : i32
    return %c0_i32, %c0_i32_0 : i32, i32
  }
  func.func @transform_4(%arg0: i32, %arg1: i32) -> (i32, i32) {
    %c0_i32 = arith.constant 0 : i32
    %c0_i32_0 = arith.constant 0 : i32
    %c0_i32_1 = arith.constant 0 : i32
    return %c0_i32, %c0_i32_0 : i32, i32
  }
  func.func @transform_5(%arg0: i32, %arg1: i32) -> (i32, i32) {
    %c0_i32 = arith.constant 0 : i32
    %c0_i32_0 = arith.constant 0 : i32
    %c0_i32_1 = arith.constant 0 : i32
    return %c0_i32, %c0_i32_0 : i32, i32
  }
  func.func @transform_6(%arg0: i32, %arg1: i32) -> (i32, i32) {
    %c0_i32 = arith.constant 0 : i32
    %c0_i32_0 = arith.constant 0 : i32
    %c0_i32_1 = arith.constant 0 : i32
    return %c0_i32, %c0_i32_0 : i32, i32
  }
  func.func @transform_7(%arg0: i32, %arg1: i32) -> (i32, i32) {
    %c0_i32 = arith.constant 0 : i32
    %c0_i32_0 = arith.constant 0 : i32
    %c0_i32_1 = arith.constant 0 : i32
    return %c0_i32, %c0_i32_0 : i32, i32
  }
  func.func @transform_8(%arg0: i32, %arg1: i32) -> (i32, i32) {
    %c0_i32 = arith.constant 0 : i32
    %c0_i32_0 = arith.constant 0 : i32
    %c0_i32_1 = arith.constant 0 : i32
    return %c0_i32, %c0_i32_0 : i32, i32
  }
  func.func @transform_9(%arg0: i32, %arg1: i32) -> (i32, i32, i32) {
    %c0_i32 = arith.constant 0 : i32
    %c0_i32_0 = arith.constant 0 : i32
    return %arg0, %arg1, %c0_i32 : i32, i32, i32
  }
}

module attributes {stable_mosaic.version = 11 : i64} {
  func.func @kernel(%arg0: i32, %arg1: i32, %arg2: memref<1x16x16xf32, #tpu.memory_space<vmem>>, %arg3: memref<16x64xbf16, #tpu.memory_space<vmem>>, %arg4: memref<4x32xf32, #tpu.memory_space<vmem>>, %arg5: memref<3x32xf32, #tpu.memory_space<vmem>>, %arg6: memref<32x128xbf16, #tpu.memory_space<vmem>>, %arg7: memref<1x32xf32, #tpu.memory_space<vmem>>, %arg8: memref<8x32xf32, #tpu.memory_space<vmem>>, %arg9: memref<32x16xbf16, #tpu.memory_space<vmem>>, %arg10: memref<2x16xf32, #tpu.memory_space<vmem>>, %arg11: memref<1x16x16xf32, #tpu.memory_space<vmem>>, %arg12: memref<8x32xf32, #tpu.memory_space<vmem>>, %arg13: memref<8x32xf32, #tpu.memory_space<vmem>>, %arg14: memref<16x32xf32, #tpu.memory_space<vmem>>, %arg15: memref<16x32xf32, #tpu.memory_space<vmem>>, %arg16: memref<16x16xf32, #tpu.memory_space<vmem>>, %arg17: memref<16x32xf32, #tpu.memory_space<vmem>>) attributes {dimension_semantics = [#tpu.dimension_semantics<parallel>, #tpu.dimension_semantics<arbitrary>], iteration_bounds = array<i64: 2, 1>, scalar_prefetch = 0 : i64, scratch_operands = 6 : i64, tpu.core_type = #tpu.core_type<tc>, window_params = [{transform_indices = @transform_0, window_bounds = array<i64: 1, 16, 16>}, {pipeline_mode = #tpu.pipeline_mode<synchronous>, transform_indices = @transform_1, window_bounds = array<i64: 16, 64>}, {pipeline_mode = #tpu.pipeline_mode<synchronous>, transform_indices = @transform_2, window_bounds = array<i64: 4, 32>}, {pipeline_mode = #tpu.pipeline_mode<synchronous>, transform_indices = @transform_3, window_bounds = array<i64: 3, 32>}, {pipeline_mode = #tpu.pipeline_mode<synchronous>, transform_indices = @transform_4, window_bounds = array<i64: 32, 128>}, {pipeline_mode = #tpu.pipeline_mode<synchronous>, transform_indices = @transform_5, window_bounds = array<i64: 1, 32>}, {pipeline_mode = #tpu.pipeline_mode<synchronous>, transform_indices = @transform_6, window_bounds = array<i64: 8, 32>}, {pipeline_mode = #tpu.pipeline_mode<synchronous>, transform_indices = @transform_7, window_bounds = array<i64: 32, 16>}, {pipeline_mode = #tpu.pipeline_mode<synchronous>, transform_indices = @transform_8, window_bounds = array<i64: 2, 16>}, {transform_indices = @transform_9, window_bounds = array<i64: 1, 16, 16>}]} {
    %c0_i32 = arith.constant 0 : i32
    %0 = arith.cmpi eq, %arg1, %c0_i32 : i32
    %1 = arith.extui %0 : i1 to i32
    %c0_i32_0 = arith.constant 0 : i32
    %2 = arith.cmpi ne, %1, %c0_i32_0 : i32
    scf.if %2 {
      %cst_64 = arith.constant 0.000000e+00 : f32
      %117 = vector.broadcast %cst_64 : f32 to vector<8x32xf32>
      %c0_65 = arith.constant 0 : index
      %c0_66 = arith.constant 0 : index
      %118 = vector.load %arg12[%c0_65, %c0_66] : memref<8x32xf32, #tpu.memory_space<vmem>>, vector<8x32xf32>
      tpu.vector_store %arg12[%c0_65, %c0_66], %117 {strides = array<i32>} : memref<8x32xf32, #tpu.memory_space<vmem>>, vector<8x32xf32>,
      %cst_67 = arith.constant 0.000000e+00 : f32
      %119 = vector.broadcast %cst_67 : f32 to vector<8x32xf32>
      %c0_68 = arith.constant 0 : index
      %c0_69 = arith.constant 0 : index
      %120 = vector.load %arg13[%c0_68, %c0_69] : memref<8x32xf32, #tpu.memory_space<vmem>>, vector<8x32xf32>
      tpu.vector_store %arg13[%c0_68, %c0_69], %119 {strides = array<i32>} : memref<8x32xf32, #tpu.memory_space<vmem>>, vector<8x32xf32>,
    } else {
    }
    %c0 = arith.constant 0 : index
    %c0_1 = arith.constant 0 : index
    %c0_2 = arith.constant 0 : index
    %3 = vector.load %arg2[%c0, %c0_1, %c0_2] : memref<1x16x16xf32, #tpu.memory_space<vmem>>, vector<1x16x16xf32>
    %4 = vector.shape_cast %3 : vector<1x16x16xf32> to vector<16x16xf32>
    %c0_3 = arith.constant 0 : index
    %c0_4 = arith.constant 0 : index
    %5 = vector.load %arg5[%c0_3, %c0_4] : memref<3x32xf32, #tpu.memory_space<vmem>>, vector<1x32xf32>
    %c1 = arith.constant 1 : index
    %c0_5 = arith.constant 0 : index
    %6 = vector.load %arg5[%c1, %c0_5] : memref<3x32xf32, #tpu.memory_space<vmem>>, vector<1x32xf32>
    %c2 = arith.constant 2 : index
    %c0_6 = arith.constant 0 : index
    %7 = vector.load %arg5[%c2, %c0_6] : memref<3x32xf32, #tpu.memory_space<vmem>>, vector<1x32xf32>
    %c0_7 = arith.constant 0 : index
    %c0_8 = arith.constant 0 : index
    %8 = vector.load %arg10[%c0_7, %c0_8] : memref<2x16xf32, #tpu.memory_space<vmem>>, vector<1x16xf32>
    %c1_9 = arith.constant 1 : index
    %c0_10 = arith.constant 0 : index
    %9 = vector.load %arg10[%c1_9, %c0_10] : memref<2x16xf32, #tpu.memory_space<vmem>>, vector<1x16xf32>
    %10 = arith.truncf %4 : vector<16x16xf32> to vector<16x16xbf16>
    %c0_11 = arith.constant 0 : index
    %c0_12 = arith.constant 0 : index
    %11 = vector.load %arg3[%c0_11, %c0_12] : memref<16x64xbf16, #tpu.memory_space<vmem>>, vector<16x64xbf16>
    %cst = arith.constant dense<0.000000e+00> : vector<16x64xf32>
    %12 = tpu.matmul %10, %11, %cst {dimension_numbers = #tpu.dot_dimension_numbers<[1], [0], [0], [1], [0, 0, 1, 1], [], []>} : vector<16x16xbf16>, vector<16x64xbf16>, vector<16x64xf32> -> vector<16x64xf32>
    %13 = vector.extract_strided_slice %12 {offsets = [0, 0], sizes = [16, 32], strides = [1, 1]} : vector<16x64xf32> to vector<16x32xf32>
    %14 = vector.extract_strided_slice %12 {offsets = [0, 32], sizes = [16, 32], strides = [1, 1]} : vector<16x64xf32> to vector<16x32xf32>
    %c0_13 = arith.constant 0 : index
    %c0_14 = arith.constant 0 : index
    %15 = vector.load %arg13[%c0_13, %c0_14] : memref<8x32xf32, #tpu.memory_space<vmem>>, vector<8x32xf32>
    %16 = tpu.concatenate %15, %13 in 0 : vector<8x32xf32>, vector<16x32xf32> -> vector<24x32xf32>
    %cst_15 = arith.constant 0.000000e+00 : f32
    %17 = vector.broadcast %cst_15 : f32 to vector<16x32xf32>
    %18 = vector.extract_strided_slice %16 {offsets = [5, 0], sizes = [16, 32], strides = [1, 1]} : vector<24x32xf32> to vector<16x32xf32>
    %c0_16 = arith.constant 0 : index
    %c0_17 = arith.constant 0 : index
    %19 = vector.load %arg4[%c0_16, %c0_17] : memref<4x32xf32, #tpu.memory_space<vmem>>, vector<1x32xf32>
    %20 = vector.broadcast %19 : vector<1x32xf32> to vector<16x32xf32>
    %21 = arith.mulf %18, %20 : vector<16x32xf32>
    %22 = arith.addf %17, %21 : vector<16x32xf32>
    %23 = vector.extract_strided_slice %16 {offsets = [6, 0], sizes = [16, 32], strides = [1, 1]} : vector<24x32xf32> to vector<16x32xf32>
    %c1_18 = arith.constant 1 : index
    %c0_19 = arith.constant 0 : index
    %24 = vector.load %arg4[%c1_18, %c0_19] : memref<4x32xf32, #tpu.memory_space<vmem>>, vector<1x32xf32>
    %25 = vector.broadcast %24 : vector<1x32xf32> to vector<16x32xf32>
    %26 = arith.mulf %23, %25 : vector<16x32xf32>
    %27 = arith.addf %22, %26 : vector<16x32xf32>
    %28 = vector.extract_strided_slice %16 {offsets = [7, 0], sizes = [16, 32], strides = [1, 1]} : vector<24x32xf32> to vector<16x32xf32>
    %c2_20 = arith.constant 2 : index
    %c0_21 = arith.constant 0 : index
    %29 = vector.load %arg4[%c2_20, %c0_21] : memref<4x32xf32, #tpu.memory_space<vmem>>, vector<1x32xf32>
    %30 = vector.broadcast %29 : vector<1x32xf32> to vector<16x32xf32>
    %31 = arith.mulf %28, %30 : vector<16x32xf32>
    %32 = arith.addf %27, %31 : vector<16x32xf32>
    %33 = vector.extract_strided_slice %16 {offsets = [8, 0], sizes = [16, 32], strides = [1, 1]} : vector<24x32xf32> to vector<16x32xf32>
    %c3 = arith.constant 3 : index
    %c0_22 = arith.constant 0 : index
    %34 = vector.load %arg4[%c3, %c0_22] : memref<4x32xf32, #tpu.memory_space<vmem>>, vector<1x32xf32>
    %35 = vector.broadcast %34 : vector<1x32xf32> to vector<16x32xf32>
    %36 = arith.mulf %33, %35 : vector<16x32xf32>
    %37 = arith.addf %32, %36 : vector<16x32xf32>
    %38 = vector.extract_strided_slice %13 {offsets = [8, 0], sizes = [8, 32], strides = [1, 1]} : vector<16x32xf32> to vector<8x32xf32>
    %c0_23 = arith.constant 0 : index
    %c0_24 = arith.constant 0 : index
    %39 = vector.load %arg13[%c0_23, %c0_24] : memref<8x32xf32, #tpu.memory_space<vmem>>, vector<8x32xf32>
    tpu.vector_store %arg13[%c0_23, %c0_24], %38 {strides = array<i32>} : memref<8x32xf32, #tpu.memory_space<vmem>>, vector<8x32xf32>,
    %40 = vector.broadcast %5 : vector<1x32xf32> to vector<16x32xf32>
    %41 = arith.addf %37, %40 : vector<16x32xf32>
    %cst_25 = arith.constant 0.000000e+00 : f32
    %42 = vector.broadcast %cst_25 : f32 to vector<16x32xf32>
    %43 = arith.subf %42, %41 : vector<16x32xf32>
    %44 = math.exp %43 : vector<16x32xf32>
    %cst_26 = arith.constant 1.000000e+00 : f32
    %45 = vector.broadcast %cst_26 : f32 to vector<16x32xf32>
    %46 = arith.addf %45, %44 : vector<16x32xf32>
    %cst_27 = arith.constant 1.000000e+00 : f32
    %47 = vector.broadcast %cst_27 : f32 to vector<16x32xf32>
    %48 = arith.divf %47, %46 : vector<16x32xf32>
    %49 = arith.mulf %41, %48 : vector<16x32xf32>
    %50 = arith.truncf %49 : vector<16x32xf32> to vector<16x32xbf16>
    %c0_28 = arith.constant 0 : index
    %c0_29 = arith.constant 0 : index
    %51 = vector.load %arg6[%c0_28, %c0_29] : memref<32x128xbf16, #tpu.memory_space<vmem>>, vector<32x128xbf16>
    %cst_30 = arith.constant dense<0.000000e+00> : vector<16x128xf32>
    %52 = tpu.matmul %50, %51, %cst_30 {dimension_numbers = #tpu.dot_dimension_numbers<[1], [0], [0], [1], [0, 0, 1, 1], [], []>} : vector<16x32xbf16>, vector<32x128xbf16>, vector<16x128xf32> -> vector<16x128xf32>
    %53 = vector.extract_strided_slice %52 {offsets = [0, 0], sizes = [16, 1], strides = [1, 1]} : vector<16x128xf32> to vector<16x1xf32>
    %54 = vector.extract_strided_slice %52 {offsets = [0, 1], sizes = [16, 16], strides = [1, 1]} : vector<16x128xf32> to vector<16x16xf32>
    %c0_31 = arith.constant 0 : index
    %c0_32 = arith.constant 0 : index
    %55 = vector.load %arg7[%c0_31, %c0_32] : memref<1x32xf32, #tpu.memory_space<vmem>>, vector<1x32xf32>
    %56 = vector.broadcast %53 : vector<16x1xf32> to vector<16x32xf32>
    %57 = vector.broadcast %55 : vector<1x32xf32> to vector<16x32xf32>
    %58 = arith.mulf %56, %57 : vector<16x32xf32>
    %59 = vector.broadcast %6 : vector<1x32xf32> to vector<16x32xf32>
    %60 = arith.addf %58, %59 : vector<16x32xf32>
    %cst_33 = arith.constant 2.000000e+01 : f32
    %61 = vector.broadcast %cst_33 : f32 to vector<16x32xf32>
    %62 = arith.cmpf ogt, %60, %61 : vector<16x32xf32>
    %63 = math.exp %60 : vector<16x32xf32>
    %64 = math.log1p %63 : vector<16x32xf32>
    %65 = arith.select %62, %60, %64 : vector<16x32xi1>, vector<16x32xf32>
    %c0_34 = arith.constant 0 : index
    %c0_35 = arith.constant 0 : index
    %66 = vector.load %arg14[%c0_34, %c0_35] : memref<16x32xf32, #tpu.memory_space<vmem>>, vector<16x32xf32>
    tpu.vector_store %arg14[%c0_34, %c0_35], %65 {strides = array<i32>} : memref<16x32xf32, #tpu.memory_space<vmem>>, vector<16x32xf32>,
    %67 = arith.mulf %65, %49 : vector<16x32xf32>
    %c0_36 = arith.constant 0 : index
    %c0_37 = arith.constant 0 : index
    %68 = vector.load %arg15[%c0_36, %c0_37] : memref<16x32xf32, #tpu.memory_space<vmem>>, vector<16x32xf32>
    tpu.vector_store %arg15[%c0_36, %c0_37], %67 {strides = array<i32>} : memref<16x32xf32, #tpu.memory_space<vmem>>, vector<16x32xf32>,
    %c0_38 = arith.constant 0 : index
    %c0_39 = arith.constant 0 : index
    %69 = vector.load %arg16[%c0_38, %c0_39] : memref<16x16xf32, #tpu.memory_space<vmem>>, vector<16x16xf32>
    tpu.vector_store %arg16[%c0_38, %c0_39], %54 {strides = array<i32>} : memref<16x16xf32, #tpu.memory_space<vmem>>, vector<16x16xf32>,
    %c0_40 = arith.constant 0 : index
    %c0_41 = arith.constant 0 : index
    %70 = vector.load %arg8[%c0_40, %c0_41] : memref<8x32xf32, #tpu.memory_space<vmem>>, vector<8x32xf32>
    %c0_42 = arith.constant 0 : index
    %c0_43 = arith.constant 0 : index
    %71 = vector.load %arg12[%c0_42, %c0_43] : memref<8x32xf32, #tpu.memory_space<vmem>>, vector<8x32xf32>
    %c0_i32_44 = arith.constant 0 : i32
    %c2_i32 = arith.constant 2 : i32
    %72 = arith.addi %c0_i32_44, %c2_i32 : i32
    %c1_i32 = arith.constant 1 : i32
    %73 = scf.for %arg18 = %c0_i32_44 to %72 step %c1_i32 iter_args(%arg19 = %71) -> (vector<8x32xf32>)  : i32 {
      %c8_i32 = arith.constant 8 : i32
      %117 = arith.muli %arg18, %c8_i32 : i32
      %118 = tpu.assume_multiple %117, 8 : i32
      %119 = arith.index_cast %118 : i32 to index
      %c0_64 = arith.constant 0 : index
      %120 = vector.load %arg14[%119, %c0_64] : memref<16x32xf32, #tpu.memory_space<vmem>>, vector<8x32xf32>
      %121 = arith.index_cast %118 : i32 to index
      %c0_65 = arith.constant 0 : index
      %122 = vector.load %arg15[%121, %c0_65] : memref<16x32xf32, #tpu.memory_space<vmem>>, vector<8x32xf32>
      %123 = arith.index_cast %118 : i32 to index
      %c0_66 = arith.constant 0 : index
      %124 = vector.load %arg16[%123, %c0_66] : memref<16x16xf32, #tpu.memory_space<vmem>>, vector<8x16xf32>
      %125 = tpu.transpose %124, [1, 0] : vector<8x16xf32> -> vector<16x8xf32>
      %126 = vector.extract_strided_slice %125 {offsets = [0, 0], sizes = [8, 8], strides = [1, 1]} : vector<16x8xf32> to vector<8x8xf32>
      %127 = vector.extract_strided_slice %125 {offsets = [8, 0], sizes = [8, 8], strides = [1, 1]} : vector<16x8xf32> to vector<8x8xf32>
      %128 = vector.shape_cast %120 : vector<8x32xf32> to vector<8x1x32xf32>
      %129 = vector.shape_cast %70 : vector<8x32xf32> to vector<1x8x32xf32>
      %130 = vector.broadcast %128 : vector<8x1x32xf32> to vector<8x8x32xf32>
      %131 = vector.broadcast %129 : vector<1x8x32xf32> to vector<8x8x32xf32>
      %132 = arith.mulf %130, %131 : vector<8x8x32xf32>
      %133 = math.exp %132 : vector<8x8x32xf32>
      %134 = vector.extract_strided_slice %122 {offsets = [0, 0], sizes = [1, 32], strides = [1, 1]} : vector<8x32xf32> to vector<1x32xf32>
      %135 = vector.extract_strided_slice %126 {offsets = [0, 0], sizes = [8, 1], strides = [1, 1]} : vector<8x8xf32> to vector<8x1xf32>
      %136 = vector.broadcast %134 : vector<1x32xf32> to vector<8x32xf32>
      %137 = vector.broadcast %135 : vector<8x1xf32> to vector<8x32xf32>
      %138 = arith.mulf %136, %137 : vector<8x32xf32>
      %139 = vector.extract_strided_slice %133 {offsets = [0, 0, 0], sizes = [1, 8, 32], strides = [1, 1, 1]} : vector<8x8x32xf32> to vector<1x8x32xf32>
      %140 = vector.shape_cast %139 : vector<1x8x32xf32> to vector<8x32xf32>
      %141 = arith.mulf %140, %arg19 : vector<8x32xf32>
      %142 = arith.addf %141, %138 : vector<8x32xf32>
      %143 = vector.extract_strided_slice %127 {offsets = [0, 0], sizes = [8, 1], strides = [1, 1]} : vector<8x8xf32> to vector<8x1xf32>
      %144 = vector.broadcast %143 : vector<8x1xf32> to vector<8x32xf32>
      %145 = arith.mulf %142, %144 : vector<8x32xf32>
      %cst_67 = arith.constant dense<0.000000e+00> : vector<32xf32>
      %146 = vector.multi_reduction <add>, %145, %cst_67 [0] : vector<8x32xf32> to vector<32xf32>
      %147 = vector.shape_cast %146 : vector<32xf32> to vector<1x32xf32>
      %148 = vector.extract_strided_slice %122 {offsets = [1, 0], sizes = [1, 32], strides = [1, 1]} : vector<8x32xf32> to vector<1x32xf32>
      %149 = vector.extract_strided_slice %126 {offsets = [0, 1], sizes = [8, 1], strides = [1, 1]} : vector<8x8xf32> to vector<8x1xf32>
      %150 = vector.broadcast %148 : vector<1x32xf32> to vector<8x32xf32>
      %151 = vector.broadcast %149 : vector<8x1xf32> to vector<8x32xf32>
      %152 = arith.mulf %150, %151 : vector<8x32xf32>
      %153 = vector.extract_strided_slice %133 {offsets = [1, 0, 0], sizes = [1, 8, 32], strides = [1, 1, 1]} : vector<8x8x32xf32> to vector<1x8x32xf32>
      %154 = vector.shape_cast %153 : vector<1x8x32xf32> to vector<8x32xf32>
      %155 = arith.mulf %154, %142 : vector<8x32xf32>
      %156 = arith.addf %155, %152 : vector<8x32xf32>
      %157 = vector.extract_strided_slice %127 {offsets = [0, 1], sizes = [8, 1], strides = [1, 1]} : vector<8x8xf32> to vector<8x1xf32>
      %158 = vector.broadcast %157 : vector<8x1xf32> to vector<8x32xf32>
      %159 = arith.mulf %156, %158 : vector<8x32xf32>
      %cst_68 = arith.constant dense<0.000000e+00> : vector<32xf32>
      %160 = vector.multi_reduction <add>, %159, %cst_68 [0] : vector<8x32xf32> to vector<32xf32>
      %161 = vector.shape_cast %160 : vector<32xf32> to vector<1x32xf32>
      %162 = vector.extract_strided_slice %122 {offsets = [2, 0], sizes = [1, 32], strides = [1, 1]} : vector<8x32xf32> to vector<1x32xf32>
      %163 = vector.extract_strided_slice %126 {offsets = [0, 2], sizes = [8, 1], strides = [1, 1]} : vector<8x8xf32> to vector<8x1xf32>
      %164 = vector.broadcast %162 : vector<1x32xf32> to vector<8x32xf32>
      %165 = vector.broadcast %163 : vector<8x1xf32> to vector<8x32xf32>
      %166 = arith.mulf %164, %165 : vector<8x32xf32>
      %167 = vector.extract_strided_slice %133 {offsets = [2, 0, 0], sizes = [1, 8, 32], strides = [1, 1, 1]} : vector<8x8x32xf32> to vector<1x8x32xf32>
      %168 = vector.shape_cast %167 : vector<1x8x32xf32> to vector<8x32xf32>
      %169 = arith.mulf %168, %156 : vector<8x32xf32>
      %170 = arith.addf %169, %166 : vector<8x32xf32>
      %171 = vector.extract_strided_slice %127 {offsets = [0, 2], sizes = [8, 1], strides = [1, 1]} : vector<8x8xf32> to vector<8x1xf32>
      %172 = vector.broadcast %171 : vector<8x1xf32> to vector<8x32xf32>
      %173 = arith.mulf %170, %172 : vector<8x32xf32>
      %cst_69 = arith.constant dense<0.000000e+00> : vector<32xf32>
      %174 = vector.multi_reduction <add>, %173, %cst_69 [0] : vector<8x32xf32> to vector<32xf32>
      %175 = vector.shape_cast %174 : vector<32xf32> to vector<1x32xf32>
      %176 = vector.extract_strided_slice %122 {offsets = [3, 0], sizes = [1, 32], strides = [1, 1]} : vector<8x32xf32> to vector<1x32xf32>
      %177 = vector.extract_strided_slice %126 {offsets = [0, 3], sizes = [8, 1], strides = [1, 1]} : vector<8x8xf32> to vector<8x1xf32>
      %178 = vector.broadcast %176 : vector<1x32xf32> to vector<8x32xf32>
      %179 = vector.broadcast %177 : vector<8x1xf32> to vector<8x32xf32>
      %180 = arith.mulf %178, %179 : vector<8x32xf32>
      %181 = vector.extract_strided_slice %133 {offsets = [3, 0, 0], sizes = [1, 8, 32], strides = [1, 1, 1]} : vector<8x8x32xf32> to vector<1x8x32xf32>
      %182 = vector.shape_cast %181 : vector<1x8x32xf32> to vector<8x32xf32>
      %183 = arith.mulf %182, %170 : vector<8x32xf32>
      %184 = arith.addf %183, %180 : vector<8x32xf32>
      %185 = vector.extract_strided_slice %127 {offsets = [0, 3], sizes = [8, 1], strides = [1, 1]} : vector<8x8xf32> to vector<8x1xf32>
      %186 = vector.broadcast %185 : vector<8x1xf32> to vector<8x32xf32>
      %187 = arith.mulf %184, %186 : vector<8x32xf32>
      %cst_70 = arith.constant dense<0.000000e+00> : vector<32xf32>
      %188 = vector.multi_reduction <add>, %187, %cst_70 [0] : vector<8x32xf32> to vector<32xf32>
      %189 = vector.shape_cast %188 : vector<32xf32> to vector<1x32xf32>
      %190 = vector.extract_strided_slice %122 {offsets = [4, 0], sizes = [1, 32], strides = [1, 1]} : vector<8x32xf32> to vector<1x32xf32>
      %191 = vector.extract_strided_slice %126 {offsets = [0, 4], sizes = [8, 1], strides = [1, 1]} : vector<8x8xf32> to vector<8x1xf32>
      %192 = vector.broadcast %190 : vector<1x32xf32> to vector<8x32xf32>
      %193 = vector.broadcast %191 : vector<8x1xf32> to vector<8x32xf32>
      %194 = arith.mulf %192, %193 : vector<8x32xf32>
      %195 = vector.extract_strided_slice %133 {offsets = [4, 0, 0], sizes = [1, 8, 32], strides = [1, 1, 1]} : vector<8x8x32xf32> to vector<1x8x32xf32>
      %196 = vector.shape_cast %195 : vector<1x8x32xf32> to vector<8x32xf32>
      %197 = arith.mulf %196, %184 : vector<8x32xf32>
      %198 = arith.addf %197, %194 : vector<8x32xf32>
      %199 = vector.extract_strided_slice %127 {offsets = [0, 4], sizes = [8, 1], strides = [1, 1]} : vector<8x8xf32> to vector<8x1xf32>
      %200 = vector.broadcast %199 : vector<8x1xf32> to vector<8x32xf32>
      %201 = arith.mulf %198, %200 : vector<8x32xf32>
      %cst_71 = arith.constant dense<0.000000e+00> : vector<32xf32>
      %202 = vector.multi_reduction <add>, %201, %cst_71 [0] : vector<8x32xf32> to vector<32xf32>
      %203 = vector.shape_cast %202 : vector<32xf32> to vector<1x32xf32>
      %204 = vector.extract_strided_slice %122 {offsets = [5, 0], sizes = [1, 32], strides = [1, 1]} : vector<8x32xf32> to vector<1x32xf32>
      %205 = vector.extract_strided_slice %126 {offsets = [0, 5], sizes = [8, 1], strides = [1, 1]} : vector<8x8xf32> to vector<8x1xf32>
      %206 = vector.broadcast %204 : vector<1x32xf32> to vector<8x32xf32>
      %207 = vector.broadcast %205 : vector<8x1xf32> to vector<8x32xf32>
      %208 = arith.mulf %206, %207 : vector<8x32xf32>
      %209 = vector.extract_strided_slice %133 {offsets = [5, 0, 0], sizes = [1, 8, 32], strides = [1, 1, 1]} : vector<8x8x32xf32> to vector<1x8x32xf32>
      %210 = vector.shape_cast %209 : vector<1x8x32xf32> to vector<8x32xf32>
      %211 = arith.mulf %210, %198 : vector<8x32xf32>
      %212 = arith.addf %211, %208 : vector<8x32xf32>
      %213 = vector.extract_strided_slice %127 {offsets = [0, 5], sizes = [8, 1], strides = [1, 1]} : vector<8x8xf32> to vector<8x1xf32>
      %214 = vector.broadcast %213 : vector<8x1xf32> to vector<8x32xf32>
      %215 = arith.mulf %212, %214 : vector<8x32xf32>
      %cst_72 = arith.constant dense<0.000000e+00> : vector<32xf32>
      %216 = vector.multi_reduction <add>, %215, %cst_72 [0] : vector<8x32xf32> to vector<32xf32>
      %217 = vector.shape_cast %216 : vector<32xf32> to vector<1x32xf32>
      %218 = vector.extract_strided_slice %122 {offsets = [6, 0], sizes = [1, 32], strides = [1, 1]} : vector<8x32xf32> to vector<1x32xf32>
      %219 = vector.extract_strided_slice %126 {offsets = [0, 6], sizes = [8, 1], strides = [1, 1]} : vector<8x8xf32> to vector<8x1xf32>
      %220 = vector.broadcast %218 : vector<1x32xf32> to vector<8x32xf32>
      %221 = vector.broadcast %219 : vector<8x1xf32> to vector<8x32xf32>
      %222 = arith.mulf %220, %221 : vector<8x32xf32>
      %223 = vector.extract_strided_slice %133 {offsets = [6, 0, 0], sizes = [1, 8, 32], strides = [1, 1, 1]} : vector<8x8x32xf32> to vector<1x8x32xf32>
      %224 = vector.shape_cast %223 : vector<1x8x32xf32> to vector<8x32xf32>
      %225 = arith.mulf %224, %212 : vector<8x32xf32>
      %226 = arith.addf %225, %222 : vector<8x32xf32>
      %227 = vector.extract_strided_slice %127 {offsets = [0, 6], sizes = [8, 1], strides = [1, 1]} : vector<8x8xf32> to vector<8x1xf32>
      %228 = vector.broadcast %227 : vector<8x1xf32> to vector<8x32xf32>
      %229 = arith.mulf %226, %228 : vector<8x32xf32>
      %cst_73 = arith.constant dense<0.000000e+00> : vector<32xf32>
      %230 = vector.multi_reduction <add>, %229, %cst_73 [0] : vector<8x32xf32> to vector<32xf32>
      %231 = vector.shape_cast %230 : vector<32xf32> to vector<1x32xf32>
      %232 = vector.extract_strided_slice %122 {offsets = [7, 0], sizes = [1, 32], strides = [1, 1]} : vector<8x32xf32> to vector<1x32xf32>
      %233 = vector.extract_strided_slice %126 {offsets = [0, 7], sizes = [8, 1], strides = [1, 1]} : vector<8x8xf32> to vector<8x1xf32>
      %234 = vector.broadcast %232 : vector<1x32xf32> to vector<8x32xf32>
      %235 = vector.broadcast %233 : vector<8x1xf32> to vector<8x32xf32>
      %236 = arith.mulf %234, %235 : vector<8x32xf32>
      %237 = vector.extract_strided_slice %133 {offsets = [7, 0, 0], sizes = [1, 8, 32], strides = [1, 1, 1]} : vector<8x8x32xf32> to vector<1x8x32xf32>
      %238 = vector.shape_cast %237 : vector<1x8x32xf32> to vector<8x32xf32>
      %239 = arith.mulf %238, %226 : vector<8x32xf32>
      %240 = arith.addf %239, %236 : vector<8x32xf32>
      %241 = vector.extract_strided_slice %127 {offsets = [0, 7], sizes = [8, 1], strides = [1, 1]} : vector<8x8xf32> to vector<8x1xf32>
      %242 = vector.broadcast %241 : vector<8x1xf32> to vector<8x32xf32>
      %243 = arith.mulf %240, %242 : vector<8x32xf32>
      %cst_74 = arith.constant dense<0.000000e+00> : vector<32xf32>
      %244 = vector.multi_reduction <add>, %243, %cst_74 [0] : vector<8x32xf32> to vector<32xf32>
      %245 = vector.shape_cast %244 : vector<32xf32> to vector<1x32xf32>
      %246 = tpu.concatenate %147, %161, %175, %189, %203, %217, %231, %245 in 0 : vector<1x32xf32>, vector<1x32xf32>, vector<1x32xf32>, vector<1x32xf32>, vector<1x32xf32>, vector<1x32xf32>, vector<1x32xf32>, vector<1x32xf32> -> vector<8x32xf32>
      %247 = arith.index_cast %118 : i32 to index
      %c0_75 = arith.constant 0 : index
      %248 = vector.load %arg17[%247, %c0_75] : memref<16x32xf32, #tpu.memory_space<vmem>>, vector<8x32xf32>
      tpu.vector_store %arg17[%247, %c0_75], %246 {strides = array<i32>} : memref<16x32xf32, #tpu.memory_space<vmem>>, vector<8x32xf32>,
      scf.yield %240 : vector<8x32xf32>
    }
    %c2_i32_45 = arith.constant 2 : i32
    %c0_46 = arith.constant 0 : index
    %c0_47 = arith.constant 0 : index
    %74 = vector.load %arg12[%c0_46, %c0_47] : memref<8x32xf32, #tpu.memory_space<vmem>>, vector<8x32xf32>
    tpu.vector_store %arg12[%c0_46, %c0_47], %73 {strides = array<i32>} : memref<8x32xf32, #tpu.memory_space<vmem>>, vector<8x32xf32>,
    %c0_48 = arith.constant 0 : index
    %c0_49 = arith.constant 0 : index
    %75 = vector.load %arg17[%c0_48, %c0_49] : memref<16x32xf32, #tpu.memory_space<vmem>>, vector<16x32xf32>
    %76 = vector.broadcast %7 : vector<1x32xf32> to vector<16x32xf32>
    %77 = arith.mulf %49, %76 : vector<16x32xf32>
    %78 = arith.addf %75, %77 : vector<16x32xf32>
    %cst_50 = arith.constant 0.000000e+00 : f32
    %79 = vector.broadcast %cst_50 : f32 to vector<16x32xf32>
    %80 = arith.subf %79, %14 : vector<16x32xf32>
    %81 = math.exp %80 : vector<16x32xf32>
    %cst_51 = arith.constant 1.000000e+00 : f32
    %82 = vector.broadcast %cst_51 : f32 to vector<16x32xf32>
    %83 = arith.addf %82, %81 : vector<16x32xf32>
    %cst_52 = arith.constant 1.000000e+00 : f32
    %84 = vector.broadcast %cst_52 : f32 to vector<16x32xf32>
    %85 = arith.divf %84, %83 : vector<16x32xf32>
    %86 = arith.mulf %14, %85 : vector<16x32xf32>
    %87 = arith.mulf %78, %86 : vector<16x32xf32>
    %88 = arith.truncf %87 : vector<16x32xf32> to vector<16x32xbf16>
    %c0_53 = arith.constant 0 : index
    %c0_54 = arith.constant 0 : index
    %89 = vector.load %arg9[%c0_53, %c0_54] : memref<32x16xbf16, #tpu.memory_space<vmem>>, vector<32x16xbf16>
    %cst_55 = arith.constant dense<0.000000e+00> : vector<16x16xf32>
    %90 = tpu.matmul %88, %89, %cst_55 {dimension_numbers = #tpu.dot_dimension_numbers<[1], [0], [0], [1], [0, 0, 1, 1], [], []>} : vector<16x32xbf16>, vector<32x16xbf16>, vector<16x16xf32> -> vector<16x16xf32>
    %cst_56 = arith.constant dense<0.000000e+00> : vector<16xf32>
    %91 = vector.multi_reduction <add>, %90, %cst_56 [1] : vector<16x16xf32> to vector<16xf32>
    %92 = vector.shape_cast %91 : vector<16xf32> to vector<16x1xf32>
    %cst_57 = arith.constant 1.600000e+01 : f32
    %93 = vector.broadcast %cst_57 : f32 to vector<16x1xf32>
    %94 = arith.divf %92, %93 : vector<16x1xf32>
    %95 = vector.broadcast %94 : vector<16x1xf32> to vector<16x16xf32>
    %96 = arith.subf %90, %95 : vector<16x16xf32>
    %97 = arith.mulf %96, %96 : vector<16x16xf32>
    %cst_58 = arith.constant dense<0.000000e+00> : vector<16xf32>
    %98 = vector.multi_reduction <add>, %97, %cst_58 [1] : vector<16x16xf32> to vector<16xf32>
    %99 = vector.shape_cast %98 : vector<16xf32> to vector<16x1xf32>
    %cst_59 = arith.constant 1.600000e+01 : f32
    %100 = vector.broadcast %cst_59 : f32 to vector<16x1xf32>
    %101 = arith.divf %99, %100 : vector<16x1xf32>
    %102 = vector.broadcast %94 : vector<16x1xf32> to vector<16x16xf32>
    %103 = arith.subf %90, %102 : vector<16x16xf32>
    %cst_60 = arith.constant 9.99999974E-6 : f32
    %104 = vector.broadcast %cst_60 : f32 to vector<16x1xf32>
    %105 = arith.addf %101, %104 : vector<16x1xf32>
    %106 = math.rsqrt %105 : vector<16x1xf32>
    %107 = vector.broadcast %106 : vector<16x1xf32> to vector<16x16xf32>
    %108 = arith.mulf %103, %107 : vector<16x16xf32>
    %109 = vector.broadcast %8 : vector<1x16xf32> to vector<16x16xf32>
    %110 = arith.mulf %108, %109 : vector<16x16xf32>
    %111 = vector.broadcast %9 : vector<1x16xf32> to vector<16x16xf32>
    %112 = arith.addf %110, %111 : vector<16x16xf32>
    %113 = arith.addf %112, %4 : vector<16x16xf32>
    %c0_61 = arith.constant 0 : index
    %c0_62 = arith.constant 0 : index
    %c0_63 = arith.constant 0 : index
    %114 = vector.load %arg11[%c0_61, %c0_62, %c0_63] : memref<1x16x16xf32, #tpu.memory_space<vmem>>, vector<1x16x16xf32>
    %115 = vector.shape_cast %114 : vector<1x16x16xf32> to vector<16x16xf32>
    %116 = vector.shape_cast %113 : vector<16x16xf32> to vector<1x16x16xf32>
    tpu.vector_store %arg11[%c0_61, %c0_62, %c0_63], %116 {strides = array<i32>} : memref<1x16x16xf32, #tpu.memory_space<vmem>>, vector<1x16x16xf32>,
    return
  }
  func.func @transform_0(%arg0: i32, %arg1: i32) -> (i32, i32, i32) {
    %c0_i32 = arith.constant 0 : i32
    %c0_i32_0 = arith.constant 0 : i32
    return %arg0, %arg1, %c0_i32 : i32, i32, i32
  }
  func.func @transform_1(%arg0: i32, %arg1: i32) -> (i32, i32) {
    %c0_i32 = arith.constant 0 : i32
    %c0_i32_0 = arith.constant 0 : i32
    %c0_i32_1 = arith.constant 0 : i32
    return %c0_i32, %c0_i32_0 : i32, i32
  }
  func.func @transform_2(%arg0: i32, %arg1: i32) -> (i32, i32) {
    %c0_i32 = arith.constant 0 : i32
    %c0_i32_0 = arith.constant 0 : i32
    %c0_i32_1 = arith.constant 0 : i32
    return %c0_i32, %c0_i32_0 : i32, i32
  }
  func.func @transform_3(%arg0: i32, %arg1: i32) -> (i32, i32) {
    %c0_i32 = arith.constant 0 : i32
    %c0_i32_0 = arith.constant 0 : i32
    %c0_i32_1 = arith.constant 0 : i32
    return %c0_i32, %c0_i32_0 : i32, i32
  }
  func.func @transform_4(%arg0: i32, %arg1: i32) -> (i32, i32) {
    %c0_i32 = arith.constant 0 : i32
    %c0_i32_0 = arith.constant 0 : i32
    %c0_i32_1 = arith.constant 0 : i32
    return %c0_i32, %c0_i32_0 : i32, i32
  }
  func.func @transform_5(%arg0: i32, %arg1: i32) -> (i32, i32) {
    %c0_i32 = arith.constant 0 : i32
    %c0_i32_0 = arith.constant 0 : i32
    %c0_i32_1 = arith.constant 0 : i32
    return %c0_i32, %c0_i32_0 : i32, i32
  }
  func.func @transform_6(%arg0: i32, %arg1: i32) -> (i32, i32) {
    %c0_i32 = arith.constant 0 : i32
    %c0_i32_0 = arith.constant 0 : i32
    %c0_i32_1 = arith.constant 0 : i32
    return %c0_i32, %c0_i32_0 : i32, i32
  }
  func.func @transform_7(%arg0: i32, %arg1: i32) -> (i32, i32) {
    %c0_i32 = arith.constant 0 : i32
    %c0_i32_0 = arith.constant 0 : i32
    %c0_i32_1 = arith.constant 0 : i32
    return %c0_i32, %c0_i32_0 : i32, i32
  }
  func.func @transform_8(%arg0: i32, %arg1: i32) -> (i32, i32) {
    %c0_i32 = arith.constant 0 : i32
    %c0_i32_0 = arith.constant 0 : i32
    %c0_i32_1 = arith.constant 0 : i32
    return %c0_i32, %c0_i32_0 : i32, i32
  }
  func.func @transform_9(%arg0: i32, %arg1: i32) -> (i32, i32, i32) {
    %c0_i32 = arith.constant 0 : i32
    %c0_i32_0 = arith.constant 0 : i32
    return %arg0, %arg1, %c0_i32 : i32, i32, i32
  }
}

</mosaic_0001>

<bundles_post_ra>
// kernel: tpu_custom_call.1
= control target key start
LH: loop header
LB: loop body
LE: loop exit
PB: predicated region body
PF: predicated region fallthrough
CT: control target
= control target key end

     0   :  { %s2456_s0 = inlined_call_operand.hbm [shape: f32[2,16,16], index: 0, kind: input, shape index: {}]   ;;  %s2457_s1 = inlined_call_operand.vmem [shape: bf16[16,64], index: 1, kind: input, shape index: {}]   ;;  %s2458_s2 = inlined_call_operand.hbm [shape: f32[4,32], index: 2, kind: input, shape index: {}]   ;;  %s2459_s3 = inlined_call_operand.hbm [shape: f32[3,32], index: 3, kind: input, shape index: {}]   ;;  %s2460_s4 = inlined_call_operand.vmem [shape: bf16[32,128], index: 4, kind: input, shape index: {}]   ;;  %s2461_s5 = inlined_call_operand.hbm [shape: f32[1,32], index: 5, kind: input, shape index: {}]   ;;  %s2462_s6 = inlined_call_operand.vmem [shape: f32[8,32], index: 6, kind: input, shape index: {}]   ;;  %s2463_s7 = inlined_call_operand.vmem [shape: bf16[32,16], index: 7, kind: input, shape index: {}]   ;;  %s2464_s8 = inlined_call_operand.vmem [shape: f32[2,16], index: 8, kind: input, shape index: {}]   ;;  %s2465_s9 = inlined_call_operand.hbm [shape: f32[2,16,16], index: 9, kind: output, shape index: {}]  }
   0x1   :  { %2473 = sst [smem:[#allocation24_spill]] %s2465_s9 }
   0x2   :  { %14 = vsyncpa [#allocation9], 0 }
   0x3   :  { %16 = vsyncpa [#allocation9 + $0x1], 0 }
   0x4   :  { %17 = vsyncpa [#allocation12], 0 }
   0x5   :  { %18 = vsyncpa [#allocation15], 0 }
   0x6   :  { %19 = vsyncpa [#allocation10], 0 }
   0x7   :  { %21 = vsyncpa [#allocation10 + $0x1], 0  ;;  %s1966_s30 = smov 0   ;;  %s1968_s10 = smov 0  }
   0x8   :  { %s1970_s11 = smov 0   ;;  %s1972_s12 = smov 0  }
   0x9   :  { %s1974_s13 = smov 0   ;;  %s1976_s14 = smov 0  }
   0xa LB: > { %2474 = sst [smem:[#allocation21_spill]] %s1863_s30  ;;  %s1399_s15 = sadd.s32 4294967295, %s1883_s14   ;;  %s1883_s14 = sphi %s1976_s14, %s27_s14   ;;  %s1879_s13 = sphi %s1974_s13, %s2501_s13   ;;  %s1875_s12 = sphi %s1972_s12, %s2500_s12   ;;  %s1871_s11 = sphi %s1970_s11, %s2499_s11   ;;  %s1867_s10 = sphi %s1968_s10, %s2498_s10   ;;  %s1863_s30 = sphi %s1966_s30, %s2497_s30  }
   0xb   : > { %2475 = sst [smem:[#allocation22_spill]] %s1875_s12  ;;  %s1400_s16 = sadd.s32 4294967294, %s1883_s14  }
   0xc   : > { %p61_p0 = scmp.ne.s32.totalorder %s1867_s10, %s1863_s30  ;;  %p2000_p1 = scmp.eq.s32.totalorder %s1399_s15, 0 }
   0xd   : > { %p2004_p2 = scmp.eq.s32.totalorder %s1399_s15, 1  ;;  %p261_p3 = scmp.eq.s32.totalorder %s1400_s16, 1 }
   0xe   : > { %s2476_s17 = scalar_select %p2000_p1, 1, 0 }
   0xf   : > { %s2477_s18 = scalar_select %p2004_p2, 1, 0 }
  0x10   : > { %p2010_p4 = por %p2000_p1, %p61_p0  ;;  %p1401_p5 = scmp.ge.s32.totalorder %s1883_s14, 1 }
  0x11   : > { %p2015_p6 = por %p261_p3, %p61_p0  ;;  %p268_p7 = scmp.lt.s32.totalorder %s1883_s14, 3 }
  0x12   : > { %s2478_s19 = scalar_select %p2010_p4, 1, 0 }
  0x13   : > { %s2479_s20 = scalar_select %p2015_p6, 1, 0 }
  0x14   : > { %p2020_p8 = pnand %p1401_p5, %p268_p7  ;;  %s1893_s22 = smov [#allocation11]  }
  0x15   : > { %2480 = sst [smem:[#allocation23_spill]] %s2479_s20  ;;  %s284_s23 = sshll.u32 %s1893_s22, 4  ;;  %s285_s23 = int_to_ptr.vmem [resolvable:$true] %s284_s23 }
  0x16   : > { %s2481_s21 = scalar_select %p2020_p8, 1, 0 }
  0x17   : > { %p1487_p10 = pneg %p2020_p8  ;;  %s1894_s24 = smov [#allocation13]  }
  0x18   : > { %s295_s25 = sshll.u32 %s1894_s24, 4  ;;  %s1895_s27 = smov [#allocation14]   ;;  %s2033_s25 = int_to_ptr.vmem [resolvable:$true] %s295_s25 }
  0x19   : > { %p2029_p11 = pnand %p1487_p10, %p2000_p1  ;;  %s309_s28 = sshll.u32 %s1895_s27, 4  ;;  %s2035_s28 = int_to_ptr.vmem [resolvable:$true] %s309_s28 }
  0x1a   : > { %s1671_s16 = scalar_lea.hbm %s2458_s2, 64 }
  0x1b   : > { %p1672_p12 = scmp.ne.s32.totalorder %s2458_s2, %s1671_s16  ;;  %p2045_p13 = pneg %p2029_p11 }
  0x1c   : > { %p1678_p5 = scmp.lt.u32.totalorder %s1671_s16, %s2458_s2 }
  0x1d   : > { %p1674_p0 = pnand %p2045_p13, %p1672_p12 }
  0x1f   : > { %p1675_p3 = pneg %p1674_p0 }
  0x21   : > { %p1680_p7 = pnand %p1678_p5, %p1675_p3 }
  0x23   : > { %1683 = shalt.err (!%p1680_p7)
}
  0x24   : > { %s1684_s29 = scalar_lea.vmem %s285_s23, 64  ;;  %p1692_p1 = scmp.lt.s32.totalorder %s285_s23, %s285_s23 }
  0x25   : > { %p1685_p10 = scmp.ne.s32.totalorder %s285_s23, %s1684_s29  ;;  %p1693_p4 = scmp.lt.s32.totalorder %s1684_s29, %s1684_s29 }
  0x27   : > { %p1687_p9 = pnand %p1685_p10, %p2045_p13  ;;  %p1694_p8 = por %p1693_p4, %p1692_p1 }
  0x29   : > { %p1688_p6 = pneg %p1687_p9 }
  0x2b   : > { %p1695_p2 = pnand %p1694_p8, %p1688_p6 }
  0x2d   : > { %1698 = shalt.err (!%p1695_p2)
}
  0x2e   : > { %1490 = dma.hbm_to_vmem [thread:$0]  (!%p2029_p11), %s2458_s2, 64, %s285_s23, [#allocation12]  }
  0x2f   : > { %s1699_s22 = scalar_lea.hbm %s2459_s3, 64 }
  0x30   : > { %p1700_p9 = scmp.ne.s32.totalorder %s2459_s3, %s1699_s22  ;;  %p1706_p2 = scmp.lt.u32.totalorder %s1699_s22, %s2459_s3 }
  0x32   : > { %p1702_p12 = pnand %p1700_p9, %p2045_p13 }
  0x34   : > { %p1703_p1 = pneg %p1702_p12 }
  0x36   : > { %p1708_p4 = pnand %p1706_p2, %p1703_p1 }
  0x38   : > { %1711 = shalt.err (!%p1708_p4)
}
  0x39   : > { %s1712_s23 = scalar_lea.vmem %s2033_s25, 64  ;;  %p1720_p3 = scmp.lt.s32.totalorder %s2033_s25, %s2033_s25 }
  0x3a   : > { %p1713_p6 = scmp.ne.s32.totalorder %s2033_s25, %s1712_s23  ;;  %p1721_p5 = scmp.lt.s32.totalorder %s1712_s23, %s1712_s23 }
  0x3c   : > { %p1715_p8 = pnand %p1713_p6, %p2045_p13  ;;  %p1722_p7 = por %p1721_p5, %p1720_p3 }
  0x3e   : > { %p1716_p0 = pneg %p1715_p8 }
  0x40   : > { %p1723_p10 = pnand %p1722_p7, %p1716_p0 }
  0x42   : > { %1726 = shalt.err (!%p1723_p10)
}
  0x43   : > { %1493 = dma.hbm_to_vmem [thread:$0]  (!%p2029_p11), %s2459_s3, 64, %s2033_s25, [#allocation12]  }
  0x44   : > { %s1727_s30 = scalar_lea.hbm %s2461_s5, 16 }
  0x45   : > { %p1728_p9 = scmp.ne.s32.totalorder %s2461_s5, %s1727_s30  ;;  %p1734_p2 = scmp.lt.u32.totalorder %s1727_s30, %s2461_s5 }
  0x47   : > { %p1730_p12 = pnand %p1728_p9, %p2045_p13 }
  0x49   : > { %p1731_p1 = pneg %p1730_p12 }
  0x4b   : > { %p1736_p4 = pnand %p1734_p2, %p1731_p1 }
  0x4d   : > { %1739 = shalt.err (!%p1736_p4)
}
  0x4e   : > { %s1740_s25 = scalar_lea.vmem %s2035_s28, 16  ;;  %s1747_s23 = scalar_lea.vmem %s2035_s28, 32 }
  0x4f   : > { %p1741_p6 = scmp.ne.s32.totalorder %s2035_s28, %s1740_s25  ;;  %p1748_p3 = scmp.lt.s32.totalorder %s2035_s28, %s2035_s28 }
  0x50   : > { %p1749_p5 = scmp.lt.s32.totalorder %s1747_s23, %s1740_s25 }
  0x51   : > { %p1743_p8 = pnand %p1741_p6, %p2045_p13 }
  0x52   : > { %p1750_p7 = por %p1749_p5, %p1748_p3 }
  0x53   : > { %p1744_p0 = pneg %p1743_p8 }
  0x55   : > { %p1751_p10 = pnand %p1750_p7, %p1744_p0 }
  0x57   : > { %1754 = shalt.err (!%p1751_p10)
}
  0x58   : > { %1496 = dma.hbm_to_vmem [thread:$0]  (!%p2029_p11), %s2461_s5, 16, %s2035_s28, [#allocation15]  }
  0x59   : > { %s48_s24 = sadd.s32 1, %s1871_s11  ;;  %s39_s20 = sadd.s32 1, %s1879_s13 }
  0x5a   : > { %p55_p13 = scmp.ne.s32.totalorder %s1871_s11, %s1867_s10  ;;  %p41_p9 = scmp.ge.s32.totalorder %s39_s20, 2 }
  0x5b   : > { %p56_p12 = scmp.eq.s32.totalorder %s1883_s14, 0  ;;  %p2484_p1 = scmp.ne.s32.totalorder %s2477_s18, 0 }
  0x5c   : > { %p1508_p4 = scmp.lt.s32.totalorder %s1883_s14, 2  ;;  %s2503_s20 = smov (%p41_p9, %s39_s20), 0 }
  0x5d   : > { %p2115_p2 = por %p2484_p1, %p55_p13  ;;  %p57_p6 = por %p56_p12, %p55_p13 }
  0x5e   : > { %s329_s15 = sand.u32 1, %s1871_s11   ;;  %s43_s30 = ssub.s32 %s1879_s13, %s2503_s20 }
  0x5f   : > { %p46_p8 = scmp.eq.s32.totalorder %s43_s30, 0  ;;  %s1406_s28 = sshll.u32 %s329_s15, 4 }
  0x60   : > { %s1439_s16 = sshll.u32 %s1879_s13, 8  ;;  %s333_s25 = scalar_lea.vmem [#allocation8], %s1406_s28 }
  0x61   : > { %s2127_s22 = scalar_select %p46_p8, %s1871_s11, %s48_s24  }
  0x62   : > { %s2132_s18 = scalar_lea.hbm %s2456_s0, %s1439_s16  ;;  %s342_s23 = sshll.u32 %s333_s25, 4  ;;  %s2134_s23 = int_to_ptr.vmem [resolvable:$true] %s342_s23 }
  0x63   : > { %p2138_p11 = pnand %p1508_p4, %p57_p6  ;;  %s2142_s12 = scalar_lea.sflag [#allocation9], %s329_s15 }
  0x64   : > { %s1755_s24 = scalar_lea.hbm %s2132_s18, 256  ;;  %s1760_s16 = scalar_lea.hbm %s2456_s0, 512 }
  0x65   : > { %p1756_p0 = scmp.ne.s32.totalorder %s2132_s18, %s1755_s24  ;;  %p1757_p3 = pneg %p2138_p11 }
  0x66   : > { %p1761_p10 = scmp.lt.u32.totalorder %s2132_s18, %s2456_s0  ;;  %p1762_p13 = scmp.lt.u32.totalorder %s1760_s16, %s1755_s24 }
  0x67   : > { %p1758_p5 = pnand %p1757_p3, %p1756_p0  ;;  %p1764_p12 = scmp.lt.u32.totalorder %s1755_s24, %s2132_s18 }
  0x68   : > { %p1763_p9 = por %p1762_p13, %p1761_p10 }
  0x69   : > { %p1759_p7 = pneg %p1758_p5 }
  0x6a   : > { %p1765_p1 = por %p1764_p12, %p1763_p9 }
  0x6c   : > { %p1766_p4 = pnand %p1765_p1, %p1759_p7 }
  0x6e   : > { %1769 = shalt.err (!%p1766_p4)
}
  0x6f   : > { %s1770_s15 = scalar_lea.vmem %s2134_s23, 256  ;;  %s1896_s25 = smov [#allocation8]  }
  0x70   : > { %p1771_p6 = scmp.ne.s32.totalorder %s2134_s23, %s1770_s15  ;;  %s1775_s30 = sshll.u32 %s1896_s25, 4  ;;  %s1776_s30 = int_to_ptr.vmem [resolvable:$false] %s1775_s30 }
  0x71   : > { %s1777_s28 = scalar_lea.vmem %s1776_s30, 512  ;;  %p1778_p5 = scmp.lt.s32.totalorder %s2134_s23, %s1776_s30 }
  0x72   : > { %p1773_p8 = pnand %p1771_p6, %p1757_p3  ;;  %p1779_p10 = scmp.lt.s32.totalorder %s1777_s28, %s1770_s15 }
  0x74   : > { %p1774_p0 = pneg %p1773_p8  ;;  %p1780_p13 = por %p1779_p10, %p1778_p5 }
  0x76   : > { %p1781_p9 = pnand %p1780_p13, %p1774_p0 }
  0x78   : > { %1784 = shalt.err (!%p1781_p9)
}
  0x79   : > { %s1897_s24 = smov 128   ;;  %s1898_s16 = smov 8  }
  0x7a   : > { %1500 = dma.hbm_to_vmem [thread:$0]  (!%p2138_p11), %s2132_s18, 256, %s2134_s23, %s2142_s12, %s1897_s24, %s1897_s24, %s1898_s16  }
  0x7b   : > { %p2487_p3 = scmp.ne.s32.totalorder %s2481_s21, 0 }
  0x7c   : > { %s2173_s27 = sand.u32 (!%p2487_p3), 1, %s1867_s10   ;;  %p2488_p7 = scmp.ne.s32.totalorder (!%p2487_p3), %s2478_s19, 0 }
  0x7d   : > { %354 = sbr.rel (%p2487_p3) target bundleno = 1810 (0x712), region = 56  ;;  %s1410_s29 = sshll.u32 (!%p2487_p3), %s2173_s27, 4 }
  0x7e   : > { %s357_s15 = scalar_lea.sflag (!%p2487_p3), [#allocation9], %s2173_s27  ;;  %s360_s25 = scalar_lea.vmem (!%p2487_p3), [#allocation8], %s1410_s29 }
  0x84   : > { %1846 = dma.done.wait (%p2488_p7), %s357_s15, 256  }
  0x85   : > { %1848 = vsyncadd (%p2488_p7), %s357_s15, 4294967040  ;;  %p2489_p11 = scmp.ne.s32.totalorder %s2476_s17, 0 }
  0x87   : > { %1850 = dma.done.wait (%p2489_p11), [#allocation12], 128  }
  0x88   : > { %1852 = vsyncadd (%p2489_p11), [#allocation12], 4294967168 }
  0x89   : > { %1854 = dma.done.wait (%p2489_p11), [#allocation15], 16  }
  0x8a   : > { %1856 = vsyncadd (%p2489_p11), [#allocation15], 4294967280  ;;  %v1899_v0 = vmov 0.0   ;;  %vm1900_vm0 = vmmov 0   ;;  %vm414_vm1 = vcmask 261120   ;;  %v2216_v4 = vld [vmem:[%s2462_s6] sm:$0xff] }
  0x8b   : > { %1449 = vmatprep.subr.bf16.mxu0 %v1899_v0  ;;  %1451 = vmatprep.mubr.msk.bf16.mxu0 %vm1900_vm0, %v1899_v0  ;;  %415 = vst.msk [vmem:[#allocation2] sm:$0xff] %vm414_vm1, %v1899_v0  ;;  %416 = vst.msk [vmem:[#allocation3] sm:$0xff] %vm414_vm1, %v1899_v0  ;;  %v2201_v1 = vld [vmem:[#allocation13 + $0x2] ss:$0 sm:$0xff]  ;;  %v2206_v2 = vld [vmem:[%s2464_s8] ss:$0 sm:$0xff] }
  0x8c   : > { %1455 = vmatprep.subr.bf16.mxu1 %v1899_v0  ;;  %1459 = vmatprep.mubr.msk.bf16.mxu1 %vm1900_vm0, %v1899_v0  ;;  %v2211_v3 = vld [vmem:[%s2464_s8 + $0x1] ss:$0 sm:$0xff]  ;;  %v2223_v7 = vld [vmem:[%s360_s25 + $0x8] sm:$0xff]  ;;  %vm433_vm2 = vcmask 130048   ;;  %v1901_v12 = vmov 0   ;;  %vm501_vm3 = vcmask 1046528  }
  0x8d   : > { %v1600_v5 = vld [vmem:[%s2457_s1] sm:$0xff]   ;;  %v1602_v11 = vld [vmem:[%s2460_s4 + $0x8] sm:$0xff]   ;;  %1599 = vset.pattern.permute.xlu0 %v1901_v12  ;;  %v1418_v14 = vld [vmem:[#allocation11 + $0x1] ss:$0 sm:$0xff]  ;;  %vm524_vm4 = vcmask 1045504   ;;  %vm545_vm5 = vcmask 1044480  }
  0x8e   : > { %v2221_v6 = vld [vmem:[%s360_s25] sm:$0xff]  ;;  %1450 = vmatpush3.bf16.msra.mxu0 %v1600_v5  ;;  %vm721_vm6 = vcmask 1042432   ;;  %vm591_vm7 = vsmask.f32 5376  ;;  %s1902_s25 = smov 127   ;;  %s2283_s17 = scalar_lea.vmem [#allocation16], %s1410_s29 }
  0x8f   : > { %v424_v8 = vpack.c.bf16 %v2223_v7, %v2221_v6  ;;  %v1601_v10 = vld [vmem:[%s2460_s4] sm:$0xff]   ;;  %v1419_v15 = vld [vmem:[#allocation11 + $0x2] ss:$0 sm:$0xff]  ;;  %v1420_v19 = vld [vmem:[#allocation11 + $0x3] ss:$0 sm:$0xff]  ;;  %s2288_s19 = smov 0  }
  0x90   : > { %1456 = vmatpush3.bf16.msra.mxu1 %v1601_v10  ;;  %v1417_v20 = vld [vmem:[#allocation11] ss:$0 sm:$0xff]  ;;  %v1421_v48 = vld [vmem:[#allocation13] ss:$0 sm:$0xff] }
  0x91   : > { %1452 = vmatmul.mubr.msk.bf16.vlgmr.msra.gmra.mrb[0].mxu0 %vm433_vm2, %v424_v8  ;;  %1457 = vmatprep.subr.bf16.mxu1 %v1899_v0 }
  0x92   : > { %v2228_v9 = vld [vmem:[#allocation2] sm:$0xff]   ;;  %v478_v13 = vld [vmem:[#allocation3] sm:$0xff] }
  0x93   : > { %v495_v16 = vmul.f32 %v1418_v14, %v478_v13  ;;  %v518_v17 = vmul.f32 %v1419_v15, %v478_v13  ;;  %v484_v25 = vmul.f32 %v1417_v20, %v478_v13 }
  0x94   : > { %1458 = vmatpush3.bf16.msra.mxu1 %v1602_v11 }
  0x95   : > { %v502_v22 = vrot.slane %v495_v16, 1  ;;  %v525_v28 = vrot.slane %v518_v17, 2 }
 0x164   : > { %v2237_v18 = vpop.f32.mrb[0].mxu0 }
 0x165   : > { %v496_v21 = vmul.f32 %v1418_v14, %v2237_v18  ;;  %v519_v23 = vmul.f32 %v1419_v15, %v2237_v18  ;;  %v1453_v24 = vpop.f32.mrb[1].mxu0  ;;  %v541_v30 = vmul.f32 %v1420_v19, %v2237_v18  ;;  %v485_v41 = vmul.f32 %v1417_v20, %v2237_v18 }
 0x166   : > { %v2241_v26 = vpop.f32.mrb[2].mxu0 }
 0x167   : > { %v503_v27 = vrot.slane %v496_v21, 1  ;;  %v526_v29 = vrot.slane %v519_v23, 2  ;;  %556 = vst.msk [vmem:[#allocation3] sm:$0xff] %vm414_vm1, %v2241_v26  ;;  %v1454_v31 = vpop.f32.mrb[3].mxu0  ;;  %v497_v32 = vmul.f32 %v1418_v14, %v2241_v26  ;;  %v520_v33 = vmul.f32 %v1419_v15, %v2241_v26 }
 0x168   : > { %v542_v34 = vmul.f32 %v1420_v19, %v2241_v26  ;;  %v486_v36 = vmul.f32 %v1417_v20, %v2241_v26  ;;  %v546_v43 = vrot.slane %v541_v30, 3 }
 0x169   : > { %v504_v35 = vsel %vm501_vm3, %v502_v22, %v503_v27  ;;  %v505_v38 = vrot.slane %v497_v32, 1  ;;  %v528_v39 = vrot.slane %v520_v33, 2  ;;  %v527_v42 = vsel %vm524_vm4, %v525_v28, %v526_v29 }
 0x16a   : > { %v510_v37 = vadd.f32 %v504_v35, %v484_v25  ;;  %v547_v40 = vrot.slane %v542_v34, 3 }
 0x16b   : > { %v506_v45 = vsel %vm501_vm3, %v503_v27, %v505_v38  ;;  %v512_v46 = vadd.f32 %v505_v38, %v486_v36  ;;  %v529_v47 = vsel %vm524_vm4, %v526_v29, %v528_v39 }
 0x16c   : > { %v533_v44 = vadd.f32 %v527_v42, %v510_v37  ;;  %v511_v49 = vadd.f32 %v506_v45, %v485_v41  ;;  %v548_v50 = vsel %vm545_vm5, %v546_v43, %v547_v40 }
 0x16d   : > { %v535_v52 = vadd.f32 %v528_v39, %v512_v46 }
 0x16e   : > { %v552_v51 = vadd.f32 %v546_v43, %v533_v44  ;;  %v534_v53 = vadd.f32 %v529_v47, %v511_v49  ;;  %v1425_v47 = vld [vmem:[#allocation14] ss:$0 sm:$0xff] }
 0x16f   : > { %v554_v55 = vadd.f32 %v547_v40, %v535_v52 }
 0x170   : > { %v561_v54 = vadd.f32 %v1421_v48, %v552_v51  ;;  %v553_v56 = vadd.f32 %v548_v50, %v534_v53 }
 0x171   : > { %v563_v58 = vadd.f32 %v1421_v48, %v554_v55 }
 0x172   : > { %v564_v57 = vsub.f32 0.0, %v561_v54  ;;  %v562_v59 = vadd.f32 %v1421_v48, %v553_v56  ;;  %v1426_v48 = vld [vmem:[#allocation13 + $0x1] ss:$0 sm:$0xff] }
 0x173   : > { %v566_v61 = vsub.f32 0.0, %v563_v58 }
 0x174   : > { %v567_v60 = vmul.f32 1.442695, %v564_v57  ;;  %v565_v62 = vsub.f32 0.0, %v562_v59 }
 0x175   : > { %v571_v63 = vmul.f32 1.442695, %v566_v61 }
 0x176   : > { %1603 = vpow2.f32 %v567_v60  ;;  %v569_v5 = vmul.f32 1.442695, %v565_v62 }
 0x177   : > { %1605 = vpow2.f32 %v571_v63 }
 0x178   : > { %1607 = vpow2.f32 %v569_v5 }
 0x180   : > { %v1604_v8 = vpop.eup %1603 }
 0x181   : > { %v573_v10 = vadd.f32 1.0, %v1604_v8  ;;  %v1606_v11 = vpop.eup %1605 }
 0x182   : > { %v1608_v12 = vpop.eup %1607  ;;  %v575_v13 = vadd.f32 1.0, %v1606_v11 }
 0x183   : > { %1609 = vrcp.f32 %v573_v10  ;;  %v574_v14 = vadd.f32 1.0, %v1608_v12 }
 0x184   : > { %1611 = vrcp.f32 %v575_v13 }
 0x185   : > { %1613 = vrcp.f32 %v574_v14 }
 0x18d   : > { %v1610_v15 = vpop.eup %1609 }
 0x18e   : > { %v1612_v16 = vpop.eup %1611  ;;  %v2256_v17 = vmul.f32 %v1610_v15, %v561_v54 }
 0x18f   : > { %v1614_v19 = vpop.eup %1613  ;;  %v2258_v20 = vmul.f32 %v1612_v16, %v563_v58 }
 0x190   : > { %v2260_v21 = vmul.f32 %v1614_v19, %v562_v59  ;;  %v722_v25 = vrot.slane %v2256_v17, 5 }
 0x191   : > { %v586_v22 = vpack.c.bf16 %v2258_v20, %v2258_v20  ;;  %v725_v23 = vrot.slane %v2258_v20, 5 }
 0x192   : > { %v585_v24 = vpack.c.bf16 %v2260_v21, %v2256_v17  ;;  %v723_v27 = vrot.slane %v2260_v21, 5 }
 0x193   : > { %v601_v28 = vshrl.u32 %v586_v22, 16  ;;  %v604_v29 = vshll.u32 %v586_v22, 16 }
 0x194   : > { %v593_v30 = vshrl.u32 %v585_v24, 16  ;;  %v596_v31 = vshll.u32 %v585_v24, 16  ;;  %v724_v32 = vsel %vm721_vm6, %v722_v25, %v723_v27  ;;  %v2271_v33 = vsel %vm721_vm6, %v723_v27, %v725_v23 }
 0x195   : > { %v603_v34 = vrot.slane %v601_v28, 2  ;;  %v606_v35 = vrot.slane %v604_v29, 3 }
 0x196   : > { %v595_v36 = vrot.slane %v593_v30, 2  ;;  %v598_v37 = vrot.slane %v596_v31, 3 }
 0x197   : > { %v607_v38 = vor.u32 %v606_v35, %v603_v34 }
 0x198   : > { %v599_v39 = vor.u32 %v598_v37, %v595_v36 }
 0x19a   : > { %v608_v40 = vsel %vm591_vm7, %v599_v39, %v607_v38 }
 0x19b   : > { %1460 = vmatmul.mubr.msk.bf16.vlgmr.msra.gmra.mrb[0].mxu1 %vm414_vm1, %v608_v40 }
 0x26e   : > { %v658_v41 = vpop.f32.mrb[0].mxu1 }
 0x26f   : > { %733 = vrot.lane.b32.xlu1 %v658_v41, %s1902_s25  ;;  %668 = vperm.xlu0 %1599, %v658_v41   ;;  %v1461_v42 = vpop.f32.mrb[1].mxu1 }
 0x270   : > { %v661_v43 = vpop.f32.mrb[2].mxu1 }
 0x271   : > { %v1462_v44 = vpop.f32.mrb[3].mxu1 }
 0x273   : > { %735 = vrot.lane.b32.xlu1 %v661_v43, %s1902_s25  ;;  %673 = vperm.xlu0 %1599, %v661_v43  }
 0x2e1   : > { %v734_v45 = vpop.permute.xlu1 %733 }
 0x2e2   : > { %739 = vst.msk [vmem:[#allocation6] sm:$0xff] %vm433_vm2, %v734_v45 }
 0x2e5   : > { %v736_v46 = vpop.permute.xlu1 %735 }
 0x2e6   : > { %740 = vst.msk [vmem:[#allocation6 + $0x8] sm:$0xff] %vm433_vm2, %v736_v46 }
 0x2ee   : > { %v669_v49 = vpop.permute.xlu0 %668 }
 0x2ef   : > { %v682_v50 = vmul.f32 %v1425_v47, %v669_v49 }
 0x2f1   : > { %v688_v51 = vadd.f32 %v1426_v48, %v682_v50 }
 0x2f2   : > { %v674_v52 = vpop.permute.xlu0 %673 }
 0x2f3   : > { %v692_v53 = vmul.f32 1.442695, %v688_v51  ;;  %v683_v54 = vmul.f32 %v1425_v47, %v674_v52  ;;  %vm690_vm9 = vcmp.gt.f32.partialorder %v688_v51, 20.0 }
 0x2f5   : > { %1615 = vpow2.f32 %v692_v53  ;;  %v689_v55 = vadd.f32 %v1426_v48, %v683_v54 }
 0x2f7   : > { %v694_v56 = vmul.f32 1.442695, %v689_v55  ;;  %vm691_vm11 = vcmp.gt.f32.partialorder %v689_v55, 20.0 }
 0x2f9   : > { %1617 = vpow2.f32 %v694_v56 }
 0x2ff   : > { %v1616_v57 = vpop.eup %1615 }
 0x300   : > { %v696_v58 = vadd.f32 1.0, %v1616_v57  ;;  %v699_v61 = vmul.f32 -0.5, %v1616_v57  ;;  %v702_v5 = vand.u32 2147483647, %v1616_v57 }
 0x302   : > { %1619 = vlog2.f32 %v696_v58  ;;  %v700_v62 = vadd.f32 1.0, %v699_v61  ;;  %vm703_vm8 = vcmp.lt.f32.partialorder %v702_v5, 0.0004427343 }
 0x303   : > { %v1618_v59 = vpop.eup %1617 }
 0x304   : > { %v705_v60 = vadd.f32 1.0, %v1618_v59  ;;  %v708_v63 = vmul.f32 -0.5, %v1618_v59  ;;  %v701_v11 = vmul.f32 %v1616_v57, %v700_v62  ;;  %v711_v13 = vand.u32 2147483647, %v1618_v59 }
 0x306   : > { %1621 = vlog2.f32 %v705_v60  ;;  %v709_v12 = vadd.f32 1.0, %v708_v63  ;;  %vm712_vm10 = vcmp.lt.f32.partialorder %v711_v13, 0.0004427343 }
 0x308   : > { %v710_v23 = vmul.f32 %v1618_v59, %v709_v12 }
 0x30c   : > { %v1620_v8 = vpop.eup %1619 }
 0x30d   : > { %v698_v10 = vmul.f32 0.6931472, %v1620_v8 }
 0x30f   : > { %v704_v14 = vsel %vm703_vm8, %v701_v11, %v698_v10 }
 0x310   : > { %v1622_v15 = vpop.eup %1621  ;;  %v714_v16 = vsel %vm690_vm9, %v688_v51, %v704_v14 }
 0x311   : > { %716 = vst.msk [vmem:[#allocation4] sm:$0xff] %vm414_vm1, %v714_v16  ;;  %v729_v19 = vmul.f32 %v724_v32, %v714_v16  ;;  %v707_v22 = vmul.f32 0.6931472, %v1622_v15 }
 0x313   : > { %731 = vst.msk [vmem:[#allocation5] sm:$0xff] %vm414_vm1, %v729_v19  ;;  %v713_v24 = vsel %vm712_vm10, %v710_v23, %v707_v22 }
 0x314   : > { %v715_v25 = vsel %vm691_vm11, %v689_v55, %v713_v24 }
 0x315   : > { %717 = vst.msk [vmem:[#allocation4 + $0x8] sm:$0xff] %vm414_vm1, %v715_v25  ;;  %v730_v27 = vmul.f32 %v2271_v33, %v715_v25 }
 0x317   : > { %732 = vst.msk [vmem:[#allocation5 + $0x8] sm:$0xff] %vm414_vm1, %v730_v27 }
 0x318 LB: >> { %v1903_v28 = vmov 1   ;;  %s2297_s21 = sshll.u32 %s1891_s19, 3  ;;  %v1904_v30 = vmov 0   ;;  %v1905_v33 = vmov 2   ;;  %v1906_v34 = vmov 6   ;;  %s748_s19 = sadd.s32 1, %s1891_s19   ;;  %s1891_s19 = sphi %s2288_s19, %s748_s19   ;;  %v1887_v9 = vphi %v2228_v9, %v2490_v9  }
 0x319   : >> { %1624 = vset.pattern.permute.xlu1 %v1903_v28  ;;  %s755_s29 = scalar_lea.vmem [#allocation6], %s2297_s21  ;;  %v1907_v35 = vmov 3   ;;  %v1908_v36 = vmov 7   ;;  %v1909_v37 = vmov 4   ;;  %v1910_v38 = vmov 5   ;;  %s751_s18 = scalar_lea.vmem [#allocation4], %s2297_s21 }
 0x31a   : >> { %v756_v29 = vld [vmem:[%s755_s29] sm:$0xff]  ;;  %v1911_v39 = vmov 1966171168   ;;  %v794_v41 = vlaneseq  ;;  %s753_s23 = scalar_lea.vmem [#allocation5], %s2297_s21  ;;  %vm1089_vm12 = vcmask 1040384   ;;  %vm1091_vm13 = vcmask 1041408  }
 0x31b   : >> { %757 = vxpose.xlu0.b32.start.end [1/1] (short) (narrow) %v756_v29, 16  ;;  %v792_v40 = vunpack.c.l.s4 %v1911_v39  ;;  %vm1094_vm14 = vcmask 1043456   ;;  %s1099_s9 = scalar_lea.vmem [#allocation7], %s2297_s21  ;;  %p745_p12 = scmp.ge.s32.totalorder %s748_s19, 2  }
 0x31c   : >> { %v2300_v43 = vshrl.u32 %v794_v41, 7  ;;  %v752_v45 = vld [vmem:[%s751_s18] sm:$0xff]  ;;  %1463 = vmatprep.subr.bf16.mxu0 (%p745_p12), %v1899_v0  ;;  %1467 = vmatprep.mubr.msk.bf16.mxu0 (%p745_p12), %vm1900_vm0, %v1899_v0  ;;  %s1912_s16 = smov (%p745_p12), 96   ;;  %s2491_s15 = sld [smem:[#allocation22_spill]] (%p745_p12) }
 0x31d   : >> { %v793_v42 = vunpack.c.0.s8 %v792_v40  ;;  %v790_v59 = vcombine.high %v752_v45, %v752_v45  ;;  %s1267_s19 = sshll.u32 (%p745_p12), %s2283_s17, 4  ;;  %s2492_s18 = sld [smem:[#allocation24_spill]] (%p745_p12)  ;;  %s2404_s19 = int_to_ptr.vmem [resolvable:$true] %s1267_s19 }
 0x31e   : >> { %v2305_v47 = vsub.s32 0, %v2300_v43  ;;  %v2314_v62 = vld [vmem:[%s753_s23] sm:$0xff]  ;;  %v930_v11 = vsub.s32 1, %v2300_v43  ;;  %s1785_s12 = scalar_lea.vmem (%p745_p12), %s2404_s19, 256  ;;  %s1913_s30 = smov (%p745_p12), [#allocation16]  }
 0x31f   : >> { %v796_v44 = vsub.s32 %v793_v42, %v2300_v43  ;;  %p1786_p1 = scmp.ne.s32.totalorder (%p745_p12), %s2404_s19, %s1785_s12  ;;  %s1789_s28 = sshll.u32 (%p745_p12), %s1913_s30, 4  ;;  %s1790_s28 = int_to_ptr.vmem [resolvable:$false] %s1789_s28 }
 0x320   : >> { %v906_v12 = vrot.slane %v2314_v62, %v2305_v47  ;;  %v931_v22 = vrot.slane %v2314_v62, %v930_v11  ;;  %v1022_v11 = vsub.s32 5, %v2300_v43  ;;  %s1791_s24 = scalar_lea.vmem (%p745_p12), %s1790_s28, 512  ;;  %p1792_p8 = scmp.lt.s32.totalorder (%p745_p12), %s2404_s19, %s1790_s28 }
 0x321   : >> { %v797_v46 = vrot.slane %v752_v45, %v796_v44  ;;  %v804_v63 = vrot.slane %v790_v59, %v796_v44  ;;  %v976_v45 = vsub.s32 3, %v2300_v43  ;;  %p1787_p4 = pnand (%p745_p12), %p1786_p1, %p2115_p2  ;;  %p1793_p0 = scmp.lt.s32.totalorder (%p745_p12), %s1791_s24, %s1785_s12 }
 0x322   : > { %s1440_s25 = sshll.u32 (%p745_p12), %s2491_s15, 8 }
 0x323   : >> { %v813_v48 = vrot.slane %v797_v46, %v796_v44  ;;  %v805_v49 = vcombine.high %v797_v46, %v797_v46  ;;  %v820_v13 = vrot.slane %v804_v63, %v796_v44  ;;  %v806_v25 = vcombine.high %v804_v63, %v804_v63  ;;  %s2402_s23 = scalar_lea.hbm (%p745_p12), %s2492_s18, %s1440_s25  ;;  %p1788_p6 = pneg (%p745_p12), %p1787_p4 }
 0x324   : > { %p1794_p5 = por (%p745_p12), %p1793_p0, %p1792_p8 }
 0x325   : >> { %v842_v50 = vrot.slane %v813_v48, %v2305_v47  ;;  %v827_v51 = vrot.slane %v805_v49, %v796_v44  ;;  %v835_v54 = vcombine.high %v813_v48, %v813_v48  ;;  %v858_v27 = vrot.slane %v820_v13, %v2305_v47 }
 0x326   : >> { %v836_v46 = vcombine.high %v820_v13, %v820_v13  ;;  %p1795_p10 = pnand (%p745_p12), %p1794_p5, %p1788_p6 }
 0x327   : >> { %v879_v52 = vmul.f32 %v842_v50, %v2216_v4  ;;  %v846_v53 = vrot.slane %v827_v51, %v2305_v47  ;;  %v850_v57 = vrot.slane %v835_v54, %v2305_v47  ;;  %v837_v60 = vcombine.high %v827_v51, %v827_v51 }
 0x328   : >> { %v977_v51 = vrot.slane %v2314_v62, %v976_v45 }
 0x329   : >> { %v887_v55 = vmul.f32 1.442695, %v879_v52  ;;  %v880_v56 = vmul.f32 %v846_v53, %v2216_v4  ;;  %v881_v61 = vmul.f32 %v850_v57, %v2216_v4  ;;  %v854_v8 = vrot.slane %v837_v60, %v2305_v47 }
 0x32a   : >> { %v866_v53 = vrot.slane %v836_v46, %v2305_v47 }
 0x32b   : >> { %1641 = vpow2.f32 %v887_v55  ;;  %v889_v58 = vmul.f32 1.442695, %v880_v56  ;;  %v891_v5 = vmul.f32 1.442695, %v881_v61  ;;  %v882_v14 = vmul.f32 %v854_v8, %v2216_v4 }
 0x32c   : >> { %v999_v55 = vsub.s32 4, %v2300_v43 }
 0x32d   : >> { %1643 = vpow2.f32 %v889_v58  ;;  %v885_v58 = vmul.f32 %v866_v53, %v2216_v4 }
 0x32e   : >> { %1645 = vpow2.f32 %v891_v5  ;;  %v1000_v60 = vrot.slane %v2314_v62, %v999_v55 }
 0x32f   : >> { %v899_v5 = vmul.f32 1.442695, %v885_v58 }
 0x335   : >> { %v1642_v10 = vpop.eup %1641 }
 0x336   : >> { %v913_v15 = vmul.f32 %v1887_v9, %v1642_v10 }
 0x337   : >> { %v1644_v24 = vpop.eup %1643 }
 0x344   : >> { %1623 = vset.pattern.permute.xlu0 %v1904_v30 }
 0x39b   : >> { %v773_v31 = vpop.trf.xlu0 }
 0x39c   : >> { %933 = vperm.xlu1 %1624, %v773_v31   ;;  %909 = vperm.xlu0 %1623, %v773_v31  }
 0x39f   : >> { %v774_v32 = vpop.trf.xlu0 }
 0x3a0   : >> { %1625 = vset.pattern.permute.xlu1 %v1905_v33  ;;  %1637 = vset.pattern.permute.xlu0 %v1906_v34 }
 0x3a1   : >> { %956 = vperm.xlu1 %1625, %v773_v31   ;;  %1055 = vperm.xlu0 %1637, %v774_v32  }
 0x3a5   : >> { %1626 = vset.pattern.permute.xlu1 %v1907_v35  ;;  %1639 = vset.pattern.permute.xlu0 %v1908_v36 }
 0x3a6   : >> { %979 = vperm.xlu1 %1626, %v773_v31  }
 0x3aa   : >> { %1627 = vset.pattern.permute.xlu1 %v1909_v37 }
 0x3ab   : >> { %1002 = vperm.xlu1 %1627, %v773_v31  }
 0x3af   : >> { %1628 = vset.pattern.permute.xlu1 %v1910_v38 }
 0x3b0   : >> { %1025 = vperm.xlu1 %1628, %v773_v31  }
 0x3b4   : >> { %1629 = vset.pattern.permute.xlu1 %v1906_v34  ;;  %v834_v34 = vrot.slane %v806_v25, %v796_v44 }
 0x3b5   : >> { %1048 = vperm.xlu1 %1629, %v773_v31  }
 0x3b6   : >> { %v862_v40 = vrot.slane %v834_v34, %v2305_v47  ;;  %v838_v13 = vcombine.high %v834_v34, %v834_v34 }
 0x3b8   : >> { %v884_v48 = vmul.f32 %v862_v40, %v2216_v4  ;;  %v870_v25 = vrot.slane %v838_v13, %v2305_v47 }
 0x3b9   : >> { %1630 = vset.pattern.permute.xlu1 %v1908_v36 }
 0x3ba   : >> { %1071 = vperm.xlu1 %1630, %v773_v31   ;;  %v897_v52 = vmul.f32 1.442695, %v884_v48 }
 0x3be   : >> { %1631 = vset.pattern.permute.xlu1 %v1904_v30 }
 0x3bf   : >> { %917 = vperm.xlu1 %1631, %v774_v32  }
 0x3c3   : >> { %1632 = vset.pattern.permute.xlu1 %v1903_v28  ;;  %v893_v28 = vmul.f32 1.442695, %v882_v14 }
 0x3c4   : >> { %940 = vperm.xlu1 %1632, %v774_v32  }
 0x3c5   : >> { %1647 = vpow2.f32 %v893_v28 }
 0x3c8   : >> { %1633 = vset.pattern.permute.xlu1 %v1905_v33 }
 0x3c9   : >> { %963 = vperm.xlu1 %1633, %v774_v32  }
 0x3cd   : >> { %1634 = vset.pattern.permute.xlu1 %v1907_v35  ;;  %v883_v35 = vmul.f32 %v858_v27, %v2216_v4 }
 0x3ce   : >> { %986 = vperm.xlu1 %1634, %v774_v32  }
 0x3cf   : >> { %v895_v39 = vmul.f32 1.442695, %v883_v35 }
 0x3d1   : >> { %1649 = vpow2.f32 %v895_v39 }
 0x3d2   : >> { %1635 = vset.pattern.permute.xlu1 %v1909_v37  ;;  %1651 = vpow2.f32 %v897_v52  ;;  %v1068_v52 = vsub.s32 7, %v2300_v43 }
 0x3d3   : >> { %1009 = vperm.xlu1 %1635, %v774_v32   ;;  %1653 = vpow2.f32 %v899_v5 }
 0x3d4   : >> { %v1069_v58 = vrot.slane %v2314_v62, %v1068_v52 }
 0x3d7   : >> { %1636 = vset.pattern.permute.xlu1 %v1910_v38 }
 0x3d8   : >> { %1032 = vperm.xlu1 %1636, %v774_v32  }
 0x3dc   : >> { %1638 = vset.pattern.permute.xlu1 %v1908_v36  ;;  %v1646_v36 = vpop.eup %1645 }
 0x3dd   : >> { %1078 = vperm.xlu1 %1638, %v774_v32   ;;  %v953_v32 = vsub.s32 2, %v2300_v43  ;;  %v1648_v50 = vpop.eup %1647 }
 0x3de   : >> { %v1650_v61 = vpop.eup %1649 }
 0x3df   : >> { %v954_v37 = vrot.slane %v2314_v62, %v953_v32 }
 0x41b   : >> { %v934_v16 = vpop.permute.xlu1 %933  ;;  %v910_v19 = vpop.permute.xlu0 %909 }
 0x41c   : >> { %v912_v23 = vmul.f32 %v910_v19, %v906_v12  ;;  %v936_v30 = vmul.f32 %v934_v16, %v931_v22  ;;  %v1652_v16 = vpop.eup %1651 }
 0x41e   : >> { %v914_v29 = vadd.f32 %v913_v15, %v912_v23  ;;  %v1023_v15 = vrot.slane %v2314_v62, %v1022_v11  ;;  %v1045_v23 = vsub.s32 6, %v2300_v43 }
 0x420   : >> { %v937_v31 = vmul.f32 %v1644_v24, %v914_v29  ;;  %v957_v33 = vpop.permute.xlu1 %956  ;;  %v1046_v28 = vrot.slane %v2314_v62, %v1045_v23 }
 0x421   : >> { %v959_v42 = vmul.f32 %v957_v33, %v954_v37 }
 0x422   : >> { %v938_v9 = vadd.f32 %v937_v31, %v936_v30  ;;  %v886_v30 = vmul.f32 %v870_v25, %v2216_v4  ;;  %v1654_v31 = vpop.eup %1653  ;;  %v1657_v4 = vld [vmem:[%s2463_s7] sm:$0xff] (%p745_p12)  }
 0x423   : > { %1464 = vmatpush3.bf16.msra.mxu0 (%p745_p12), %v1657_v4 }
 0x424   : >> { %v960_v41 = vmul.f32 %v1646_v36, %v938_v9  ;;  %v901_v36 = vmul.f32 1.442695, %v886_v30  ;;  %1465 = vmatprep.subr.bf16.mxu0 (%p745_p12), %v1899_v0  ;;  %v1109_v0 = vmul.f32 (%p745_p12), %v2201_v1, %v2260_v21 }
 0x425   : >> { %v980_v38 = vpop.permute.xlu1 %979 }
 0x426   : >> { %v961_v44 = vadd.f32 %v960_v41, %v959_v42  ;;  %v982_v57 = vmul.f32 %v980_v38, %v977_v51  ;;  %1655 = vpow2.f32 %v901_v36  ;;  %v1056_v42 = vpop.permute.xlu0 %1055 }
 0x428   : >> { %v983_v54 = vmul.f32 %v1648_v50, %v961_v44 }
 0x42a   : >> { %v1003_v49 = vpop.permute.xlu1 %1002  ;;  %v984_v59 = vadd.f32 %v983_v54, %v982_v57 }
 0x42b   : >> { %v1005_v8 = vmul.f32 %v1003_v49, %v1000_v60 }
 0x42c   : >> { %v1006_v10 = vmul.f32 %v1650_v61, %v984_v59 }
 0x42e   : >> { %v1007_v14 = vadd.f32 %v1006_v10, %v1005_v8 }
 0x42f   : >> { %v1026_v56 = vpop.permute.xlu1 %1025 }
 0x430   : >> { %v1028_v19 = vmul.f32 %v1026_v56, %v1023_v15  ;;  %v1029_v22 = vmul.f32 %v1652_v16, %v1007_v14 }
 0x432   : >> { %v1030_v27 = vadd.f32 %v1029_v22, %v1028_v19 }
 0x434   : >> { %v1049_v63 = vpop.permute.xlu1 %1048  ;;  %v1052_v35 = vmul.f32 %v1654_v31, %v1030_v27 }
 0x435   : >> { %v1051_v34 = vmul.f32 %v1049_v63, %v1046_v28  ;;  %v1656_v63 = vpop.eup %1655 }
 0x437   : >> { %v1053_v41 = vadd.f32 %v1052_v35, %v1051_v34 }
 0x439   : >> { %v1072_v12 = vpop.permute.xlu1 %1071  ;;  %v1058_v50 = vmul.f32 %v1056_v42, %v1053_v41  ;;  %v1075_v19 = vmul.f32 %v1656_v63, %v1053_v41 }
 0x43a   : >> { %v1074_v15 = vmul.f32 %v1072_v12, %v1069_v58 }
 0x43b   : >> { %v1059_v55 = vsel %vm414_vm1, %v1058_v50, 0.0 }
 0x43c   : >> { %v1060_v8 = vrot.slane %v1059_v55, 4 }
 0x43e   : >> { %v918_v24 = vpop.permute.xlu1 %917  ;;  %v1061_v25 = vadd.f32 %v1060_v8, %v1059_v55 }
 0x43f   : >> { %v920_v37 = vmul.f32 %v918_v24, %v914_v29 }
 0x441   : >> { %v921_v47 = vsel %vm414_vm1, %v920_v37, 0.0  ;;  %v1062_v37 = vrot.slane %v1061_v25, 2 }
 0x443   : >> { %v941_v32 = vpop.permute.xlu1 %940 }
 0x444   : >> { %v943_v33 = vmul.f32 %v941_v32, %v938_v9  ;;  %v922_v9 = vrot.slane %v921_v47, 4 }
 0x446   : >> { %v944_v39 = vsel %vm414_vm1, %v943_v33, 0.0  ;;  %v923_v56 = vadd.f32 %v922_v9, %v921_v47  ;;  %v1076_v33 = vadd.f32 %v1075_v19, %v1074_v15  }
 0x447   : >> { %v945_v46 = vrot.slane %v944_v39, 4 }
 0x448   : >> { %v964_v38 = vpop.permute.xlu1 %963  ;;  %v924_v43 = vrot.slane %v923_v56, 2  ;;  %1101 = vst.msk [vmem:[#allocation2] sm:$0xff] (%p745_p12), %vm414_vm1, %v1076_v33 }
 0x449   : >> { %v966_v40 = vmul.f32 %v964_v38, %v961_v44  ;;  %v946_v29 = vadd.f32 %v945_v46, %v944_v39 }
 0x44a   : >> { %v925_v62 = vadd.f32 %v924_v43, %v923_v56 }
 0x44b   : >> { %v967_v45 = vsel %vm414_vm1, %v966_v40, 0.0  ;;  %v947_v5 = vrot.slane %v946_v29, 2 }
 0x44c   : >> { %v968_v48 = vrot.slane %v967_v45, 4  ;;  %v926_v40 = vrot.slane %v925_v62, 1 }
 0x44d   : >> { %v987_v49 = vpop.permute.xlu1 %986  ;;  %v948_v22 = vadd.f32 %v947_v5, %v946_v29 }
 0x44e   : >> { %v989_v51 = vmul.f32 %v987_v49, %v984_v59  ;;  %v969_v54 = vadd.f32 %v968_v48, %v967_v45  ;;  %v1063_v48 = vadd.f32 %v1062_v37, %v1061_v25  ;;  %v927_v9 = vadd.f32 %v926_v40, %v925_v62  ;;  %v1658_v25 = vld [vmem:[%s2463_s7 + $0x8] sm:$0xff] (%p745_p12)  }
 0x44f   : >> { %v949_v34 = vrot.slane %v948_v22, 1  ;;  %1466 = vmatpush3.bf16.msra.mxu0 (%p745_p12), %v1658_v25 }
 0x450   : >> { %v990_v53 = vsel %vm414_vm1, %v989_v51, 0.0  ;;  %v970_v10 = vrot.slane %v969_v54, 2  ;;  %v1064_v55 = vrot.slane %v1063_v48, 1 }
 0x451   : >> { %v991_v44 = vrot.slane %v990_v53, 4  ;;  %v950_v45 = vadd.f32 %v949_v34, %v948_v22  ;;  %v1115_v34 = vrot.slane (%p745_p12), %v1109_v0, 5 }
 0x452   : >> { %v1010_v57 = vpop.permute.xlu1 %1009  ;;  %v971_v28 = vadd.f32 %v970_v10, %v969_v54  ;;  %v1065_v8 = vadd.f32 %v1064_v55, %v1063_v48 }
 0x453   : >> { %v992_v60 = vadd.f32 %v991_v44, %v990_v53  ;;  %v1012_v61 = vmul.f32 %v1010_v57, %v1007_v14  ;;  %v1090_v54 = vsel %vm1089_vm12, %v927_v9, %v950_v45  ;;  %v2490_v9 = vmov %v1076_v33 }
 0x454   : >> { %v972_v38 = vrot.slane %v971_v28, 1 }
 0x455   : >> { %v1013_v59 = vsel %vm414_vm1, %v1012_v61, 0.0  ;;  %v993_v11 = vrot.slane %v992_v60, 2 }
 0x456   : >> { %v1014_v13 = vrot.slane %v1013_v59, 4  ;;  %v973_v49 = vadd.f32 %v972_v38, %v971_v28 }
 0x457   : >> { %v1033_v16 = vpop.permute.xlu1 %1032  ;;  %v994_v30 = vadd.f32 %v993_v11, %v992_v60  ;;  %v1123_v11 = vsub.f32 (%p745_p12), 0.0, %v2237_v18 }
 0x458   : >> { %v1015_v23 = vadd.f32 %v1014_v13, %v1013_v59  ;;  %v1035_v24 = vmul.f32 %v1033_v16, %v1030_v27  ;;  %v1092_v56 = vsel %vm1091_vm13, %v1090_v54, %v973_v49  ;;  %v1124_v13 = vsub.f32 (%p745_p12), 0.0, %v2241_v26 }
 0x459   : >> { %v995_v41 = vrot.slane %v994_v30, 1  ;;  %v1125_v15 = vmul.f32 (%p745_p12), 1.442695, %v1123_v11 }
 0x45a   : >> { %v1016_v14 = vrot.slane %v1015_v23, 2  ;;  %v1036_v31 = vsel %vm414_vm1, %v1035_v24, 0.0  ;;  %v1127_v16 = vmul.f32 (%p745_p12), 1.442695, %v1124_v13 }
 0x45b   : >> { %v1037_v32 = vrot.slane %v1036_v31, 4  ;;  %v996_v51 = vadd.f32 %v995_v41, %v994_v30  ;;  %1659 = vpow2.f32 (%p745_p12), %v1125_v15 }
 0x45c   : >> { %v1017_v35 = vadd.f32 %v1016_v14, %v1015_v23  ;;  %v1079_v36 = vpop.permute.xlu1 %1078  ;;  %1661 = vpow2.f32 (%p745_p12), %v1127_v16 }
 0x45d   : >> { %v1038_v12 = vadd.f32 %v1037_v32, %v1036_v31  ;;  %v1081_v39 = vmul.f32 %v1079_v36, %v1076_v33  ;;  %v1093_v58 = vsel %vm721_vm6, %v1092_v56, %v996_v51  ;;  %v1108_v31 = vmul.f32 (%p745_p12), %v2201_v1, %v2256_v17 }
 0x45e   : >> { %v1018_v42 = vrot.slane %v1017_v35, 1  ;;  %v1110_v32 = vmul.f32 (%p745_p12), %v2201_v1, %v2258_v20 }
 0x45f   : >> { %v1039_v27 = vrot.slane %v1038_v12, 2  ;;  %v1082_v47 = vsel %vm414_vm1, %v1081_v39, 0.0  ;;  %v1114_v33 = vrot.slane (%p745_p12), %v1108_v31, 5 }
 0x460   : >> { %v1083_v46 = vrot.slane %v1082_v47, 4  ;;  %v1019_v29 = vadd.f32 %v1018_v42, %v1017_v35  ;;  %v1117_v35 = vrot.slane (%p745_p12), %v1110_v32, 5 }
 0x461   : >> { %v1040_v50 = vadd.f32 %v1039_v27, %v1038_v12 }
 0x462   : >> { %v1084_v52 = vadd.f32 %v1083_v46, %v1082_v47  ;;  %v1095_v61 = vsel %vm1094_vm14, %v1093_v58, %v1019_v29  ;;  %v1118_v38 = vsel (%p745_p12), %vm721_vm6, %v1115_v34, %v1117_v35 }
 0x463   : >> { %v1041_v53 = vrot.slane %v1040_v50, 1 }
 0x464   : >> { %v1085_v44 = vrot.slane %v1084_v52, 2 }
 0x465   : >> { %v1042_v57 = vadd.f32 %v1041_v53, %v1040_v50  ;;  %v1660_v19 = vpop.eup (%p745_p12), %1659 }
 0x466   : >> { %v1086_v60 = vadd.f32 %v1085_v44, %v1084_v52  ;;  %v1662_v22 = vpop.eup (%p745_p12), %1661  ;;  %v1129_v23 = vadd.f32 (%p745_p12), 1.0, %v1660_v19 }
 0x467   : >> { %v1096_v63 = vsel %vm545_vm5, %v1095_v61, %v1042_v57  ;;  %747 = sbr.rel (!%p745_p12) target bundleno = 792 (0x318), region = 128  ;;  %v1130_v24 = vadd.f32 (%p745_p12), 1.0, %v1662_v22 }
 0x468   : >> { %v1087_v5 = vrot.slane %v1086_v60, 1  ;;  %v1097_v59 = vsel %vm524_vm4, %v1096_v63, %v1065_v8  ;;  %1663 = vrcp.f32 (%p745_p12), %v1129_v23 }
 0x469   : > { %1665 = vrcp.f32 (%p745_p12), %v1130_v24 }
 0x46a   : >> { %v1088_v10 = vadd.f32 %v1087_v5, %v1086_v60 }
 0x46c   : >> { %v1098_v43 = vsel %vm501_vm3, %v1097_v59, %v1088_v10 }
 0x46d   : >> { %1100 = vst.msk [vmem:[%s1099_s9] sm:$0xff] %vm414_vm1, %v1098_v43  ;;  %s1252_s9 = scalar_lea.sflag (%p745_p12), [#allocation10], %s2173_s27 }
 0x472   : > { %v1664_v28 = vpop.eup %1663 }
 0x473   : > { %v1666_v62 = vpop.eup %1665  ;;  %v1135_v30 = vmul.f32 %v1664_v28, %v2237_v18  ;;  %v1116_v18 = vsel %vm721_vm6, %v1114_v33, %v1115_v34 }
 0x474   : > { %v1136_v14 = vmul.f32 %v1666_v62, %v2241_v26  ;;  %v1102_v36 = vld [vmem:[#allocation7] sm:$0xff]  ;;  %v1103_v37 = vld [vmem:[#allocation7 + $0x8] sm:$0xff] }
 0x475   : > { %1139 = vrot.lane.b32.xlu0 %v1135_v30, %s1912_s16  ;;  %v1121_v12 = vadd.f32 %v1116_v18, %v1102_v36  ;;  %v1122_v39 = vadd.f32 %v1118_v38, %v1103_v37 }
 0x479   : > { %1141 = vrot.lane.b32.xlu0 %v1136_v14, %s1912_s16 }
 0x4e7   : > { %v1140_v26 = vpop.permute.xlu0 %1139 }
 0x4e8   : > { %v1145_v17 = vmul.f32 %v1140_v26, %v1121_v12 }
 0x4eb   : > { %v1142_v40 = vpop.permute.xlu0 %1141 }
 0x4ec   : > { %v1146_v41 = vmul.f32 %v1142_v40, %v1122_v39 }
 0x4ee   : > { %v1147_v42 = vpack.c.bf16 %v1146_v41, %v1145_v17 }
 0x4f0   : > { %1468 = vmatmul.mubr.msk.bf16.vlgmr.msra.gmra.mrb[4].mxu0 %vm414_vm1, %v1147_v42 }
 0x5c3   : > { %v1201_v21 = vpop.f32.mrb[4].mxu0 }
 0x5c4   : > { %v1469_v1 = vpop.f32.mrb[5].mxu0  ;;  %v1208_v20 = vsel %vm433_vm2, %v1201_v21, 0.0 }
 0x5c5   : > { %1209 = vadd.xlane.f32.xlu1 %v1208_v20  ;;  %v1204_v27 = vpop.f32.mrb[6].mxu0 }
 0x5c6   : > { %v1470_v47 = vpop.f32.mrb[7].mxu0  ;;  %v1211_v45 = vsel %vm433_vm2, %v1204_v27, 0.0 }
 0x5c9   : > { %1212 = vadd.xlane.f32.xlu1 %v1211_v45 }
 0x652   : > { %v1210_v46 = vpop.xlane.xlu1 %1209 }
 0x653   : > { %v1215_v48 = vmul.f32 0.0625, %v1210_v46 }
 0x655   : > { %v1217_v49 = vsub.f32 %v1201_v21, %v1215_v48 }
 0x656   : > { %v1213_v50 = vpop.xlane.xlu1 %1212 }
 0x657   : > { %v1216_v9 = vmul.f32 0.0625, %v1213_v50  ;;  %v1219_v51 = vmul.f32 %v1217_v49, %v1217_v49 }
 0x659   : > { %v1218_v52 = vsub.f32 %v1204_v27, %v1216_v9  ;;  %v1221_v29 = vsel %vm433_vm2, %v1219_v51, 0.0 }
 0x65a   : > { %1222 = vadd.xlane.f32.xlu0 %v1221_v29 }
 0x65b   : > { %v1220_v53 = vmul.f32 %v1218_v52, %v1218_v52 }
 0x65d   : > { %v1224_v54 = vsel %vm433_vm2, %v1220_v53, 0.0 }
 0x65e   : > { %1225 = vadd.xlane.f32.xlu1 %v1224_v54 }
 0x6e7   : > { %v1223_v44 = vpop.xlane.xlu0 %1222 }
 0x6e8   : > { %v1227_v55 = vmul.f32 0.0625, %v1223_v44 }
 0x6ea   : > { %v1229_v56 = vadd.f32 1e-05, %v1227_v55 }
 0x6eb   : > { %v1226_v57 = vpop.xlane.xlu1 %1225 }
 0x6ec   : > { %1667 = vrsqrt.f32 %v1229_v56  ;;  %v1228_v58 = vmul.f32 0.0625, %v1226_v57 }
 0x6ee   : > { %v1230_v60 = vadd.f32 1e-05, %v1228_v58 }
 0x6f0   : > { %1669 = vrsqrt.f32 %v1230_v60 }
 0x6f6   : > { %v1668_v61 = vpop.eup %1667 }
 0x6f7   : > { %v1233_v63 = vmul.f32 %v1668_v61, %v1217_v49 }
 0x6f9   : > { %v1239_v5 = vmul.f32 %v2206_v2, %v1233_v63 }
 0x6fa   : > { %v1670_v8 = vpop.eup %1669 }
 0x6fb   : > { %v1234_v10 = vmul.f32 %v1670_v8, %v1218_v52  ;;  %v1245_v59 = vadd.f32 %v2211_v3, %v1239_v5 }
 0x6fd   : > { %v1240_v43 = vmul.f32 %v2206_v2, %v1234_v10  ;;  %v1247_v11 = vadd.f32 %v1245_v59, %v2221_v6 }
 0x6ff   : > { %v1246_v13 = vadd.f32 %v2211_v3, %v1240_v43  ;;  %1249 = vst.msk [vmem:[%s2283_s17] sm:$0xff] %vm433_vm2, %v1247_v11 }
 0x701   : > { %v1248_v2 = vadd.f32 %v1246_v13, %v2223_v7 }
 0x703   : > { %1250 = vst.msk [vmem:[%s2283_s17 + $0x8] sm:$0xff] %vm433_vm2, %v1248_v2 }
 0x704   : > { %1798 = shalt.err (!%p1795_p10)
}
 0x705   : > { %s1799_s17 = scalar_lea.hbm %s2402_s23, 256  ;;  %s1803_s25 = scalar_lea.hbm %s2492_s18, 512 }
 0x706   : > { %p1800_p13 = scmp.ne.s32.totalorder %s2402_s23, %s1799_s17  ;;  %p1804_p7 = scmp.lt.u32.totalorder %s2402_s23, %s2492_s18 }
 0x707   : > { %p1805_p11 = scmp.lt.u32.totalorder %s1803_s25, %s1799_s17  ;;  %p1807_p1 = scmp.lt.u32.totalorder %s1799_s17, %s2402_s23 }
 0x708   : > { %p1801_p9 = pnand %p1800_p13, %p2115_p2 }
 0x709   : > { %p1806_p12 = por %p1805_p11, %p1804_p7 }
 0x70a   : > { %p1802_p3 = pneg %p1801_p9 }
 0x70b   : > { %p1808_p4 = por %p1807_p1, %p1806_p12 }
 0x70d   : > { %p1809_p6 = pnand %p1808_p4, %p1802_p3 }
 0x70f   : > { %1812 = shalt.err (!%p1809_p6)
}
 0x710   : > { %s1914_s12 = smov 128   ;;  %s1915_s30 = smov 8  }
 0x711   : > { %1485 = dma.vmem_to_hbm [thread:$0]  (%p2115_p2), %s2404_s19, 256, %s2402_s23, %s1252_s9, %s1914_s12, %s1914_s12, %s1915_s30  }
 0x712 PF: > { %s2493_s28 = sld [smem:[#allocation21_spill]]  ;;  %s2494_s24 = sld [smem:[#allocation23_spill]] }
 0x713   : > { %p2496_p0 = scmp.ge.s32.totalorder %s1883_s14, 2 }
 0x718   : > { %s1282_s16 = sand.u32 1, %s2493_s28   ;;  %p2495_p8 = scmp.ne.s32.totalorder %s2494_s24, 0 }
 0x719   : > { %s1283_s17 = scalar_lea.sflag [#allocation10], %s1282_s16 }
 0x71a   : > { %p1502_p5 = pnand %p2496_p0, %p2495_p8 }
 0x71c   : > { %1858 = dma.done.wait (!%p1502_p5), %s1283_s17, 256  }
 0x71d   : > { %1860 = vsyncadd (!%p1502_p5), %s1283_s17, 4294967040  ;;  %s27_s14 = sadd.s32 1, %s1883_s14   ;;  %s2497_s30 = smov %s1867_s10 }
 0x71e   : > { %p24_p10 = scmp.ge.s32.totalorder %s27_s14, 4   ;;  %s2498_s10 = smov %s1871_s11 }
 0x71f   : > { %s2499_s11 = smov %s2127_s22  ;;  %s2500_s12 = smov %s1879_s13 }
 0x720   : > { %s2501_s13 = smov %s2503_s20  ;;  %26 = sbr.rel (!%p24_p10) target bundleno = 10 (0xa), region = 139 }
 0x727   :  { %1288 = vsyncpa [#allocation9], 1 }
 0x728   :  { %1290 = vsyncpa [#allocation9 + $0x1], 1 }
 0x729   :  { %1291 = vsyncpa [#allocation12], 1 }
 0x72a   :  { %1292 = vsyncpa [#allocation15], 1 }
 0x72b   :  { %1293 = vsyncpa [#allocation10], 1 }
 0x72c   :  { %1295 = vsyncpa [#allocation10 + $0x1], 1 }

// kernel: tpu_custom_call.1
= control target key start
LH: loop header
LB: loop body
LE: loop exit
PB: predicated region body
PF: predicated region fallthrough
CT: control target
= control target key end

     0   :  { %s2456_s0 = inlined_call_operand.hbm [shape: f32[2,16,16], index: 0, kind: input, shape index: {}]   ;;  %s2457_s1 = inlined_call_operand.vmem [shape: bf16[16,64], index: 1, kind: input, shape index: {}]   ;;  %s2458_s2 = inlined_call_operand.hbm [shape: f32[4,32], index: 2, kind: input, shape index: {}]   ;;  %s2459_s3 = inlined_call_operand.hbm [shape: f32[3,32], index: 3, kind: input, shape index: {}]   ;;  %s2460_s4 = inlined_call_operand.vmem [shape: bf16[32,128], index: 4, kind: input, shape index: {}]   ;;  %s2461_s5 = inlined_call_operand.hbm [shape: f32[1,32], index: 5, kind: input, shape index: {}]   ;;  %s2462_s6 = inlined_call_operand.vmem [shape: f32[8,32], index: 6, kind: input, shape index: {}]   ;;  %s2463_s7 = inlined_call_operand.vmem [shape: bf16[32,16], index: 7, kind: input, shape index: {}]   ;;  %s2464_s8 = inlined_call_operand.vmem [shape: f32[2,16], index: 8, kind: input, shape index: {}]   ;;  %s2465_s9 = inlined_call_operand.hbm [shape: f32[2,16,16], index: 9, kind: output, shape index: {}]  }
   0x1   :  { %2473 = sst [smem:[#allocation24_spill]] %s2465_s9 }
   0x2   :  { %14 = vsyncpa [#allocation9], 0 }
   0x3   :  { %16 = vsyncpa [#allocation9 + $0x1], 0 }
   0x4   :  { %17 = vsyncpa [#allocation12], 0 }
   0x5   :  { %18 = vsyncpa [#allocation15], 0 }
   0x6   :  { %19 = vsyncpa [#allocation10], 0 }
   0x7   :  { %21 = vsyncpa [#allocation10 + $0x1], 0  ;;  %s1966_s30 = smov 0   ;;  %s1968_s10 = smov 0  }
   0x8   :  { %s1970_s11 = smov 0   ;;  %s1972_s12 = smov 0  }
   0x9   :  { %s1974_s13 = smov 0   ;;  %s1976_s14 = smov 0  }
   0xa LB: > { %2474 = sst [smem:[#allocation21_spill]] %s1863_s30  ;;  %s1399_s15 = sadd.s32 4294967295, %s1883_s14   ;;  %s1883_s14 = sphi %s1976_s14, %s27_s14   ;;  %s1879_s13 = sphi %s1974_s13, %s2501_s13   ;;  %s1875_s12 = sphi %s1972_s12, %s2500_s12   ;;  %s1871_s11 = sphi %s1970_s11, %s2499_s11   ;;  %s1867_s10 = sphi %s1968_s10, %s2498_s10   ;;  %s1863_s30 = sphi %s1966_s30, %s2497_s30  }
   0xb   : > { %2475 = sst [smem:[#allocation22_spill]] %s1875_s12  ;;  %s1400_s16 = sadd.s32 4294967294, %s1883_s14  }
   0xc   : > { %p61_p0 = scmp.ne.s32.totalorder %s1867_s10, %s1863_s30  ;;  %p2000_p1 = scmp.eq.s32.totalorder %s1399_s15, 0 }
   0xd   : > { %p2004_p2 = scmp.eq.s32.totalorder %s1399_s15, 1  ;;  %p261_p3 = scmp.eq.s32.totalorder %s1400_s16, 1 }
   0xe   : > { %s2476_s17 = scalar_select %p2000_p1, 1, 0 }
   0xf   : > { %s2477_s18 = scalar_select %p2004_p2, 1, 0 }
  0x10   : > { %p2010_p4 = por %p2000_p1, %p61_p0  ;;  %p1401_p5 = scmp.ge.s32.totalorder %s1883_s14, 1 }
  0x11   : > { %p2015_p6 = por %p261_p3, %p61_p0  ;;  %p268_p7 = scmp.lt.s32.totalorder %s1883_s14, 3 }
  0x12   : > { %s2478_s19 = scalar_select %p2010_p4, 1, 0 }
  0x13   : > { %s2479_s20 = scalar_select %p2015_p6, 1, 0 }
  0x14   : > { %p2020_p8 = pnand %p1401_p5, %p268_p7  ;;  %s1893_s22 = smov [#allocation11]  }
  0x15   : > { %2480 = sst [smem:[#allocation23_spill]] %s2479_s20  ;;  %s284_s23 = sshll.u32 %s1893_s22, 4  ;;  %s285_s23 = int_to_ptr.vmem [resolvable:$true] %s284_s23 }
  0x16   : > { %s2481_s21 = scalar_select %p2020_p8, 1, 0 }
  0x17   : > { %p1487_p10 = pneg %p2020_p8  ;;  %s1894_s24 = smov [#allocation13]  }
  0x18   : > { %s295_s25 = sshll.u32 %s1894_s24, 4  ;;  %s1895_s27 = smov [#allocation14]   ;;  %s2033_s25 = int_to_ptr.vmem [resolvable:$true] %s295_s25 }
  0x19   : > { %p2029_p11 = pnand %p1487_p10, %p2000_p1  ;;  %s309_s28 = sshll.u32 %s1895_s27, 4  ;;  %s2035_s28 = int_to_ptr.vmem [resolvable:$true] %s309_s28 }
  0x1a   : > { %s1671_s16 = scalar_lea.hbm %s2458_s2, 64 }
  0x1b   : > { %p1672_p12 = scmp.ne.s32.totalorder %s2458_s2, %s1671_s16  ;;  %p2045_p13 = pneg %p2029_p11 }
  0x1c   : > { %p1678_p5 = scmp.lt.u32.totalorder %s1671_s16, %s2458_s2 }
  0x1d   : > { %p1674_p0 = pnand %p2045_p13, %p1672_p12 }
  0x1f   : > { %p1675_p3 = pneg %p1674_p0 }
  0x21   : > { %p1680_p7 = pnand %p1678_p5, %p1675_p3 }
  0x23   : > { %1683 = shalt.err (!%p1680_p7)
}
  0x24   : > { %s1684_s29 = scalar_lea.vmem %s285_s23, 64  ;;  %p1692_p1 = scmp.lt.s32.totalorder %s285_s23, %s285_s23 }
  0x25   : > { %p1685_p10 = scmp.ne.s32.totalorder %s285_s23, %s1684_s29  ;;  %p1693_p4 = scmp.lt.s32.totalorder %s1684_s29, %s1684_s29 }
  0x27   : > { %p1687_p9 = pnand %p1685_p10, %p2045_p13  ;;  %p1694_p8 = por %p1693_p4, %p1692_p1 }
  0x29   : > { %p1688_p6 = pneg %p1687_p9 }
  0x2b   : > { %p1695_p2 = pnand %p1694_p8, %p1688_p6 }
  0x2d   : > { %1698 = shalt.err (!%p1695_p2)
}
  0x2e   : > { %1490 = dma.hbm_to_vmem [thread:$0]  (!%p2029_p11), %s2458_s2, 64, %s285_s23, [#allocation12]  }
  0x2f   : > { %s1699_s22 = scalar_lea.hbm %s2459_s3, 64 }
  0x30   : > { %p1700_p9 = scmp.ne.s32.totalorder %s2459_s3, %s1699_s22  ;;  %p1706_p2 = scmp.lt.u32.totalorder %s1699_s22, %s2459_s3 }
  0x32   : > { %p1702_p12 = pnand %p1700_p9, %p2045_p13 }
  0x34   : > { %p1703_p1 = pneg %p1702_p12 }
  0x36   : > { %p1708_p4 = pnand %p1706_p2, %p1703_p1 }
  0x38   : > { %1711 = shalt.err (!%p1708_p4)
}
  0x39   : > { %s1712_s23 = scalar_lea.vmem %s2033_s25, 64  ;;  %p1720_p3 = scmp.lt.s32.totalorder %s2033_s25, %s2033_s25 }
  0x3a   : > { %p1713_p6 = scmp.ne.s32.totalorder %s2033_s25, %s1712_s23  ;;  %p1721_p5 = scmp.lt.s32.totalorder %s1712_s23, %s1712_s23 }
  0x3c   : > { %p1715_p8 = pnand %p1713_p6, %p2045_p13  ;;  %p1722_p7 = por %p1721_p5, %p1720_p3 }
  0x3e   : > { %p1716_p0 = pneg %p1715_p8 }
  0x40   : > { %p1723_p10 = pnand %p1722_p7, %p1716_p0 }
  0x42   : > { %1726 = shalt.err (!%p1723_p10)
}
  0x43   : > { %1493 = dma.hbm_to_vmem [thread:$0]  (!%p2029_p11), %s2459_s3, 64, %s2033_s25, [#allocation12]  }
  0x44   : > { %s1727_s30 = scalar_lea.hbm %s2461_s5, 16 }
  0x45   : > { %p1728_p9 = scmp.ne.s32.totalorder %s2461_s5, %s1727_s30  ;;  %p1734_p2 = scmp.lt.u32.totalorder %s1727_s30, %s2461_s5 }
  0x47   : > { %p1730_p12 = pnand %p1728_p9, %p2045_p13 }
  0x49   : > { %p1731_p1 = pneg %p1730_p12 }
  0x4b   : > { %p1736_p4 = pnand %p1734_p2, %p1731_p1 }
  0x4d   : > { %1739 = shalt.err (!%p1736_p4)
}
  0x4e   : > { %s1740_s25 = scalar_lea.vmem %s2035_s28, 16  ;;  %s1747_s23 = scalar_lea.vmem %s2035_s28, 32 }
  0x4f   : > { %p1741_p6 = scmp.ne.s32.totalorder %s2035_s28, %s1740_s25  ;;  %p1748_p3 = scmp.lt.s32.totalorder %s2035_s28, %s2035_s28 }
  0x50   : > { %p1749_p5 = scmp.lt.s32.totalorder %s1747_s23, %s1740_s25 }
  0x51   : > { %p1743_p8 = pnand %p1741_p6, %p2045_p13 }
  0x52   : > { %p1750_p7 = por %p1749_p5, %p1748_p3 }
  0x53   : > { %p1744_p0 = pneg %p1743_p8 }
  0x55   : > { %p1751_p10 = pnand %p1750_p7, %p1744_p0 }
  0x57   : > { %1754 = shalt.err (!%p1751_p10)
}
  0x58   : > { %1496 = dma.hbm_to_vmem [thread:$0]  (!%p2029_p11), %s2461_s5, 16, %s2035_s28, [#allocation15]  }
  0x59   : > { %s48_s24 = sadd.s32 1, %s1871_s11  ;;  %s39_s20 = sadd.s32 1, %s1879_s13 }
  0x5a   : > { %p55_p13 = scmp.ne.s32.totalorder %s1871_s11, %s1867_s10  ;;  %p41_p9 = scmp.ge.s32.totalorder %s39_s20, 2 }
  0x5b   : > { %p56_p12 = scmp.eq.s32.totalorder %s1883_s14, 0  ;;  %p2484_p1 = scmp.ne.s32.totalorder %s2477_s18, 0 }
  0x5c   : > { %p1508_p4 = scmp.lt.s32.totalorder %s1883_s14, 2  ;;  %s2503_s20 = smov (%p41_p9, %s39_s20), 0 }
  0x5d   : > { %p2115_p2 = por %p2484_p1, %p55_p13  ;;  %p57_p6 = por %p56_p12, %p55_p13 }
  0x5e   : > { %s329_s15 = sand.u32 1, %s1871_s11   ;;  %s43_s30 = ssub.s32 %s1879_s13, %s2503_s20 }
  0x5f   : > { %p46_p8 = scmp.eq.s32.totalorder %s43_s30, 0  ;;  %s1406_s28 = sshll.u32 %s329_s15, 4 }
  0x60   : > { %s1439_s16 = sshll.u32 %s1879_s13, 8  ;;  %s333_s25 = scalar_lea.vmem [#allocation8], %s1406_s28 }
  0x61   : > { %s2127_s22 = scalar_select %p46_p8, %s1871_s11, %s48_s24  }
  0x62   : > { %s2132_s18 = scalar_lea.hbm %s2456_s0, %s1439_s16  ;;  %s342_s23 = sshll.u32 %s333_s25, 4  ;;  %s2134_s23 = int_to_ptr.vmem [resolvable:$true] %s342_s23 }
  0x63   : > { %p2138_p11 = pnand %p1508_p4, %p57_p6  ;;  %s2142_s12 = scalar_lea.sflag [#allocation9], %s329_s15 }
  0x64   : > { %s1755_s24 = scalar_lea.hbm %s2132_s18, 256  ;;  %s1760_s16 = scalar_lea.hbm %s2456_s0, 512 }
  0x65   : > { %p1756_p0 = scmp.ne.s32.totalorder %s2132_s18, %s1755_s24  ;;  %p1757_p3 = pneg %p2138_p11 }
  0x66   : > { %p1761_p10 = scmp.lt.u32.totalorder %s2132_s18, %s2456_s0  ;;  %p1762_p13 = scmp.lt.u32.totalorder %s1760_s16, %s1755_s24 }
  0x67   : > { %p1758_p5 = pnand %p1757_p3, %p1756_p0  ;;  %p1764_p12 = scmp.lt.u32.totalorder %s1755_s24, %s2132_s18 }
  0x68   : > { %p1763_p9 = por %p1762_p13, %p1761_p10 }
  0x69   : > { %p1759_p7 = pneg %p1758_p5 }
  0x6a   : > { %p1765_p1 = por %p1764_p12, %p1763_p9 }
  0x6c   : > { %p1766_p4 = pnand %p1765_p1, %p1759_p7 }
  0x6e   : > { %1769 = shalt.err (!%p1766_p4)
}
  0x6f   : > { %s1770_s15 = scalar_lea.vmem %s2134_s23, 256  ;;  %s1896_s25 = smov [#allocation8]  }
  0x70   : > { %p1771_p6 = scmp.ne.s32.totalorder %s2134_s23, %s1770_s15  ;;  %s1775_s30 = sshll.u32 %s1896_s25, 4  ;;  %s1776_s30 = int_to_ptr.vmem [resolvable:$false] %s1775_s30 }
  0x71   : > { %s1777_s28 = scalar_lea.vmem %s1776_s30, 512  ;;  %p1778_p5 = scmp.lt.s32.totalorder %s2134_s23, %s1776_s30 }
  0x72   : > { %p1773_p8 = pnand %p1771_p6, %p1757_p3  ;;  %p1779_p10 = scmp.lt.s32.totalorder %s1777_s28, %s1770_s15 }
  0x74   : > { %p1774_p0 = pneg %p1773_p8  ;;  %p1780_p13 = por %p1779_p10, %p1778_p5 }
  0x76   : > { %p1781_p9 = pnand %p1780_p13, %p1774_p0 }
  0x78   : > { %1784 = shalt.err (!%p1781_p9)
}
  0x79   : > { %s1897_s24 = smov 128   ;;  %s1898_s16 = smov 8  }
  0x7a   : > { %1500 = dma.hbm_to_vmem [thread:$0]  (!%p2138_p11), %s2132_s18, 256, %s2134_s23, %s2142_s12, %s1897_s24, %s1897_s24, %s1898_s16  }
  0x7b   : > { %p2487_p3 = scmp.ne.s32.totalorder %s2481_s21, 0 }
  0x7c   : > { %s2173_s27 = sand.u32 (!%p2487_p3), 1, %s1867_s10   ;;  %p2488_p7 = scmp.ne.s32.totalorder (!%p2487_p3), %s2478_s19, 0 }
  0x7d   : > { %354 = sbr.rel (%p2487_p3) target bundleno = 1810 (0x712), region = 56  ;;  %s1410_s29 = sshll.u32 (!%p2487_p3), %s2173_s27, 4 }
  0x7e   : > { %s357_s15 = scalar_lea.sflag (!%p2487_p3), [#allocation9], %s2173_s27  ;;  %s360_s25 = scalar_lea.vmem (!%p2487_p3), [#allocation8], %s1410_s29 }
  0x84   : > { %1846 = dma.done.wait (%p2488_p7), %s357_s15, 256  }
  0x85   : > { %1848 = vsyncadd (%p2488_p7), %s357_s15, 4294967040  ;;  %p2489_p11 = scmp.ne.s32.totalorder %s2476_s17, 0 }
  0x87   : > { %1850 = dma.done.wait (%p2489_p11), [#allocation12], 128  }
  0x88   : > { %1852 = vsyncadd (%p2489_p11), [#allocation12], 4294967168 }
  0x89   : > { %1854 = dma.done.wait (%p2489_p11), [#allocation15], 16  }
  0x8a   : > { %1856 = vsyncadd (%p2489_p11), [#allocation15], 4294967280  ;;  %v1899_v0 = vmov 0.0   ;;  %vm1900_vm0 = vmmov 0   ;;  %vm414_vm1 = vcmask 261120   ;;  %v2216_v4 = vld [vmem:[%s2462_s6] sm:$0xff] }
  0x8b   : > { %1449 = vmatprep.subr.bf16.mxu0 %v1899_v0  ;;  %1451 = vmatprep.mubr.msk.bf16.mxu0 %vm1900_vm0, %v1899_v0  ;;  %415 = vst.msk [vmem:[#allocation2] sm:$0xff] %vm414_vm1, %v1899_v0  ;;  %416 = vst.msk [vmem:[#allocation3] sm:$0xff] %vm414_vm1, %v1899_v0  ;;  %v2201_v1 = vld [vmem:[#allocation13 + $0x2] ss:$0 sm:$0xff]  ;;  %v2206_v2 = vld [vmem:[%s2464_s8] ss:$0 sm:$0xff] }
  0x8c   : > { %1455 = vmatprep.subr.bf16.mxu1 %v1899_v0  ;;  %1459 = vmatprep.mubr.msk.bf16.mxu1 %vm1900_vm0, %v1899_v0  ;;  %v2211_v3 = vld [vmem:[%s2464_s8 + $0x1] ss:$0 sm:$0xff]  ;;  %v2223_v7 = vld [vmem:[%s360_s25 + $0x8] sm:$0xff]  ;;  %vm433_vm2 = vcmask 130048   ;;  %v1901_v12 = vmov 0   ;;  %vm501_vm3 = vcmask 1046528  }
  0x8d   : > { %v1600_v5 = vld [vmem:[%s2457_s1] sm:$0xff]   ;;  %v1602_v11 = vld [vmem:[%s2460_s4 + $0x8] sm:$0xff]   ;;  %1599 = vset.pattern.permute.xlu0 %v1901_v12  ;;  %v1418_v14 = vld [vmem:[#allocation11 + $0x1] ss:$0 sm:$0xff]  ;;  %vm524_vm4 = vcmask 1045504   ;;  %vm545_vm5 = vcmask 1044480  }
  0x8e   : > { %v2221_v6 = vld [vmem:[%s360_s25] sm:$0xff]  ;;  %1450 = vmatpush3.bf16.msra.mxu0 %v1600_v5  ;;  %vm721_vm6 = vcmask 1042432   ;;  %vm591_vm7 = vsmask.f32 5376  ;;  %s1902_s25 = smov 127   ;;  %s2283_s17 = scalar_lea.vmem [#allocation16], %s1410_s29 }
  0x8f   : > { %v424_v8 = vpack.c.bf16 %v2223_v7, %v2221_v6  ;;  %v1601_v10 = vld [vmem:[%s2460_s4] sm:$0xff]   ;;  %v1419_v15 = vld [vmem:[#allocation11 + $0x2] ss:$0 sm:$0xff]  ;;  %v1420_v19 = vld [vmem:[#allocation11 + $0x3] ss:$0 sm:$0xff]  ;;  %s2288_s19 = smov 0  }
  0x90   : > { %1456 = vmatpush3.bf16.msra.mxu1 %v1601_v10  ;;  %v1417_v20 = vld [vmem:[#allocation11] ss:$0 sm:$0xff]  ;;  %v1421_v48 = vld [vmem:[#allocation13] ss:$0 sm:$0xff] }
  0x91   : > { %1452 = vmatmul.mubr.msk.bf16.vlgmr.msra.gmra.mrb[0].mxu0 %vm433_vm2, %v424_v8  ;;  %1457 = vmatprep.subr.bf16.mxu1 %v1899_v0 }
  0x92   : > { %v2228_v9 = vld [vmem:[#allocation2] sm:$0xff]   ;;  %v478_v13 = vld [vmem:[#allocation3] sm:$0xff] }
  0x93   : > { %v495_v16 = vmul.f32 %v1418_v14, %v478_v13  ;;  %v518_v17 = vmul.f32 %v1419_v15, %v478_v13  ;;  %v484_v25 = vmul.f32 %v1417_v20, %v478_v13 }
  0x94   : > { %1458 = vmatpush3.bf16.msra.mxu1 %v1602_v11 }
  0x95   : > { %v502_v22 = vrot.slane %v495_v16, 1  ;;  %v525_v28 = vrot.slane %v518_v17, 2 }
 0x164   : > { %v2237_v18 = vpop.f32.mrb[0].mxu0 }
 0x165   : > { %v496_v21 = vmul.f32 %v1418_v14, %v2237_v18  ;;  %v519_v23 = vmul.f32 %v1419_v15, %v2237_v18  ;;  %v1453_v24 = vpop.f32.mrb[1].mxu0  ;;  %v541_v30 = vmul.f32 %v1420_v19, %v2237_v18  ;;  %v485_v41 = vmul.f32 %v1417_v20, %v2237_v18 }
 0x166   : > { %v2241_v26 = vpop.f32.mrb[2].mxu0 }
 0x167   : > { %v503_v27 = vrot.slane %v496_v21, 1  ;;  %v526_v29 = vrot.slane %v519_v23, 2  ;;  %556 = vst.msk [vmem:[#allocation3] sm:$0xff] %vm414_vm1, %v2241_v26  ;;  %v1454_v31 = vpop.f32.mrb[3].mxu0  ;;  %v497_v32 = vmul.f32 %v1418_v14, %v2241_v26  ;;  %v520_v33 = vmul.f32 %v1419_v15, %v2241_v26 }
 0x168   : > { %v542_v34 = vmul.f32 %v1420_v19, %v2241_v26  ;;  %v486_v36 = vmul.f32 %v1417_v20, %v2241_v26  ;;  %v546_v43 = vrot.slane %v541_v30, 3 }
 0x169   : > { %v504_v35 = vsel %vm501_vm3, %v502_v22, %v503_v27  ;;  %v505_v38 = vrot.slane %v497_v32, 1  ;;  %v528_v39 = vrot.slane %v520_v33, 2  ;;  %v527_v42 = vsel %vm524_vm4, %v525_v28, %v526_v29 }
 0x16a   : > { %v510_v37 = vadd.f32 %v504_v35, %v484_v25  ;;  %v547_v40 = vrot.slane %v542_v34, 3 }
 0x16b   : > { %v506_v45 = vsel %vm501_vm3, %v503_v27, %v505_v38  ;;  %v512_v46 = vadd.f32 %v505_v38, %v486_v36  ;;  %v529_v47 = vsel %vm524_vm4, %v526_v29, %v528_v39 }
 0x16c   : > { %v533_v44 = vadd.f32 %v527_v42, %v510_v37  ;;  %v511_v49 = vadd.f32 %v506_v45, %v485_v41  ;;  %v548_v50 = vsel %vm545_vm5, %v546_v43, %v547_v40 }
 0x16d   : > { %v535_v52 = vadd.f32 %v528_v39, %v512_v46 }
 0x16e   : > { %v552_v51 = vadd.f32 %v546_v43, %v533_v44  ;;  %v534_v53 = vadd.f32 %v529_v47, %v511_v49  ;;  %v1425_v47 = vld [vmem:[#allocation14] ss:$0 sm:$0xff] }
 0x16f   : > { %v554_v55 = vadd.f32 %v547_v40, %v535_v52 }
 0x170   : > { %v561_v54 = vadd.f32 %v1421_v48, %v552_v51  ;;  %v553_v56 = vadd.f32 %v548_v50, %v534_v53 }
 0x171   : > { %v563_v58 = vadd.f32 %v1421_v48, %v554_v55 }
 0x172   : > { %v564_v57 = vsub.f32 0.0, %v561_v54  ;;  %v562_v59 = vadd.f32 %v1421_v48, %v553_v56  ;;  %v1426_v48 = vld [vmem:[#allocation13 + $0x1] ss:$0 sm:$0xff] }
 0x173   : > { %v566_v61 = vsub.f32 0.0, %v563_v58 }
 0x174   : > { %v567_v60 = vmul.f32 1.442695, %v564_v57  ;;  %v565_v62 = vsub.f32 0.0, %v562_v59 }
 0x175   : > { %v571_v63 = vmul.f32 1.442695, %v566_v61 }
 0x176   : > { %1603 = vpow2.f32 %v567_v60  ;;  %v569_v5 = vmul.f32 1.442695, %v565_v62 }
 0x177   : > { %1605 = vpow2.f32 %v571_v63 }
 0x178   : > { %1607 = vpow2.f32 %v569_v5 }
 0x180   : > { %v1604_v8 = vpop.eup %1603 }
 0x181   : > { %v573_v10 = vadd.f32 1.0, %v1604_v8  ;;  %v1606_v11 = vpop.eup %1605 }
 0x182   : > { %v1608_v12 = vpop.eup %1607  ;;  %v575_v13 = vadd.f32 1.0, %v1606_v11 }
 0x183   : > { %1609 = vrcp.f32 %v573_v10  ;;  %v574_v14 = vadd.f32 1.0, %v1608_v12 }
 0x184   : > { %1611 = vrcp.f32 %v575_v13 }
 0x185   : > { %1613 = vrcp.f32 %v574_v14 }
 0x18d   : > { %v1610_v15 = vpop.eup %1609 }
 0x18e   : > { %v1612_v16 = vpop.eup %1611  ;;  %v2256_v17 = vmul.f32 %v1610_v15, %v561_v54 }
 0x18f   : > { %v1614_v19 = vpop.eup %1613  ;;  %v2258_v20 = vmul.f32 %v1612_v16, %v563_v58 }
 0x190   : > { %v2260_v21 = vmul.f32 %v1614_v19, %v562_v59  ;;  %v722_v25 = vrot.slane %v2256_v17, 5 }
 0x191   : > { %v586_v22 = vpack.c.bf16 %v2258_v20, %v2258_v20  ;;  %v725_v23 = vrot.slane %v2258_v20, 5 }
 0x192   : > { %v585_v24 = vpack.c.bf16 %v2260_v21, %v2256_v17  ;;  %v723_v27 = vrot.slane %v2260_v21, 5 }
 0x193   : > { %v601_v28 = vshrl.u32 %v586_v22, 16  ;;  %v604_v29 = vshll.u32 %v586_v22, 16 }
 0x194   : > { %v593_v30 = vshrl.u32 %v585_v24, 16  ;;  %v596_v31 = vshll.u32 %v585_v24, 16  ;;  %v724_v32 = vsel %vm721_vm6, %v722_v25, %v723_v27  ;;  %v2271_v33 = vsel %vm721_vm6, %v723_v27, %v725_v23 }
 0x195   : > { %v603_v34 = vrot.slane %v601_v28, 2  ;;  %v606_v35 = vrot.slane %v604_v29, 3 }
 0x196   : > { %v595_v36 = vrot.slane %v593_v30, 2  ;;  %v598_v37 = vrot.slane %v596_v31, 3 }
 0x197   : > { %v607_v38 = vor.u32 %v606_v35, %v603_v34 }
 0x198   : > { %v599_v39 = vor.u32 %v598_v37, %v595_v36 }
 0x19a   : > { %v608_v40 = vsel %vm591_vm7, %v599_v39, %v607_v38 }
 0x19b   : > { %1460 = vmatmul.mubr.msk.bf16.vlgmr.msra.gmra.mrb[0].mxu1 %vm414_vm1, %v608_v40 }
 0x26e   : > { %v658_v41 = vpop.f32.mrb[0].mxu1 }
 0x26f   : > { %733 = vrot.lane.b32.xlu1 %v658_v41, %s1902_s25  ;;  %668 = vperm.xlu0 %1599, %v658_v41   ;;  %v1461_v42 = vpop.f32.mrb[1].mxu1 }
 0x270   : > { %v661_v43 = vpop.f32.mrb[2].mxu1 }
 0x271   : > { %v1462_v44 = vpop.f32.mrb[3].mxu1 }
 0x273   : > { %735 = vrot.lane.b32.xlu1 %v661_v43, %s1902_s25  ;;  %673 = vperm.xlu0 %1599, %v661_v43  }
 0x2e1   : > { %v734_v45 = vpop.permute.xlu1 %733 }
 0x2e2   : > { %739 = vst.msk [vmem:[#allocation6] sm:$0xff] %vm433_vm2, %v734_v45 }
 0x2e5   : > { %v736_v46 = vpop.permute.xlu1 %735 }
 0x2e6   : > { %740 = vst.msk [vmem:[#allocation6 + $0x8] sm:$0xff] %vm433_vm2, %v736_v46 }
 0x2ee   : > { %v669_v49 = vpop.permute.xlu0 %668 }
 0x2ef   : > { %v682_v50 = vmul.f32 %v1425_v47, %v669_v49 }
 0x2f1   : > { %v688_v51 = vadd.f32 %v1426_v48, %v682_v50 }
 0x2f2   : > { %v674_v52 = vpop.permute.xlu0 %673 }
 0x2f3   : > { %v692_v53 = vmul.f32 1.442695, %v688_v51  ;;  %v683_v54 = vmul.f32 %v1425_v47, %v674_v52  ;;  %vm690_vm9 = vcmp.gt.f32.partialorder %v688_v51, 20.0 }
 0x2f5   : > { %1615 = vpow2.f32 %v692_v53  ;;  %v689_v55 = vadd.f32 %v1426_v48, %v683_v54 }
 0x2f7   : > { %v694_v56 = vmul.f32 1.442695, %v689_v55  ;;  %vm691_vm11 = vcmp.gt.f32.partialorder %v689_v55, 20.0 }
 0x2f9   : > { %1617 = vpow2.f32 %v694_v56 }
 0x2ff   : > { %v1616_v57 = vpop.eup %1615 }
 0x300   : > { %v696_v58 = vadd.f32 1.0, %v1616_v57  ;;  %v699_v61 = vmul.f32 -0.5, %v1616_v57  ;;  %v702_v5 = vand.u32 2147483647, %v1616_v57 }
 0x302   : > { %1619 = vlog2.f32 %v696_v58  ;;  %v700_v62 = vadd.f32 1.0, %v699_v61  ;;  %vm703_vm8 = vcmp.lt.f32.partialorder %v702_v5, 0.0004427343 }
 0x303   : > { %v1618_v59 = vpop.eup %1617 }
 0x304   : > { %v705_v60 = vadd.f32 1.0, %v1618_v59  ;;  %v708_v63 = vmul.f32 -0.5, %v1618_v59  ;;  %v701_v11 = vmul.f32 %v1616_v57, %v700_v62  ;;  %v711_v13 = vand.u32 2147483647, %v1618_v59 }
 0x306   : > { %1621 = vlog2.f32 %v705_v60  ;;  %v709_v12 = vadd.f32 1.0, %v708_v63  ;;  %vm712_vm10 = vcmp.lt.f32.partialorder %v711_v13, 0.0004427343 }
 0x308   : > { %v710_v23 = vmul.f32 %v1618_v59, %v709_v12 }
 0x30c   : > { %v1620_v8 = vpop.eup %1619 }
 0x30d   : > { %v698_v10 = vmul.f32 0.6931472, %v1620_v8 }
 0x30f   : > { %v704_v14 = vsel %vm703_vm8, %v701_v11, %v698_v10 }
 0x310   : > { %v1622_v15 = vpop.eup %1621  ;;  %v714_v16 = vsel %vm690_vm9, %v688_v51, %v704_v14 }
 0x311   : > { %716 = vst.msk [vmem:[#allocation4] sm:$0xff] %vm414_vm1, %v714_v16  ;;  %v729_v19 = vmul.f32 %v724_v32, %v714_v16  ;;  %v707_v22 = vmul.f32 0.6931472, %v1622_v15 }
 0x313   : > { %731 = vst.msk [vmem:[#allocation5] sm:$0xff] %vm414_vm1, %v729_v19  ;;  %v713_v24 = vsel %vm712_vm10, %v710_v23, %v707_v22 }
 0x314   : > { %v715_v25 = vsel %vm691_vm11, %v689_v55, %v713_v24 }
 0x315   : > { %717 = vst.msk [vmem:[#allocation4 + $0x8] sm:$0xff] %vm414_vm1, %v715_v25  ;;  %v730_v27 = vmul.f32 %v2271_v33, %v715_v25 }
 0x317   : > { %732 = vst.msk [vmem:[#allocation5 + $0x8] sm:$0xff] %vm414_vm1, %v730_v27 }
 0x318 LB: >> { %v1903_v28 = vmov 1   ;;  %s2297_s21 = sshll.u32 %s1891_s19, 3  ;;  %v1904_v30 = vmov 0   ;;  %v1905_v33 = vmov 2   ;;  %v1906_v34 = vmov 6   ;;  %s748_s19 = sadd.s32 1, %s1891_s19   ;;  %s1891_s19 = sphi %s2288_s19, %s748_s19   ;;  %v1887_v9 = vphi %v2228_v9, %v2490_v9  }
 0x319   : >> { %1624 = vset.pattern.permute.xlu1 %v1903_v28  ;;  %s755_s29 = scalar_lea.vmem [#allocation6], %s2297_s21  ;;  %v1907_v35 = vmov 3   ;;  %v1908_v36 = vmov 7   ;;  %v1909_v37 = vmov 4   ;;  %v1910_v38 = vmov 5   ;;  %s751_s18 = scalar_lea.vmem [#allocation4], %s2297_s21 }
 0x31a   : >> { %v756_v29 = vld [vmem:[%s755_s29] sm:$0xff]  ;;  %v1911_v39 = vmov 1966171168   ;;  %v794_v41 = vlaneseq  ;;  %s753_s23 = scalar_lea.vmem [#allocation5], %s2297_s21  ;;  %vm1089_vm12 = vcmask 1040384   ;;  %vm1091_vm13 = vcmask 1041408  }
 0x31b   : >> { %757 = vxpose.xlu0.b32.start.end [1/1] (short) (narrow) %v756_v29, 16  ;;  %v792_v40 = vunpack.c.l.s4 %v1911_v39  ;;  %vm1094_vm14 = vcmask 1043456   ;;  %s1099_s9 = scalar_lea.vmem [#allocation7], %s2297_s21  ;;  %p745_p12 = scmp.ge.s32.totalorder %s748_s19, 2  }
 0x31c   : >> { %v2300_v43 = vshrl.u32 %v794_v41, 7  ;;  %v752_v45 = vld [vmem:[%s751_s18] sm:$0xff]  ;;  %1463 = vmatprep.subr.bf16.mxu0 (%p745_p12), %v1899_v0  ;;  %1467 = vmatprep.mubr.msk.bf16.mxu0 (%p745_p12), %vm1900_vm0, %v1899_v0  ;;  %s1912_s16 = smov (%p745_p12), 96   ;;  %s2491_s15 = sld [smem:[#allocation22_spill]] (%p745_p12) }
 0x31d   : >> { %v793_v42 = vunpack.c.0.s8 %v792_v40  ;;  %v790_v59 = vcombine.high %v752_v45, %v752_v45  ;;  %s1267_s19 = sshll.u32 (%p745_p12), %s2283_s17, 4  ;;  %s2492_s18 = sld [smem:[#allocation24_spill]] (%p745_p12)  ;;  %s2404_s19 = int_to_ptr.vmem [resolvable:$true] %s1267_s19 }
 0x31e   : >> { %v2305_v47 = vsub.s32 0, %v2300_v43  ;;  %v2314_v62 = vld [vmem:[%s753_s23] sm:$0xff]  ;;  %v930_v11 = vsub.s32 1, %v2300_v43  ;;  %s1785_s12 = scalar_lea.vmem (%p745_p12), %s2404_s19, 256  ;;  %s1913_s30 = smov (%p745_p12), [#allocation16]  }
 0x31f   : >> { %v796_v44 = vsub.s32 %v793_v42, %v2300_v43  ;;  %p1786_p1 = scmp.ne.s32.totalorder (%p745_p12), %s2404_s19, %s1785_s12  ;;  %s1789_s28 = sshll.u32 (%p745_p12), %s1913_s30, 4  ;;  %s1790_s28 = int_to_ptr.vmem [resolvable:$false] %s1789_s28 }
 0x320   : >> { %v906_v12 = vrot.slane %v2314_v62, %v2305_v47  ;;  %v931_v22 = vrot.slane %v2314_v62, %v930_v11  ;;  %v1022_v11 = vsub.s32 5, %v2300_v43  ;;  %s1791_s24 = scalar_lea.vmem (%p745_p12), %s1790_s28, 512  ;;  %p1792_p8 = scmp.lt.s32.totalorder (%p745_p12), %s2404_s19, %s1790_s28 }
 0x321   : >> { %v797_v46 = vrot.slane %v752_v45, %v796_v44  ;;  %v804_v63 = vrot.slane %v790_v59, %v796_v44  ;;  %v976_v45 = vsub.s32 3, %v2300_v43  ;;  %p1787_p4 = pnand (%p745_p12), %p1786_p1, %p2115_p2  ;;  %p1793_p0 = scmp.lt.s32.totalorder (%p745_p12), %s1791_s24, %s1785_s12 }
 0x322   : > { %s1440_s25 = sshll.u32 (%p745_p12), %s2491_s15, 8 }
 0x323   : >> { %v813_v48 = vrot.slane %v797_v46, %v796_v44  ;;  %v805_v49 = vcombine.high %v797_v46, %v797_v46  ;;  %v820_v13 = vrot.slane %v804_v63, %v796_v44  ;;  %v806_v25 = vcombine.high %v804_v63, %v804_v63  ;;  %s2402_s23 = scalar_lea.hbm (%p745_p12), %s2492_s18, %s1440_s25  ;;  %p1788_p6 = pneg (%p745_p12), %p1787_p4 }
 0x324   : > { %p1794_p5 = por (%p745_p12), %p1793_p0, %p1792_p8 }
 0x325   : >> { %v842_v50 = vrot.slane %v813_v48, %v2305_v47  ;;  %v827_v51 = vrot.slane %v805_v49, %v796_v44  ;;  %v835_v54 = vcombine.high %v813_v48, %v813_v48  ;;  %v858_v27 = vrot.slane %v820_v13, %v2305_v47 }
 0x326   : >> { %v836_v46 = vcombine.high %v820_v13, %v820_v13  ;;  %p1795_p10 = pnand (%p745_p12), %p1794_p5, %p1788_p6 }
 0x327   : >> { %v879_v52 = vmul.f32 %v842_v50, %v2216_v4  ;;  %v846_v53 = vrot.slane %v827_v51, %v2305_v47  ;;  %v850_v57 = vrot.slane %v835_v54, %v2305_v47  ;;  %v837_v60 = vcombine.high %v827_v51, %v827_v51 }
 0x328   : >> { %v977_v51 = vrot.slane %v2314_v62, %v976_v45 }
 0x329   : >> { %v887_v55 = vmul.f32 1.442695, %v879_v52  ;;  %v880_v56 = vmul.f32 %v846_v53, %v2216_v4  ;;  %v881_v61 = vmul.f32 %v850_v57, %v2216_v4  ;;  %v854_v8 = vrot.slane %v837_v60, %v2305_v47 }
 0x32a   : >> { %v866_v53 = vrot.slane %v836_v46, %v2305_v47 }
 0x32b   : >> { %1641 = vpow2.f32 %v887_v55  ;;  %v889_v58 = vmul.f32 1.442695, %v880_v56  ;;  %v891_v5 = vmul.f32 1.442695, %v881_v61  ;;  %v882_v14 = vmul.f32 %v854_v8, %v2216_v4 }
 0x32c   : >> { %v999_v55 = vsub.s32 4, %v2300_v43 }
 0x32d   : >> { %1643 = vpow2.f32 %v889_v58  ;;  %v885_v58 = vmul.f32 %v866_v53, %v2216_v4 }
 0x32e   : >> { %1645 = vpow2.f32 %v891_v5  ;;  %v1000_v60 = vrot.slane %v2314_v62, %v999_v55 }
 0x32f   : >> { %v899_v5 = vmul.f32 1.442695, %v885_v58 }
 0x335   : >> { %v1642_v10 = vpop.eup %1641 }
 0x336   : >> { %v913_v15 = vmul.f32 %v1887_v9, %v1642_v10 }
 0x337   : >> { %v1644_v24 = vpop.eup %1643 }
 0x344   : >> { %1623 = vset.pattern.permute.xlu0 %v1904_v30 }
 0x39b   : >> { %v773_v31 = vpop.trf.xlu0 }
 0x39c   : >> { %933 = vperm.xlu1 %1624, %v773_v31   ;;  %909 = vperm.xlu0 %1623, %v773_v31  }
 0x39f   : >> { %v774_v32 = vpop.trf.xlu0 }
 0x3a0   : >> { %1625 = vset.pattern.permute.xlu1 %v1905_v33  ;;  %1637 = vset.pattern.permute.xlu0 %v1906_v34 }
 0x3a1   : >> { %956 = vperm.xlu1 %1625, %v773_v31   ;;  %1055 = vperm.xlu0 %1637, %v774_v32  }
 0x3a5   : >> { %1626 = vset.pattern.permute.xlu1 %v1907_v35  ;;  %1639 = vset.pattern.permute.xlu0 %v1908_v36 }
 0x3a6   : >> { %979 = vperm.xlu1 %1626, %v773_v31  }
 0x3aa   : >> { %1627 = vset.pattern.permute.xlu1 %v1909_v37 }
 0x3ab   : >> { %1002 = vperm.xlu1 %1627, %v773_v31  }
 0x3af   : >> { %1628 = vset.pattern.permute.xlu1 %v1910_v38 }
 0x3b0   : >> { %1025 = vperm.xlu1 %1628, %v773_v31  }
 0x3b4   : >> { %1629 = vset.pattern.permute.xlu1 %v1906_v34  ;;  %v834_v34 = vrot.slane %v806_v25, %v796_v44 }
 0x3b5   : >> { %1048 = vperm.xlu1 %1629, %v773_v31  }
 0x3b6   : >> { %v862_v40 = vrot.slane %v834_v34, %v2305_v47  ;;  %v838_v13 = vcombine.high %v834_v34, %v834_v34 }
 0x3b8   : >> { %v884_v48 = vmul.f32 %v862_v40, %v2216_v4  ;;  %v870_v25 = vrot.slane %v838_v13, %v2305_v47 }
 0x3b9   : >> { %1630 = vset.pattern.permute.xlu1 %v1908_v36 }
 0x3ba   : >> { %1071 = vperm.xlu1 %1630, %v773_v31   ;;  %v897_v52 = vmul.f32 1.442695, %v884_v48 }
 0x3be   : >> { %1631 = vset.pattern.permute.xlu1 %v1904_v30 }
 0x3bf   : >> { %917 = vperm.xlu1 %1631, %v774_v32  }
 0x3c3   : >> { %1632 = vset.pattern.permute.xlu1 %v1903_v28  ;;  %v893_v28 = vmul.f32 1.442695, %v882_v14 }
 0x3c4   : >> { %940 = vperm.xlu1 %1632, %v774_v32  }
 0x3c5   : >> { %1647 = vpow2.f32 %v893_v28 }
 0x3c8   : >> { %1633 = vset.pattern.permute.xlu1 %v1905_v33 }
 0x3c9   : >> { %963 = vperm.xlu1 %1633, %v774_v32  }
 0x3cd   : >> { %1634 = vset.pattern.permute.xlu1 %v1907_v35  ;;  %v883_v35 = vmul.f32 %v858_v27, %v2216_v4 }
 0x3ce   : >> { %986 = vperm.xlu1 %1634, %v774_v32  }
 0x3cf   : >> { %v895_v39 = vmul.f32 1.442695, %v883_v35 }
 0x3d1   : >> { %1649 = vpow2.f32 %v895_v39 }
 0x3d2   : >> { %1635 = vset.pattern.permute.xlu1 %v1909_v37  ;;  %1651 = vpow2.f32 %v897_v52  ;;  %v1068_v52 = vsub.s32 7, %v2300_v43 }
 0x3d3   : >> { %1009 = vperm.xlu1 %1635, %v774_v32   ;;  %1653 = vpow2.f32 %v899_v5 }
 0x3d4   : >> { %v1069_v58 = vrot.slane %v2314_v62, %v1068_v52 }
 0x3d7   : >> { %1636 = vset.pattern.permute.xlu1 %v1910_v38 }
 0x3d8   : >> { %1032 = vperm.xlu1 %1636, %v774_v32  }
 0x3dc   : >> { %1638 = vset.pattern.permute.xlu1 %v1908_v36  ;;  %v1646_v36 = vpop.eup %1645 }
 0x3dd   : >> { %1078 = vperm.xlu1 %1638, %v774_v32   ;;  %v953_v32 = vsub.s32 2, %v2300_v43  ;;  %v1648_v50 = vpop.eup %1647 }
 0x3de   : >> { %v1650_v61 = vpop.eup %1649 }
 0x3df   : >> { %v954_v37 = vrot.slane %v2314_v62, %v953_v32 }
 0x41b   : >> { %v934_v16 = vpop.permute.xlu1 %933  ;;  %v910_v19 = vpop.permute.xlu0 %909 }
 0x41c   : >> { %v912_v23 = vmul.f32 %v910_v19, %v906_v12  ;;  %v936_v30 = vmul.f32 %v934_v16, %v931_v22  ;;  %v1652_v16 = vpop.eup %1651 }
 0x41e   : >> { %v914_v29 = vadd.f32 %v913_v15, %v912_v23  ;;  %v1023_v15 = vrot.slane %v2314_v62, %v1022_v11  ;;  %v1045_v23 = vsub.s32 6, %v2300_v43 }
 0x420   : >> { %v937_v31 = vmul.f32 %v1644_v24, %v914_v29  ;;  %v957_v33 = vpop.permute.xlu1 %956  ;;  %v1046_v28 = vrot.slane %v2314_v62, %v1045_v23 }
 0x421   : >> { %v959_v42 = vmul.f32 %v957_v33, %v954_v37 }
 0x422   : >> { %v938_v9 = vadd.f32 %v937_v31, %v936_v30  ;;  %v886_v30 = vmul.f32 %v870_v25, %v2216_v4  ;;  %v1654_v31 = vpop.eup %1653  ;;  %v1657_v4 = vld [vmem:[%s2463_s7] sm:$0xff] (%p745_p12)  }
 0x423   : > { %1464 = vmatpush3.bf16.msra.mxu0 (%p745_p12), %v1657_v4 }
 0x424   : >> { %v960_v41 = vmul.f32 %v1646_v36, %v938_v9  ;;  %v901_v36 = vmul.f32 1.442695, %v886_v30  ;;  %1465 = vmatprep.subr.bf16.mxu0 (%p745_p12), %v1899_v0  ;;  %v1109_v0 = vmul.f32 (%p745_p12), %v2201_v1, %v2260_v21 }
 0x425   : >> { %v980_v38 = vpop.permute.xlu1 %979 }
 0x426   : >> { %v961_v44 = vadd.f32 %v960_v41, %v959_v42  ;;  %v982_v57 = vmul.f32 %v980_v38, %v977_v51  ;;  %1655 = vpow2.f32 %v901_v36  ;;  %v1056_v42 = vpop.permute.xlu0 %1055 }
 0x428   : >> { %v983_v54 = vmul.f32 %v1648_v50, %v961_v44 }
 0x42a   : >> { %v1003_v49 = vpop.permute.xlu1 %1002  ;;  %v984_v59 = vadd.f32 %v983_v54, %v982_v57 }
 0x42b   : >> { %v1005_v8 = vmul.f32 %v1003_v49, %v1000_v60 }
 0x42c   : >> { %v1006_v10 = vmul.f32 %v1650_v61, %v984_v59 }
 0x42e   : >> { %v1007_v14 = vadd.f32 %v1006_v10, %v1005_v8 }
 0x42f   : >> { %v1026_v56 = vpop.permute.xlu1 %1025 }
 0x430   : >> { %v1028_v19 = vmul.f32 %v1026_v56, %v1023_v15  ;;  %v1029_v22 = vmul.f32 %v1652_v16, %v1007_v14 }
 0x432   : >> { %v1030_v27 = vadd.f32 %v1029_v22, %v1028_v19 }
 0x434   : >> { %v1049_v63 = vpop.permute.xlu1 %1048  ;;  %v1052_v35 = vmul.f32 %v1654_v31, %v1030_v27 }
 0x435   : >> { %v1051_v34 = vmul.f32 %v1049_v63, %v1046_v28  ;;  %v1656_v63 = vpop.eup %1655 }
 0x437   : >> { %v1053_v41 = vadd.f32 %v1052_v35, %v1051_v34 }
 0x439   : >> { %v1072_v12 = vpop.permute.xlu1 %1071  ;;  %v1058_v50 = vmul.f32 %v1056_v42, %v1053_v41  ;;  %v1075_v19 = vmul.f32 %v1656_v63, %v1053_v41 }
 0x43a   : >> { %v1074_v15 = vmul.f32 %v1072_v12, %v1069_v58 }
 0x43b   : >> { %v1059_v55 = vsel %vm414_vm1, %v1058_v50, 0.0 }
 0x43c   : >> { %v1060_v8 = vrot.slane %v1059_v55, 4 }
 0x43e   : >> { %v918_v24 = vpop.permute.xlu1 %917  ;;  %v1061_v25 = vadd.f32 %v1060_v8, %v1059_v55 }
 0x43f   : >> { %v920_v37 = vmul.f32 %v918_v24, %v914_v29 }
 0x441   : >> { %v921_v47 = vsel %vm414_vm1, %v920_v37, 0.0  ;;  %v1062_v37 = vrot.slane %v1061_v25, 2 }
 0x443   : >> { %v941_v32 = vpop.permute.xlu1 %940 }
 0x444   : >> { %v943_v33 = vmul.f32 %v941_v32, %v938_v9  ;;  %v922_v9 = vrot.slane %v921_v47, 4 }
 0x446   : >> { %v944_v39 = vsel %vm414_vm1, %v943_v33, 0.0  ;;  %v923_v56 = vadd.f32 %v922_v9, %v921_v47  ;;  %v1076_v33 = vadd.f32 %v1075_v19, %v1074_v15  }
 0x447   : >> { %v945_v46 = vrot.slane %v944_v39, 4 }
 0x448   : >> { %v964_v38 = vpop.permute.xlu1 %963  ;;  %v924_v43 = vrot.slane %v923_v56, 2  ;;  %1101 = vst.msk [vmem:[#allocation2] sm:$0xff] (%p745_p12), %vm414_vm1, %v1076_v33 }
 0x449   : >> { %v966_v40 = vmul.f32 %v964_v38, %v961_v44  ;;  %v946_v29 = vadd.f32 %v945_v46, %v944_v39 }
 0x44a   : >> { %v925_v62 = vadd.f32 %v924_v43, %v923_v56 }
 0x44b   : >> { %v967_v45 = vsel %vm414_vm1, %v966_v40, 0.0  ;;  %v947_v5 = vrot.slane %v946_v29, 2 }
 0x44c   : >> { %v968_v48 = vrot.slane %v967_v45, 4  ;;  %v926_v40 = vrot.slane %v925_v62, 1 }
 0x44d   : >> { %v987_v49 = vpop.permute.xlu1 %986  ;;  %v948_v22 = vadd.f32 %v947_v5, %v946_v29 }
 0x44e   : >> { %v989_v51 = vmul.f32 %v987_v49, %v984_v59  ;;  %v969_v54 = vadd.f32 %v968_v48, %v967_v45  ;;  %v1063_v48 = vadd.f32 %v1062_v37, %v1061_v25  ;;  %v927_v9 = vadd.f32 %v926_v40, %v925_v62  ;;  %v1658_v25 = vld [vmem:[%s2463_s7 + $0x8] sm:$0xff] (%p745_p12)  }
 0x44f   : >> { %v949_v34 = vrot.slane %v948_v22, 1  ;;  %1466 = vmatpush3.bf16.msra.mxu0 (%p745_p12), %v1658_v25 }
 0x450   : >> { %v990_v53 = vsel %vm414_vm1, %v989_v51, 0.0  ;;  %v970_v10 = vrot.slane %v969_v54, 2  ;;  %v1064_v55 = vrot.slane %v1063_v48, 1 }
 0x451   : >> { %v991_v44 = vrot.slane %v990_v53, 4  ;;  %v950_v45 = vadd.f32 %v949_v34, %v948_v22  ;;  %v1115_v34 = vrot.slane (%p745_p12), %v1109_v0, 5 }
 0x452   : >> { %v1010_v57 = vpop.permute.xlu1 %1009  ;;  %v971_v28 = vadd.f32 %v970_v10, %v969_v54  ;;  %v1065_v8 = vadd.f32 %v1064_v55, %v1063_v48 }
 0x453   : >> { %v992_v60 = vadd.f32 %v991_v44, %v990_v53  ;;  %v1012_v61 = vmul.f32 %v1010_v57, %v1007_v14  ;;  %v1090_v54 = vsel %vm1089_vm12, %v927_v9, %v950_v45  ;;  %v2490_v9 = vmov %v1076_v33 }
 0x454   : >> { %v972_v38 = vrot.slane %v971_v28, 1 }
 0x455   : >> { %v1013_v59 = vsel %vm414_vm1, %v1012_v61, 0.0  ;;  %v993_v11 = vrot.slane %v992_v60, 2 }
 0x456   : >> { %v1014_v13 = vrot.slane %v1013_v59, 4  ;;  %v973_v49 = vadd.f32 %v972_v38, %v971_v28 }
 0x457   : >> { %v1033_v16 = vpop.permute.xlu1 %1032  ;;  %v994_v30 = vadd.f32 %v993_v11, %v992_v60  ;;  %v1123_v11 = vsub.f32 (%p745_p12), 0.0, %v2237_v18 }
 0x458   : >> { %v1015_v23 = vadd.f32 %v1014_v13, %v1013_v59  ;;  %v1035_v24 = vmul.f32 %v1033_v16, %v1030_v27  ;;  %v1092_v56 = vsel %vm1091_vm13, %v1090_v54, %v973_v49  ;;  %v1124_v13 = vsub.f32 (%p745_p12), 0.0, %v2241_v26 }
 0x459   : >> { %v995_v41 = vrot.slane %v994_v30, 1  ;;  %v1125_v15 = vmul.f32 (%p745_p12), 1.442695, %v1123_v11 }
 0x45a   : >> { %v1016_v14 = vrot.slane %v1015_v23, 2  ;;  %v1036_v31 = vsel %vm414_vm1, %v1035_v24, 0.0  ;;  %v1127_v16 = vmul.f32 (%p745_p12), 1.442695, %v1124_v13 }
 0x45b   : >> { %v1037_v32 = vrot.slane %v1036_v31, 4  ;;  %v996_v51 = vadd.f32 %v995_v41, %v994_v30  ;;  %1659 = vpow2.f32 (%p745_p12), %v1125_v15 }
 0x45c   : >> { %v1017_v35 = vadd.f32 %v1016_v14, %v1015_v23  ;;  %v1079_v36 = vpop.permute.xlu1 %1078  ;;  %1661 = vpow2.f32 (%p745_p12), %v1127_v16 }
 0x45d   : >> { %v1038_v12 = vadd.f32 %v1037_v32, %v1036_v31  ;;  %v1081_v39 = vmul.f32 %v1079_v36, %v1076_v33  ;;  %v1093_v58 = vsel %vm721_vm6, %v1092_v56, %v996_v51  ;;  %v1108_v31 = vmul.f32 (%p745_p12), %v2201_v1, %v2256_v17 }
 0x45e   : >> { %v1018_v42 = vrot.slane %v1017_v35, 1  ;;  %v1110_v32 = vmul.f32 (%p745_p12), %v2201_v1, %v2258_v20 }
 0x45f   : >> { %v1039_v27 = vrot.slane %v1038_v12, 2  ;;  %v1082_v47 = vsel %vm414_vm1, %v1081_v39, 0.0  ;;  %v1114_v33 = vrot.slane (%p745_p12), %v1108_v31, 5 }
 0x460   : >> { %v1083_v46 = vrot.slane %v1082_v47, 4  ;;  %v1019_v29 = vadd.f32 %v1018_v42, %v1017_v35  ;;  %v1117_v35 = vrot.slane (%p745_p12), %v1110_v32, 5 }
 0x461   : >> { %v1040_v50 = vadd.f32 %v1039_v27, %v1038_v12 }
 0x462   : >> { %v1084_v52 = vadd.f32 %v1083_v46, %v1082_v47  ;;  %v1095_v61 = vsel %vm1094_vm14, %v1093_v58, %v1019_v29  ;;  %v1118_v38 = vsel (%p745_p12), %vm721_vm6, %v1115_v34, %v1117_v35 }
 0x463   : >> { %v1041_v53 = vrot.slane %v1040_v50, 1 }
 0x464   : >> { %v1085_v44 = vrot.slane %v1084_v52, 2 }
 0x465   : >> { %v1042_v57 = vadd.f32 %v1041_v53, %v1040_v50  ;;  %v1660_v19 = vpop.eup (%p745_p12), %1659 }
 0x466   : >> { %v1086_v60 = vadd.f32 %v1085_v44, %v1084_v52  ;;  %v1662_v22 = vpop.eup (%p745_p12), %1661  ;;  %v1129_v23 = vadd.f32 (%p745_p12), 1.0, %v1660_v19 }
 0x467   : >> { %v1096_v63 = vsel %vm545_vm5, %v1095_v61, %v1042_v57  ;;  %747 = sbr.rel (!%p745_p12) target bundleno = 792 (0x318), region = 128  ;;  %v1130_v24 = vadd.f32 (%p745_p12), 1.0, %v1662_v22 }
 0x468   : >> { %v1087_v5 = vrot.slane %v1086_v60, 1  ;;  %v1097_v59 = vsel %vm524_vm4, %v1096_v63, %v1065_v8  ;;  %1663 = vrcp.f32 (%p745_p12), %v1129_v23 }
 0x469   : > { %1665 = vrcp.f32 (%p745_p12), %v1130_v24 }
 0x46a   : >> { %v1088_v10 = vadd.f32 %v1087_v5, %v1086_v60 }
 0x46c   : >> { %v1098_v43 = vsel %vm501_vm3, %v1097_v59, %v1088_v10 }
 0x46d   : >> { %1100 = vst.msk [vmem:[%s1099_s9] sm:$0xff] %vm414_vm1, %v1098_v43  ;;  %s1252_s9 = scalar_lea.sflag (%p745_p12), [#allocation10], %s2173_s27 }
 0x472   : > { %v1664_v28 = vpop.eup %1663 }
 0x473   : > { %v1666_v62 = vpop.eup %1665  ;;  %v1135_v30 = vmul.f32 %v1664_v28, %v2237_v18  ;;  %v1116_v18 = vsel %vm721_vm6, %v1114_v33, %v1115_v34 }
 0x474   : > { %v1136_v14 = vmul.f32 %v1666_v62, %v2241_v26  ;;  %v1102_v36 = vld [vmem:[#allocation7] sm:$0xff]  ;;  %v1103_v37 = vld [vmem:[#allocation7 + $0x8] sm:$0xff] }
 0x475   : > { %1139 = vrot.lane.b32.xlu0 %v1135_v30, %s1912_s16  ;;  %v1121_v12 = vadd.f32 %v1116_v18, %v1102_v36  ;;  %v1122_v39 = vadd.f32 %v1118_v38, %v1103_v37 }
 0x479   : > { %1141 = vrot.lane.b32.xlu0 %v1136_v14, %s1912_s16 }
 0x4e7   : > { %v1140_v26 = vpop.permute.xlu0 %1139 }
 0x4e8   : > { %v1145_v17 = vmul.f32 %v1140_v26, %v1121_v12 }
 0x4eb   : > { %v1142_v40 = vpop.permute.xlu0 %1141 }
 0x4ec   : > { %v1146_v41 = vmul.f32 %v1142_v40, %v1122_v39 }
 0x4ee   : > { %v1147_v42 = vpack.c.bf16 %v1146_v41, %v1145_v17 }
 0x4f0   : > { %1468 = vmatmul.mubr.msk.bf16.vlgmr.msra.gmra.mrb[4].mxu0 %vm414_vm1, %v1147_v42 }
 0x5c3   : > { %v1201_v21 = vpop.f32.mrb[4].mxu0 }
 0x5c4   : > { %v1469_v1 = vpop.f32.mrb[5].mxu0  ;;  %v1208_v20 = vsel %vm433_vm2, %v1201_v21, 0.0 }
 0x5c5   : > { %1209 = vadd.xlane.f32.xlu1 %v1208_v20  ;;  %v1204_v27 = vpop.f32.mrb[6].mxu0 }
 0x5c6   : > { %v1470_v47 = vpop.f32.mrb[7].mxu0  ;;  %v1211_v45 = vsel %vm433_vm2, %v1204_v27, 0.0 }
 0x5c9   : > { %1212 = vadd.xlane.f32.xlu1 %v1211_v45 }
 0x652   : > { %v1210_v46 = vpop.xlane.xlu1 %1209 }
 0x653   : > { %v1215_v48 = vmul.f32 0.0625, %v1210_v46 }
 0x655   : > { %v1217_v49 = vsub.f32 %v1201_v21, %v1215_v48 }
 0x656   : > { %v1213_v50 = vpop.xlane.xlu1 %1212 }
 0x657   : > { %v1216_v9 = vmul.f32 0.0625, %v1213_v50  ;;  %v1219_v51 = vmul.f32 %v1217_v49, %v1217_v49 }
 0x659   : > { %v1218_v52 = vsub.f32 %v1204_v27, %v1216_v9  ;;  %v1221_v29 = vsel %vm433_vm2, %v1219_v51, 0.0 }
 0x65a   : > { %1222 = vadd.xlane.f32.xlu0 %v1221_v29 }
 0x65b   : > { %v1220_v53 = vmul.f32 %v1218_v52, %v1218_v52 }
 0x65d   : > { %v1224_v54 = vsel %vm433_vm2, %v1220_v53, 0.0 }
 0x65e   : > { %1225 = vadd.xlane.f32.xlu1 %v1224_v54 }
 0x6e7   : > { %v1223_v44 = vpop.xlane.xlu0 %1222 }
 0x6e8   : > { %v1227_v55 = vmul.f32 0.0625, %v1223_v44 }
 0x6ea   : > { %v1229_v56 = vadd.f32 1e-05, %v1227_v55 }
 0x6eb   : > { %v1226_v57 = vpop.xlane.xlu1 %1225 }
 0x6ec   : > { %1667 = vrsqrt.f32 %v1229_v56  ;;  %v1228_v58 = vmul.f32 0.0625, %v1226_v57 }
 0x6ee   : > { %v1230_v60 = vadd.f32 1e-05, %v1228_v58 }
 0x6f0   : > { %1669 = vrsqrt.f32 %v1230_v60 }
 0x6f6   : > { %v1668_v61 = vpop.eup %1667 }
 0x6f7   : > { %v1233_v63 = vmul.f32 %v1668_v61, %v1217_v49 }
 0x6f9   : > { %v1239_v5 = vmul.f32 %v2206_v2, %v1233_v63 }
 0x6fa   : > { %v1670_v8 = vpop.eup %1669 }
 0x6fb   : > { %v1234_v10 = vmul.f32 %v1670_v8, %v1218_v52  ;;  %v1245_v59 = vadd.f32 %v2211_v3, %v1239_v5 }
 0x6fd   : > { %v1240_v43 = vmul.f32 %v2206_v2, %v1234_v10  ;;  %v1247_v11 = vadd.f32 %v1245_v59, %v2221_v6 }
 0x6ff   : > { %v1246_v13 = vadd.f32 %v2211_v3, %v1240_v43  ;;  %1249 = vst.msk [vmem:[%s2283_s17] sm:$0xff] %vm433_vm2, %v1247_v11 }
 0x701   : > { %v1248_v2 = vadd.f32 %v1246_v13, %v2223_v7 }
 0x703   : > { %1250 = vst.msk [vmem:[%s2283_s17 + $0x8] sm:$0xff] %vm433_vm2, %v1248_v2 }
 0x704   : > { %1798 = shalt.err (!%p1795_p10)
}
 0x705   : > { %s1799_s17 = scalar_lea.hbm %s2402_s23, 256  ;;  %s1803_s25 = scalar_lea.hbm %s2492_s18, 512 }
 0x706   : > { %p1800_p13 = scmp.ne.s32.totalorder %s2402_s23, %s1799_s17  ;;  %p1804_p7 = scmp.lt.u32.totalorder %s2402_s23, %s2492_s18 }
 0x707   : > { %p1805_p11 = scmp.lt.u32.totalorder %s1803_s25, %s1799_s17  ;;  %p1807_p1 = scmp.lt.u32.totalorder %s1799_s17, %s2402_s23 }
 0x708   : > { %p1801_p9 = pnand %p1800_p13, %p2115_p2 }
 0x709   : > { %p1806_p12 = por %p1805_p11, %p1804_p7 }
 0x70a   : > { %p1802_p3 = pneg %p1801_p9 }
 0x70b   : > { %p1808_p4 = por %p1807_p1, %p1806_p12 }
 0x70d   : > { %p1809_p6 = pnand %p1808_p4, %p1802_p3 }
 0x70f   : > { %1812 = shalt.err (!%p1809_p6)
}
 0x710   : > { %s1914_s12 = smov 128   ;;  %s1915_s30 = smov 8  }
 0x711   : > { %1485 = dma.vmem_to_hbm [thread:$0]  (%p2115_p2), %s2404_s19, 256, %s2402_s23, %s1252_s9, %s1914_s12, %s1914_s12, %s1915_s30  }
 0x712 PF: > { %s2493_s28 = sld [smem:[#allocation21_spill]]  ;;  %s2494_s24 = sld [smem:[#allocation23_spill]] }
 0x713   : > { %p2496_p0 = scmp.ge.s32.totalorder %s1883_s14, 2 }
 0x718   : > { %s1282_s16 = sand.u32 1, %s2493_s28   ;;  %p2495_p8 = scmp.ne.s32.totalorder %s2494_s24, 0 }
 0x719   : > { %s1283_s17 = scalar_lea.sflag [#allocation10], %s1282_s16 }
 0x71a   : > { %p1502_p5 = pnand %p2496_p0, %p2495_p8 }
 0x71c   : > { %1858 = dma.done.wait (!%p1502_p5), %s1283_s17, 256  }
 0x71d   : > { %1860 = vsyncadd (!%p1502_p5), %s1283_s17, 4294967040  ;;  %s27_s14 = sadd.s32 1, %s1883_s14   ;;  %s2497_s30 = smov %s1867_s10 }
 0x71e   : > { %p24_p10 = scmp.ge.s32.totalorder %s27_s14, 4   ;;  %s2498_s10 = smov %s1871_s11 }
 0x71f   : > { %s2499_s11 = smov %s2127_s22  ;;  %s2500_s12 = smov %s1879_s13 }
 0x720   : > { %s2501_s13 = smov %s2503_s20  ;;  %26 = sbr.rel (!%p24_p10) target bundleno = 10 (0xa), region = 139 }
 0x727   :  { %1288 = vsyncpa [#allocation9], 1 }
 0x728   :  { %1290 = vsyncpa [#allocation9 + $0x1], 1 }
 0x729   :  { %1291 = vsyncpa [#allocation12], 1 }
 0x72a   :  { %1292 = vsyncpa [#allocation15], 1 }
 0x72b   :  { %1293 = vsyncpa [#allocation10], 1 }
 0x72c   :  { %1295 = vsyncpa [#allocation10 + $0x1], 1 }

</bundles_post_ra>
